<compile_context>
chip_gen: v7x
topology: tpu7x:2x2x1
jax: 0.10.0
libtpu: 0.0.40
codegen_flags: <defaults>
</compile_context>

<pallas_src>
from functools import partial

import jax
import jax.numpy as jnp
from jax.experimental import pallas as pl
from jax.experimental.pallas import tpu as pltpu


def _attention_kernel(x_ref, wqkv_ref, wo_ref, bias_ref, o_ref, *,
                      heads, dim_head, n_pad, compute_dtype):
    """One grid step = w_tile windows, flattened along rows.

    x_ref    : (w_tile * n_pad, dim)   compute_dtype
    wqkv_ref : (dim, 3*dim)            compute_dtype  (q scale pre-folded)
    wo_ref   : (dim, dim)              compute_dtype
    bias_ref : (heads, n_pad, n_pad)   f32 (-1e9 on padded rows/cols)
    o_ref    : (w_tile * n_pad, dim)   f32
    """
    rows, dim = x_ref.shape
    w_tile = rows // n_pad
    exact_f32 = jnp.dtype(compute_dtype) == jnp.dtype(jnp.float32)

    x = x_ref[...].astype(compute_dtype)

    # Fused Q/K/V projection across q/k/v AND all heads:
    # a single MXU matmul with M = w_tile*n_pad rows and N = 3*dim lanes.
    qkv = jnp.dot(x, wqkv_ref[...], preferred_element_type=compute_dtype)
    qkv = qkv.reshape(w_tile, n_pad, 3 * dim)        # leading-dim split (n_pad % 8 == 0)

    # TODO(synk): if heads grows beyond ~4, switch this static unroll to
    # lax.fori_loop (or an inner 'arbitrary' grid axis) to bound live ranges.
    head_outs = []
    for h in range(heads):
        lo = h * dim_head
        q = qkv[:, :, lo:lo + dim_head]                          # (w, n_pad, dh)
        k = qkv[:, :, dim + lo:dim + lo + dim_head]
        v = qkv[:, :, 2 * dim + lo:2 * dim + lo + dim_head]

        # attention logits + relative positional bias, f32 accumulation
        sim = jnp.einsum('wid,wjd->wij', q, k, preferred_element_type=jnp.float32)
        sim = sim + bias_ref[h]                                  # broadcast over windows

        # numerically-stable softmax in f32
        sim = sim - jnp.max(sim, axis=-1, keepdims=True)
        p = jnp.exp(sim)
        denom = jnp.sum(p, axis=-1, keepdims=True)
        if exact_f32:
            attn = p / denom                                     # exact on the f32 path
        else:
            attn = p * pl.reciprocal(denom, approx=True)         # rides the EUP slot

        oh = jnp.einsum('wij,wjd->wid', attn.astype(compute_dtype), v,
                        preferred_element_type=compute_dtype)    # (w, n_pad, dh)
        head_outs.append(oh)

    # head concat folded into ONE final output-projection matmul.
    merged = jnp.concatenate(head_outs, axis=-1).reshape(rows, dim)
    o_ref[...] = jnp.dot(merged, wo_ref[...],
                         preferred_element_type=jnp.float32).astype(o_ref.dtype)


def _round_up(x, m):
    return ((x + m - 1) // m) * m


def _pick_w_tile(num_windows, n_pad, dim, itemsize, *,
                 target_bytes=2 << 20, max_tile=128):
    """Largest window-tile whose x block stays near target_bytes, while keeping
    >=2 grid steps (so both v7x TensorCores get work) when possible."""
    per_window = n_pad * dim * itemsize
    cap = int(max(1, min(max_tile, target_bytes // per_window)))
    if num_windows >= 2:
        cap = min(cap, max(1, pl.cdiv(num_windows, 2)))
    return int(max(1, min(cap, num_windows)))


def attention_forward(x, w_qkv, w_out, rel_pos_bias_table, rel_pos_indices,
                      *, dim_head, compute_dtype=jnp.bfloat16):
    """x: (b, H, W, wh, ww, dim) float32.  Returns same shape (float32)."""
    b, H, W, wh, ww, dim = x.shape
    heads = dim // dim_head
    scale = dim_head ** -0.5
    n = wh * ww
    n_pad = _round_up(n, 8)
    B = b * H * W

    # relative positional bias, gathered once per call (plain JAX glue).
    bias = rel_pos_bias_table[rel_pos_indices]                       # (n, n, heads)
    bias = jnp.transpose(bias, (2, 0, 1)).astype(jnp.float32)        # (heads, n, n)
    bias_p = jnp.full((heads, n_pad, n_pad), -1e9, jnp.float32)
    bias_p = bias_p.at[:, :n, :n].set(bias)                          # mask padded keys

    # fused qkv weight (q scale folded into the q columns); output projection.
    wqkv = jnp.concatenate([w_qkv[:, :dim] * scale, w_qkv[:, dim:]], axis=1)
    wqkv = wqkv.astype(compute_dtype)                                # (dim, 3*dim)
    wo = w_out.astype(compute_dtype)                                 # (dim, dim)

    itemsize = jnp.dtype(compute_dtype).itemsize
    w_tile = _pick_w_tile(B, n_pad, dim, itemsize)
    B_pad = _round_up(B, w_tile)
    grid = (B_pad // w_tile,)

    x_flat = x.reshape(B, n, dim)
    x_flat = jnp.pad(x_flat, ((0, B_pad - B), (0, n_pad - n), (0, 0)))
    x2d = x_flat.reshape(B_pad * n_pad, dim).astype(compute_dtype)

    kernel = partial(_attention_kernel, heads=heads, dim_head=dim_head,
                     n_pad=n_pad, compute_dtype=compute_dtype)

    flops_per_window = (2 * n_pad * dim * 3 * dim                    # fused qkv projection
                        + heads * 4 * n_pad * n_pad * dim_head       # q@k^T and attn@v
                        + 2 * n_pad * dim * dim)                     # output projection
    cost = pl.CostEstimate(
        flops=int(B_pad * flops_per_window),
        transcendentals=int(B_pad * heads * n_pad * n_pad),
        bytes_accessed=int(B_pad * n_pad * dim * (itemsize + 4)
                           + 4 * dim * dim * itemsize
                           + heads * n_pad * n_pad * 4))

    out2d = pl.pallas_call(
        kernel,
        out_shape=jax.ShapeDtypeStruct((B_pad * n_pad, dim), jnp.float32),
        grid_spec=pltpu.PrefetchScalarGridSpec(
            num_scalar_prefetch=0,
            grid=grid,
            in_specs=[
                pl.BlockSpec((w_tile * n_pad, dim), lambda i: (i, 0)),
                pl.BlockSpec((dim, 3 * dim), lambda i: (0, 0)),
                pl.BlockSpec((dim, dim), lambda i: (0, 0)),
                pl.BlockSpec((heads, n_pad, n_pad), lambda i: (0, 0, 0)),
            ],
            out_specs=pl.BlockSpec((w_tile * n_pad, dim), lambda i: (i, 0)),
        ),
        compiler_params=pltpu.CompilerParams(
            dimension_semantics=("parallel",),
            vmem_limit_bytes=48 * 1024 * 1024),
        cost_estimate=cost,
    )(x2d, wqkv, wo, bias_p)

    out = out2d.reshape(B_pad, n_pad, dim)[:B, :n, :]
    return out.reshape(b, H, W, wh, ww, dim)


def make_rel_pos_indices(window_height, window_width):
    """Mirror of the torch buffer construction."""
    pos_h = jnp.arange(window_height)
    pos_w = jnp.arange(window_width)
    gh, gw = jnp.meshgrid(pos_h, pos_w, indexing="ij")          # (wh, ww) each
    grid = jnp.stack([gh, gw], axis=0)                          # (2, wh, ww)
    grid = grid.reshape(2, -1).T                                # (wh*ww, 2)  'c i j -> (i j) c'
    rel_pos = grid[:, None, :] - grid[None, :, :]               # (n, n, 2)
    rel_pos = rel_pos + jnp.array([window_height - 1, window_width - 1])
    rel_pos_indices = (rel_pos * jnp.array([2 * window_width - 1, 1])).sum(axis=-1)
    return rel_pos_indices.astype(jnp.int32)                    # (n, n)


def reference_forward(x, w_qkv, w_out, rel_pos_bias_table, rel_pos_indices,
                      *, dim_head):
    """Pure-JAX f32 reference for validation."""
    b, H, W, wh, ww, dim = x.shape
    heads = dim // dim_head
    scale = dim_head ** -0.5
    n = wh * ww
    B = b * H * W

    xf = x.reshape(B, n, dim)
    qkv = xf @ w_qkv                                            # (B, n, 3*dim)
    q, k, v = jnp.split(qkv, 3, axis=-1)

    def split_heads(t):
        return jnp.transpose(t.reshape(B, n, heads, dim_head), (0, 2, 1, 3))

    q, k, v = map(split_heads, (q, k, v))
    q = q * scale
    sim = jnp.einsum("bhid,bhjd->bhij", q, k)
    bias = jnp.transpose(rel_pos_bias_table[rel_pos_indices], (2, 0, 1))  # (h, n, n)
    sim = sim + bias[None]
    attn = jax.nn.softmax(sim, axis=-1)
    out = jnp.einsum("bhij,bhjd->bhid", attn, v)
    out = jnp.transpose(out, (0, 2, 1, 3)).reshape(B, n, dim)
    out = out @ w_out
    return out.reshape(b, H, W, wh, ww, dim)


if __name__ == "__main__":
    # small but module-consistent shapes
    batch, height, width = 2, 2, 2
    window_height, window_width = 6, 10
    dim, dim_head = 64, 32
    heads = dim // dim_head

    key = jax.random.PRNGKey(0)
    kx, kqkv, kout, kemb = jax.random.split(key, 4)

    x = jax.random.normal(
        kx, (batch, height, width, window_height, window_width, dim), dtype=jnp.float32)
    # deterministic synthetic parameters (nn.Linear(dim, 3*dim, bias=False) etc.)
    w_qkv = jax.random.normal(kqkv, (dim, 3 * dim), dtype=jnp.float32) * 0.05
    w_out = jax.random.normal(kout, (dim, dim), dtype=jnp.float32) * 0.05
    rel_pos_bias_table = jax.random.normal(
        kemb, ((2 * window_height - 1) * (2 * window_width - 1), heads),
        dtype=jnp.float32) * 0.02
    rel_pos_indices = make_rel_pos_indices(window_height, window_width)

    ref = reference_forward(x, w_qkv, w_out, rel_pos_bias_table, rel_pos_indices,
                            dim_head=dim_head)

    # 1) f32 compute path: tight check of the math against the pure-JAX reference.
    out_f32 = attention_forward(x, w_qkv, w_out, rel_pos_bias_table, rel_pos_indices,
                                dim_head=dim_head, compute_dtype=jnp.float32)
    out_f32 = jax.block_until_ready(out_f32)
    assert out_f32.shape == (batch, height, width, window_height, window_width, dim)
    assert jnp.allclose(out_f32, ref, atol=1e-3, rtol=1e-3), "f32 kernel mismatch vs reference"

    # 2) bf16-MXU path (default perf configuration for v6e/v7x): looser tolerance.
    out_bf16 = attention_forward(x, w_qkv, w_out, rel_pos_bias_table, rel_pos_indices,
                                 dim_head=dim_head)
    out_bf16 = jax.block_until_ready(out_bf16)
    assert out_bf16.shape == (batch, height, width, window_height, window_width, dim)
    assert jnp.allclose(out_bf16, ref, atol=3e-2, rtol=3e-2), "bf16 kernel mismatch vs reference"

    print("KERNEL_OK")
</pallas_src>

<mosaic_0001>
module attributes {stable_mosaic.version = 11 : i64} {
  func.func @_attention_kernel(%arg0: i32, %arg1: memref<256x64xf32, #tpu.memory_space<vmem>>, %arg2: memref<64x192xf32, #tpu.memory_space<vmem>>, %arg3: memref<64x64xf32, #tpu.memory_space<vmem>>, %arg4: memref<2x64x64xf32, #tpu.memory_space<vmem>>, %arg5: memref<256x64xf32, #tpu.memory_space<vmem>>) attributes {dimension_semantics = [#tpu.dimension_semantics<parallel>], iteration_bounds = array<i64: 2>, scalar_prefetch = 0 : i64, scratch_operands = 0 : i64, tpu.core_type = #tpu.core_type<tc>, window_params = [{transform_indices = @transform_0, window_bounds = array<i64: 256, 64>}, {pipeline_mode = #tpu.pipeline_mode<synchronous>, transform_indices = @transform_1, window_bounds = array<i64: 64, 192>}, {pipeline_mode = #tpu.pipeline_mode<synchronous>, transform_indices = @transform_2, window_bounds = array<i64: 64, 64>}, {pipeline_mode = #tpu.pipeline_mode<synchronous>, transform_indices = @transform_3, window_bounds = array<i64: 2, 64, 64>}, {transform_indices = @transform_4, window_bounds = array<i64: 256, 64>}]} {
    %c0 = arith.constant 0 : index
    %c0_0 = arith.constant 0 : index
    %0 = vector.load %arg1[%c0, %c0_0] : memref<256x64xf32, #tpu.memory_space<vmem>>, vector<256x64xf32>
    %c0_1 = arith.constant 0 : index
    %c0_2 = arith.constant 0 : index
    %1 = vector.load %arg2[%c0_1, %c0_2] : memref<64x192xf32, #tpu.memory_space<vmem>>, vector<64x192xf32>
    %cst = arith.constant dense<0.000000e+00> : vector<256x192xf32>
    %2 = tpu.matmul %0, %1, %cst {dimension_numbers = #tpu.dot_dimension_numbers<[1], [0], [0], [1], [0, 0, 1, 1], [], []>} : vector<256x64xf32>, vector<64x192xf32>, vector<256x192xf32> -> vector<256x192xf32>
    %3 = vector.shape_cast %2 : vector<256x192xf32> to vector<4x64x192xf32>
    %4 = vector.extract_strided_slice %3 {offsets = [0, 0, 0], sizes = [4, 64, 32], strides = [1, 1, 1]} : vector<4x64x192xf32> to vector<4x64x32xf32>
    %5 = vector.extract_strided_slice %3 {offsets = [0, 0, 64], sizes = [4, 64, 32], strides = [1, 1, 1]} : vector<4x64x192xf32> to vector<4x64x32xf32>
    %6 = vector.extract_strided_slice %3 {offsets = [0, 0, 128], sizes = [4, 64, 32], strides = [1, 1, 1]} : vector<4x64x192xf32> to vector<4x64x32xf32>
    "tpu.trace_start"() <{level = 10 : i32, message = "wid,wjd->wij"}> : () -> ()
    %cst_3 = arith.constant dense<0.000000e+00> : vector<4x64x64xf32>
    %7 = tpu.matmul %4, %5, %cst_3 {dimension_numbers = #tpu.dot_dimension_numbers<[2], [2], [1], [1], [0, 0, 0, 1, 1, 1], [0], [0]>} : vector<4x64x32xf32>, vector<4x64x32xf32>, vector<4x64x64xf32> -> vector<4x64x64xf32>
    "tpu.trace_stop"() : () -> ()
    %c0_4 = arith.constant 0 : index
    %c0_5 = arith.constant 0 : index
    %c0_6 = arith.constant 0 : index
    %8 = vector.load %arg4[%c0_4, %c0_5, %c0_6] : memref<2x64x64xf32, #tpu.memory_space<vmem>>, vector<1x64x64xf32>
    %9 = vector.shape_cast %8 : vector<1x64x64xf32> to vector<64x64xf32>
    %10 = vector.shape_cast %9 : vector<64x64xf32> to vector<1x64x64xf32>
    %11 = vector.broadcast %10 : vector<1x64x64xf32> to vector<4x64x64xf32>
    %12 = arith.addf %7, %11 : vector<4x64x64xf32>
    %cst_7 = arith.constant dense<0xFF800000> : vector<4x64xf32>
    %13 = vector.multi_reduction <maximumf>, %12, %cst_7 [2] : vector<4x64x64xf32> to vector<4x64xf32>
    %14 = vector.shape_cast %13 : vector<4x64xf32> to vector<4x64x1xf32>
    %15 = vector.broadcast %14 : vector<4x64x1xf32> to vector<4x64x64xf32>
    %16 = arith.subf %12, %15 : vector<4x64x64xf32>
    %17 = math.exp %16 : vector<4x64x64xf32>
    %cst_8 = arith.constant dense<0.000000e+00> : vector<4x64xf32>
    %18 = vector.multi_reduction <add>, %17, %cst_8 [2] : vector<4x64x64xf32> to vector<4x64xf32>
    %19 = vector.shape_cast %18 : vector<4x64xf32> to vector<4x64x1xf32>
    %20 = vector.broadcast %19 : vector<4x64x1xf32> to vector<4x64x64xf32>
    %21 = arith.divf %17, %20 : vector<4x64x64xf32>
    "tpu.trace_start"() <{level = 10 : i32, message = "wij,wjd->wid"}> : () -> ()
    %cst_9 = arith.constant dense<0.000000e+00> : vector<4x64x32xf32>
    %22 = tpu.matmul %21, %6, %cst_9 {dimension_numbers = #tpu.dot_dimension_numbers<[2], [1], [1], [2], [0, 0, 0, 1, 1, 2], [0], [0]>} : vector<4x64x64xf32>, vector<4x64x32xf32>, vector<4x64x32xf32> -> vector<4x64x32xf32>
    "tpu.trace_stop"() : () -> ()
    %23 = vector.extract_strided_slice %3 {offsets = [0, 0, 32], sizes = [4, 64, 32], strides = [1, 1, 1]} : vector<4x64x192xf32> to vector<4x64x32xf32>
    %24 = vector.extract_strided_slice %3 {offsets = [0, 0, 96], sizes = [4, 64, 32], strides = [1, 1, 1]} : vector<4x64x192xf32> to vector<4x64x32xf32>
    %25 = vector.extract_strided_slice %3 {offsets = [0, 0, 160], sizes = [4, 64, 32], strides = [1, 1, 1]} : vector<4x64x192xf32> to vector<4x64x32xf32>
    "tpu.trace_start"() <{level = 10 : i32, message = "wid,wjd->wij"}> : () -> ()
    %cst_10 = arith.constant dense<0.000000e+00> : vector<4x64x64xf32>
    %26 = tpu.matmul %23, %24, %cst_10 {dimension_numbers = #tpu.dot_dimension_numbers<[2], [2], [1], [1], [0, 0, 0, 1, 1, 1], [0], [0]>} : vector<4x64x32xf32>, vector<4x64x32xf32>, vector<4x64x64xf32> -> vector<4x64x64xf32>
    "tpu.trace_stop"() : () -> ()
    %c1 = arith.constant 1 : index
    %c0_11 = arith.constant 0 : index
    %c0_12 = arith.constant 0 : index
    %27 = vector.load %arg4[%c1, %c0_11, %c0_12] : memref<2x64x64xf32, #tpu.memory_space<vmem>>, vector<1x64x64xf32>
    %28 = vector.shape_cast %27 : vector<1x64x64xf32> to vector<64x64xf32>
    %29 = vector.shape_cast %28 : vector<64x64xf32> to vector<1x64x64xf32>
    %30 = vector.broadcast %29 : vector<1x64x64xf32> to vector<4x64x64xf32>
    %31 = arith.addf %26, %30 : vector<4x64x64xf32>
    %cst_13 = arith.constant dense<0xFF800000> : vector<4x64xf32>
    %32 = vector.multi_reduction <maximumf>, %31, %cst_13 [2] : vector<4x64x64xf32> to vector<4x64xf32>
    %33 = vector.shape_cast %32 : vector<4x64xf32> to vector<4x64x1xf32>
    %34 = vector.broadcast %33 : vector<4x64x1xf32> to vector<4x64x64xf32>
    %35 = arith.subf %31, %34 : vector<4x64x64xf32>
    %36 = math.exp %35 : vector<4x64x64xf32>
    %cst_14 = arith.constant dense<0.000000e+00> : vector<4x64xf32>
    %37 = vector.multi_reduction <add>, %36, %cst_14 [2] : vector<4x64x64xf32> to vector<4x64xf32>
    %38 = vector.shape_cast %37 : vector<4x64xf32> to vector<4x64x1xf32>
    %39 = vector.broadcast %38 : vector<4x64x1xf32> to vector<4x64x64xf32>
    %40 = arith.divf %36, %39 : vector<4x64x64xf32>
    "tpu.trace_start"() <{level = 10 : i32, message = "wij,wjd->wid"}> : () -> ()
    %cst_15 = arith.constant dense<0.000000e+00> : vector<4x64x32xf32>
    %41 = tpu.matmul %40, %25, %cst_15 {dimension_numbers = #tpu.dot_dimension_numbers<[2], [1], [1], [2], [0, 0, 0, 1, 1, 2], [0], [0]>} : vector<4x64x64xf32>, vector<4x64x32xf32>, vector<4x64x32xf32> -> vector<4x64x32xf32>
    "tpu.trace_stop"() : () -> ()
    %42 = tpu.concatenate %22, %41 in 2 : vector<4x64x32xf32>, vector<4x64x32xf32> -> vector<4x64x64xf32>
    %43 = vector.shape_cast %42 : vector<4x64x64xf32> to vector<256x64xf32>
    %c0_16 = arith.constant 0 : index
    %c0_17 = arith.constant 0 : index
    %44 = vector.load %arg3[%c0_16, %c0_17] : memref<64x64xf32, #tpu.memory_space<vmem>>, vector<64x64xf32>
    %cst_18 = arith.constant dense<0.000000e+00> : vector<256x64xf32>
    %45 = tpu.matmul %43, %44, %cst_18 {dimension_numbers = #tpu.dot_dimension_numbers<[1], [0], [0], [1], [0, 0, 1, 1], [], []>} : vector<256x64xf32>, vector<64x64xf32>, vector<256x64xf32> -> vector<256x64xf32>
    %c0_19 = arith.constant 0 : index
    %c0_20 = arith.constant 0 : index
    %46 = vector.load %arg5[%c0_19, %c0_20] : memref<256x64xf32, #tpu.memory_space<vmem>>, vector<256x64xf32>
    tpu.vector_store %arg5[%c0_19, %c0_20], %45 {strides = array<i32>} : memref<256x64xf32, #tpu.memory_space<vmem>>, vector<256x64xf32>,
    return
  }
  func.func @transform_0(%arg0: i32) -> (i32, i32) {
    %c0_i32 = arith.constant 0 : i32
    %c0_i32_0 = arith.constant 0 : i32
    return %arg0, %c0_i32 : i32, i32
  }
  func.func @transform_1(%arg0: i32) -> (i32, i32) {
    %c0_i32 = arith.constant 0 : i32
    %c0_i32_0 = arith.constant 0 : i32
    %c0_i32_1 = arith.constant 0 : i32
    return %c0_i32, %c0_i32_0 : i32, i32
  }
  func.func @transform_2(%arg0: i32) -> (i32, i32) {
    %c0_i32 = arith.constant 0 : i32
    %c0_i32_0 = arith.constant 0 : i32
    %c0_i32_1 = arith.constant 0 : i32
    return %c0_i32, %c0_i32_0 : i32, i32
  }
  func.func @transform_3(%arg0: i32) -> (i32, i32, i32) {
    %c0_i32 = arith.constant 0 : i32
    %c0_i32_0 = arith.constant 0 : i32
    %c0_i32_1 = arith.constant 0 : i32
    %c0_i32_2 = arith.constant 0 : i32
    return %c0_i32, %c0_i32_0, %c0_i32_1 : i32, i32, i32
  }
  func.func @transform_4(%arg0: i32) -> (i32, i32) {
    %c0_i32 = arith.constant 0 : i32
    %c0_i32_0 = arith.constant 0 : i32
    return %arg0, %c0_i32 : i32, i32
  }
}

</mosaic_0001>

<bundles_post_ra>
// kernel: tpu_custom_call.1
= control target key start
LH: loop header
LB: loop body
LE: loop exit
PB: predicated region body
PF: predicated region fallthrough
CT: control target
= control target key end

     0   :  { %s6370_s15 = smov 0   ;;  %s8508_s0 = inlined_call_operand.vmem [shape: f32[512,64], index: 0, kind: input, shape index: {}]   ;;  %s8509_s1 = inlined_call_operand.vmem [shape: f32[64,192], index: 1, kind: input, shape index: {}]   ;;  %s8510_s2 = inlined_call_operand.vmem [shape: f32[64,64], index: 2, kind: input, shape index: {}]   ;;  %s8511_s3 = inlined_call_operand.vmem [shape: f32[2,64,64], index: 3, kind: input, shape index: {}]   ;;  %s8512_s4 = inlined_call_operand.vmem [shape: f32[512,64], index: 4, kind: output, shape index: {}]  }
   0x1 LB: > { %s4382_s16 = sadd.s32 4294967295, %s6339_s15   ;;  %p4386_p0 = scmp.ge.s32.totalorder %s6339_s15, 1  ;;  %s6339_s15 = sphi %s6370_s15, %s14_s15  }
   0x2   : > { %p163_p1 = scmp.lt.s32.totalorder %s6339_s15, 3 }
   0x4   : > { %p164_p2 = pnand %p4386_p0, %p163_p1 }
   0x6   : > { %167 = sbr.rel (%p164_p2) target bundleno = 2321 (0x911), region = 36 }
   0xd   : > { %v234_v0 = vld [vmem:[%s8509_s1 + $0x8] sm:$0xff]  ;;  %v236_v1 = vld [vmem:[%s8509_s1 + $0x18] sm:$0xff]  ;;  %v233_v2 = vld [vmem:[%s8509_s1] sm:$0xff]  ;;  %s4387_s23 = sshll.u32 %s4382_s16, 5  ;;  %v6341_v7 = vmov 0.0   ;;  %vm249_vm0 = vcmask 523264  }
   0xe   : > { %v5465_v3 = vpack.c.bf16 %v236_v1, %v234_v0  ;;  %v235_v4 = vld [vmem:[%s8509_s1 + $0x10] sm:$0xff]  ;;  %v238_v5 = vld [vmem:[%s8509_s1 + $0x28] sm:$0xff]  ;;  %v240_v6 = vld [vmem:[%s8509_s1 + $0x38] sm:$0xff]  ;;  %410 = vmatprep.mubr.f32.mxu0 %v6341_v7  ;;  %542 = vmatprep.mubr.f32.mxu1 %v6341_v7  ;;  %p190_p3 = scmp.lt.s32.totalorder %s4387_s23, 63  ;;  %vm635_vm1 = vcmask 261120   ;;  %s6342_s30 = smov 64  }
   0xf   : > { %v5467_v8 = vpack.c.bf16 %v235_v4, %v233_v2  ;;  %v5469_v9 = vpack.c.bf16 %v240_v6, %v238_v5  ;;  %v237_v10 = vld [vmem:[%s8509_s1 + $0x20] sm:$0xff]  ;;  %v239_v11 = vld [vmem:[%s8509_s1 + $0x30] sm:$0xff]  ;;  %v242_v12 = vld [vmem:[%s8509_s1 + $0x48] sm:$0xff]  ;;  %s6343_s5 = smov 32   ;;  %s6344_s6 = smov 96  }
  0x10   : > { %5466 = vmatprep.subr.bf16.mxu0 %v5465_v3  ;;  %v244_v13 = vld [vmem:[%s8509_s1 + $0x58] sm:$0xff]  ;;  %5817 = vmatprep.subr.bf16.mxu1 %v5465_v3  ;;  %v5471_v14 = vpack.c.bf16 %v239_v11, %v237_v10  ;;  %v241_v16 = vld [vmem:[%s8509_s1 + $0x40] sm:$0xff]  ;;  %v243_v17 = vld [vmem:[%s8509_s1 + $0x50] sm:$0xff]  ;;  %s8779_s23 = smov (!%p190_p3, %s4387_s23), 63 }
  0x11   : > { %5468 = vmatpush1.bf16.msra.mxu0 %v5467_v8  ;;  %5821 = vmatpush1.bf16.msra.mxu1 %v5467_v8  ;;  %v5473_v15 = vpack.c.bf16 %v244_v13, %v242_v12  ;;  %v246_v18 = vld [vmem:[%s8509_s1 + $0x68] sm:$0xff]  ;;  %v248_v19 = vld [vmem:[%s8509_s1 + $0x78] sm:$0xff]  ;;  %v5475_v20 = vpack.c.bf16 %v243_v17, %v241_v16  ;;  %v245_v22 = vld [vmem:[%s8509_s1 + $0x60] sm:$0xff]  ;;  %s4388_s26 = sshll.u32 %s8779_s23, 3 }
  0x12   : > { %5470 = vmatprep.subr.bf16.mxu0 %v5469_v9  ;;  %5818 = vmatprep.subr.bf16.mxu1 %v5469_v9  ;;  %v5477_v21 = vpack.c.bf16 %v248_v19, %v246_v18  ;;  %v247_v23 = vld [vmem:[%s8509_s1 + $0x70] sm:$0xff]  ;;  %s6437_s29 = scalar_lea.vmem %s8508_s0, %s4388_s26  ;;  %vm6857_vm2 = vmpackc.low %vm635_vm1, %vm635_vm1  ;;  %s8439_s13 = scalar_lea.vmem %s8512_s4, %s4388_s26 }
  0x13   : > { %v5479_v24 = vpack.c.bf16 %v247_v23, %v245_v22  ;;  %v201_v25 = vld [vmem:[%s6437_s29] sm:$0xff]  ;;  %v223_v26 = vld [vmem:[%s6437_s29 + $0xb0] sm:$0xff]  ;;  %v202_v27 = vld [vmem:[%s6437_s29 + $0x8] sm:$0xff] }
  0x14   : > { %v224_v28 = vld [vmem:[%s6437_s29 + $0xb8] sm:$0xff]  ;;  %v203_v29 = vld [vmem:[%s6437_s29 + $0x10] sm:$0xff]  ;;  %v225_v30 = vld [vmem:[%s6437_s29 + $0xc0] sm:$0xff] }
  0x15   : > { %5472 = vmatpush1.bf16.msra.mxu0 %v5471_v14  ;;  %5822 = vmatpush1.bf16.msra.mxu1 %v5471_v14  ;;  %v204_v31 = vld [vmem:[%s6437_s29 + $0x18] sm:$0xff]  ;;  %v226_v32 = vld [vmem:[%s6437_s29 + $0xc8] sm:$0xff]  ;;  %v205_v33 = vld [vmem:[%s6437_s29 + $0x20] sm:$0xff] }
  0x16   : > { %5474 = vmatprep.subr.bf16.mxu0 %v5473_v15  ;;  %5819 = vmatprep.subr.bf16.mxu1 %v5473_v15  ;;  %v227_v34 = vld [vmem:[%s6437_s29 + $0xd0] sm:$0xff]  ;;  %v206_v35 = vld [vmem:[%s6437_s29 + $0x28] sm:$0xff]  ;;  %v228_v36 = vld [vmem:[%s6437_s29 + $0xd8] sm:$0xff] }
  0x17   : > { %v207_v37 = vld [vmem:[%s6437_s29 + $0x30] sm:$0xff]  ;;  %v229_v38 = vld [vmem:[%s6437_s29 + $0xe0] sm:$0xff]  ;;  %v208_v39 = vld [vmem:[%s6437_s29 + $0x38] sm:$0xff] }
  0x18   : > { %v230_v40 = vld [vmem:[%s6437_s29 + $0xe8] sm:$0xff]  ;;  %v209_v41 = vld [vmem:[%s6437_s29 + $0x40] sm:$0xff]  ;;  %v231_v42 = vld [vmem:[%s6437_s29 + $0xf0] sm:$0xff] }
  0x19   : > { %5476 = vmatpush1.bf16.msra.mxu0 %v5475_v20  ;;  %5823 = vmatpush1.bf16.msra.mxu1 %v5475_v20  ;;  %v210_v43 = vld [vmem:[%s6437_s29 + $0x48] sm:$0xff]  ;;  %v232_v44 = vld [vmem:[%s6437_s29 + $0xf8] sm:$0xff]  ;;  %v211_v45 = vld [vmem:[%s6437_s29 + $0x50] sm:$0xff] }
  0x1a   : > { %5478 = vmatprep.subr.bf16.mxu0 %v5477_v21  ;;  %5820 = vmatprep.subr.bf16.mxu1 %v5477_v21  ;;  %v212_v46 = vld [vmem:[%s6437_s29 + $0x58] sm:$0xff]  ;;  %v213_v47 = vld [vmem:[%s6437_s29 + $0x60] sm:$0xff]  ;;  %v214_v48 = vld [vmem:[%s6437_s29 + $0x68] sm:$0xff] }
  0x1b   : > { %v215_v49 = vld [vmem:[%s6437_s29 + $0x70] sm:$0xff]  ;;  %v216_v50 = vld [vmem:[%s6437_s29 + $0x78] sm:$0xff]  ;;  %v217_v51 = vld [vmem:[%s6437_s29 + $0x80] sm:$0xff] }
  0x1c   : > { %v218_v52 = vld [vmem:[%s6437_s29 + $0x88] sm:$0xff]  ;;  %v219_v53 = vld [vmem:[%s6437_s29 + $0x90] sm:$0xff]  ;;  %v220_v54 = vld [vmem:[%s6437_s29 + $0x98] sm:$0xff] }
  0x1d   : > { %5480 = vmatpush1.bf16.msra.mxu0 %v5479_v24  ;;  %5824 = vmatpush1.bf16.msra.mxu1 %v5479_v24  ;;  %v221_v55 = vld [vmem:[%s6437_s29 + $0xa0] sm:$0xff]  ;;  %v222_v56 = vld [vmem:[%s6437_s29 + $0xa8] sm:$0xff] }
  0x20   : > { %4391 = vmatmul.mubr.msk.f32.vlgmr.msra.gmra.mrb[0].mxu0 %vm249_vm0, %v201_v25  ;;  %4413 = vmatmul.mubr.msk.f32.vlgmr.msra.gmra.mrb[0].mxu1 %vm249_vm0, %v223_v26 }
  0x21   : > { %416 = vmatprep.mubr.f32.mxu0 %v6341_v7  ;;  %548 = vmatprep.mubr.f32.mxu1 %v6341_v7 }
  0x24   : > { %4392 = vmatmul.mubr.msk.f32.gmra.mrb[2].mxu0 %vm249_vm0, %v202_v27  ;;  %4414 = vmatmul.mubr.msk.f32.gmra.mrb[2].mxu1 %vm249_vm0, %v224_v28 }
  0x25   : > { %422 = vmatprep.mubr.f32.mxu0 %v6341_v7  ;;  %554 = vmatprep.mubr.f32.mxu1 %v6341_v7 }
  0x28   : > { %4393 = vmatmul.mubr.msk.f32.gmra.mrb[4].mxu0 %vm249_vm0, %v203_v29  ;;  %4415 = vmatmul.mubr.msk.f32.gmra.mrb[4].mxu1 %vm249_vm0, %v225_v30 }
  0x29   : > { %428 = vmatprep.mubr.f32.mxu0 %v6341_v7  ;;  %560 = vmatprep.mubr.f32.mxu1 %v6341_v7 }
  0x2c   : > { %4394 = vmatmul.mubr.msk.f32.gmra.mrb[6].mxu0 %vm249_vm0, %v204_v31  ;;  %4416 = vmatmul.mubr.msk.f32.gmra.mrb[6].mxu1 %vm249_vm0, %v226_v32 }
  0x2d   : > { %434 = vmatprep.mubr.f32.mxu0 %v6341_v7  ;;  %566 = vmatprep.mubr.f32.mxu1 %v6341_v7 }
  0x30   : > { %4395 = vmatmul.mubr.msk.f32.gmra.mrb[8].mxu0 %vm249_vm0, %v205_v33  ;;  %4417 = vmatmul.mubr.msk.f32.gmra.mrb[8].mxu1 %vm249_vm0, %v227_v34 }
  0x31   : > { %440 = vmatprep.mubr.f32.mxu0 %v6341_v7  ;;  %572 = vmatprep.mubr.f32.mxu1 %v6341_v7 }
  0x34   : > { %4396 = vmatmul.mubr.msk.f32.gmra.mrb[10].mxu0 %vm249_vm0, %v206_v35  ;;  %4418 = vmatmul.mubr.msk.f32.gmra.mrb[10].mxu1 %vm249_vm0, %v228_v36 }
  0x35   : > { %446 = vmatprep.mubr.f32.mxu0 %v6341_v7  ;;  %578 = vmatprep.mubr.f32.mxu1 %v6341_v7 }
  0x38   : > { %4397 = vmatmul.mubr.msk.f32.gmra.mrb[12].mxu0 %vm249_vm0, %v207_v37  ;;  %4419 = vmatmul.mubr.msk.f32.gmra.mrb[12].mxu1 %vm249_vm0, %v229_v38 }
  0x39   : > { %452 = vmatprep.mubr.f32.mxu0 %v6341_v7  ;;  %584 = vmatprep.mubr.f32.mxu1 %v6341_v7 }
  0x3c   : > { %4398 = vmatmul.mubr.msk.f32.gmra.mrb[14].mxu0 %vm249_vm0, %v208_v39  ;;  %4420 = vmatmul.mubr.msk.f32.gmra.mrb[14].mxu1 %vm249_vm0, %v230_v40 }
  0x3d   : > { %458 = vmatprep.mubr.f32.mxu0 %v6341_v7  ;;  %590 = vmatprep.mubr.f32.mxu1 %v6341_v7 }
  0x40   : > { %4399 = vmatmul.mubr.msk.f32.gmra.mrb[16].mxu0 %vm249_vm0, %v209_v41  ;;  %4421 = vmatmul.mubr.msk.f32.gmra.mrb[16].mxu1 %vm249_vm0, %v231_v42 }
  0x41   : > { %464 = vmatprep.mubr.f32.mxu0 %v6341_v7  ;;  %596 = vmatprep.mubr.f32.mxu1 %v6341_v7 }
  0x44   : > { %4400 = vmatmul.mubr.msk.f32.gmra.mrb[18].mxu0 %vm249_vm0, %v210_v43  ;;  %4422 = vmatmul.mubr.msk.f32.gmra.mrb[18].mxu1 %vm249_vm0, %v232_v44 }
  0x45   : > { %470 = vmatprep.mubr.f32.mxu0 %v6341_v7 }
  0x48   : > { %4401 = vmatmul.mubr.msk.f32.gmra.mrb[20].mxu0 %vm249_vm0, %v211_v45 }
  0x49   : > { %476 = vmatprep.mubr.f32.mxu0 %v6341_v7 }
  0x4c   : > { %4402 = vmatmul.mubr.msk.f32.gmra.mrb[22].mxu0 %vm249_vm0, %v212_v46 }
  0x4d   : > { %482 = vmatprep.mubr.f32.mxu0 %v6341_v7 }
  0x50   : > { %4403 = vmatmul.mubr.msk.f32.gmra.mrb[24].mxu0 %vm249_vm0, %v213_v47 }
  0x51   : > { %488 = vmatprep.mubr.f32.mxu0 %v6341_v7 }
  0x54   : > { %4404 = vmatmul.mubr.msk.f32.gmra.mrb[26].mxu0 %vm249_vm0, %v214_v48 }
  0x55   : > { %494 = vmatprep.mubr.f32.mxu0 %v6341_v7 }
  0x58   : > { %4405 = vmatmul.mubr.msk.f32.gmra.mrb[28].mxu0 %vm249_vm0, %v215_v49 }
  0x59   : > { %500 = vmatprep.mubr.f32.mxu0 %v6341_v7 }
  0x5c   : > { %4406 = vmatmul.mubr.msk.f32.gmra.mrb[30].mxu0 %vm249_vm0, %v216_v50 }
  0x5d   : > { %506 = vmatprep.mubr.f32.mxu0 %v6341_v7 }
  0x60   : > { %4407 = vmatmul.mubr.msk.f32.gmra.mrb[32].mxu0 %vm249_vm0, %v217_v51 }
  0x61   : > { %512 = vmatprep.mubr.f32.mxu0 %v6341_v7 }
  0x64   : > { %4408 = vmatmul.mubr.msk.f32.gmra.mrb[34].mxu0 %vm249_vm0, %v218_v52 }
  0x65   : > { %518 = vmatprep.mubr.f32.mxu0 %v6341_v7 }
  0x68   : > { %4409 = vmatmul.mubr.msk.f32.gmra.mrb[36].mxu0 %vm249_vm0, %v219_v53 }
  0x69   : > { %524 = vmatprep.mubr.f32.mxu0 %v6341_v7 }
  0x6c   : > { %4410 = vmatmul.mubr.msk.f32.gmra.mrb[38].mxu0 %vm249_vm0, %v220_v54 }
  0x6d   : > { %530 = vmatprep.mubr.f32.mxu0 %v6341_v7 }
  0x70   : > { %4411 = vmatmul.mubr.msk.f32.gmra.mrb[40].mxu0 %vm249_vm0, %v221_v55 }
  0x71   : > { %536 = vmatprep.mubr.f32.mxu0 %v6341_v7 }
  0x74   : > { %4412 = vmatmul.mubr.msk.f32.gmra.mrb[42].mxu0 %vm249_vm0, %v222_v56 }
  0xf3   : > { %v6533_v57 = vpop.f32.mrb[0].mxu0  ;;  %v6535_v58 = vpop.f32.mrb[0].mxu1 }
  0xf4   : > { %8574 = vst [vmem:[#allocation2_spill] sm:$0xff] %v6535_v58  ;;  %v6537_v59 = vpop.f32.mrb[1].mxu0  ;;  %4969 = vmatprep.mubr.msk.f32.mxu1 %vm635_vm1, %v6533_v57  ;;  %v6541_v60 = vpop.f32.mrb[1].mxu1 }
  0xf5   : > { %8575 = vst [vmem:[#allocation3_spill] sm:$0xff] %v6537_v59  ;;  %8576 = vst [vmem:[#allocation4_spill] sm:$0xff] %v6541_v60 }
  0xf7   : > { %v6543_v61 = vpop.f32.mrb[2].mxu0  ;;  %v6545_v62 = vpop.f32.mrb[2].mxu1 }
  0xf8   : > { %8577 = vst [vmem:[#allocation5_spill] sm:$0xff] %v6545_v62  ;;  %v6547_v63 = vpop.f32.mrb[3].mxu0  ;;  %v6551_v0 = vpack.i.bf16 %v6543_v61, %v6533_v57  ;;  %v6555_v1 = vpack.i.bf16 %v6545_v62, %v6535_v58  ;;  %v6557_v2 = vpop.f32.mrb[3].mxu1 }
  0xf9   : > { %8578 = vst [vmem:[#allocation6_spill] sm:$0xff] %v6547_v63  ;;  %8579 = vst [vmem:[#allocation7_spill] sm:$0xff] %v6557_v2  ;;  %v5577_v4 = vpack.c.bf16 %v6547_v63, %v6537_v59  ;;  %v6567_v6 = vpack.c.bf16 %v6557_v2, %v6541_v60 }
  0xfa   : > { %5838 = vrot.lane.b32.xlu0 %v6551_v0, %s6342_s30 }
  0xfb   : > { %5578 = vmatprep.subr.bf16.mxu0 %v5577_v4  ;;  %v6571_v7 = vpop.f32.mrb[4].mxu0  ;;  %v6573_v8 = vpop.f32.mrb[4].mxu1 }
  0xfc   : > { %8580 = vst [vmem:[#allocation8_spill] sm:$0xff] %v6573_v8  ;;  %5580 = vmatpush3.bf16.msra.mxu0 %v5577_v4  ;;  %v6575_v9 = vpop.f32.mrb[5].mxu0  ;;  %v6577_v10 = vpop.f32.mrb[5].mxu1 }
  0xfd   : > { %8581 = vst [vmem:[#allocation9_spill] sm:$0xff] %v6575_v9  ;;  %8582 = vst [vmem:[#allocation10_spill] sm:$0xff] %v6577_v10 }
  0xff   : > { %v6579_v11 = vpop.f32.mrb[6].mxu0  ;;  %v6581_v12 = vpop.f32.mrb[6].mxu1 }
 0x100   : > { %8583 = vst [vmem:[#allocation11_spill] sm:$0xff] %v6581_v12  ;;  %v6583_v13 = vpop.f32.mrb[7].mxu0  ;;  %v6587_v14 = vpack.i.bf16 %v6579_v11, %v6571_v7  ;;  %v6589_v15 = vpop.f32.mrb[7].mxu1  ;;  %v6593_v16 = vpack.i.bf16 %v6581_v12, %v6573_v8 }
 0x101   : > { %8584 = vst [vmem:[#allocation12_spill] sm:$0xff] %v6583_v13  ;;  %8585 = vst [vmem:[#allocation13_spill] sm:$0xff] %v6589_v15  ;;  %v5581_v18 = vpack.c.bf16 %v6583_v13, %v6575_v9  ;;  %v6603_v20 = vpack.c.bf16 %v6589_v15, %v6577_v10 }
 0x102   : > { %5843 = vrot.lane.b32.xlu0 %v6587_v14, %s6342_s30 }
 0x103   : > { %5582 = vmatprep.subr.bf16.mxu0 %v5581_v18  ;;  %v6607_v21 = vpop.f32.mrb[8].mxu0  ;;  %v6609_v22 = vpop.f32.mrb[8].mxu1 }
 0x104   : > { %8586 = vst [vmem:[#allocation14_spill] sm:$0xff] %v6609_v22  ;;  %5584 = vmatpush3.bf16.msra.mxu0 %v5581_v18  ;;  %v6611_v23 = vpop.f32.mrb[9].mxu0  ;;  %v6613_v24 = vpop.f32.mrb[9].mxu1 }
 0x105   : > { %8587 = vst [vmem:[#allocation15_spill] sm:$0xff] %v6611_v23  ;;  %8588 = vst [vmem:[#allocation16_spill] sm:$0xff] %v6613_v24 }
 0x107   : > { %v6615_v25 = vpop.f32.mrb[10].mxu0  ;;  %v6617_v26 = vpop.f32.mrb[10].mxu1 }
 0x108   : > { %8589 = vst [vmem:[#allocation17_spill] sm:$0xff] %v6617_v26  ;;  %v6619_v27 = vpop.f32.mrb[11].mxu0  ;;  %v6623_v28 = vpack.i.bf16 %v6615_v25, %v6607_v21  ;;  %v6627_v29 = vpack.i.bf16 %v6617_v26, %v6609_v22  ;;  %v6629_v30 = vpop.f32.mrb[11].mxu1 }
 0x109   : > { %8590 = vst [vmem:[#allocation18_spill] sm:$0xff] %v6619_v27  ;;  %8591 = vst [vmem:[#allocation19_spill] sm:$0xff] %v6629_v30  ;;  %v5585_v32 = vpack.c.bf16 %v6619_v27, %v6611_v23  ;;  %v6639_v34 = vpack.c.bf16 %v6629_v30, %v6613_v24 }
 0x10a   : > { %5848 = vrot.lane.b32.xlu1 %v6623_v28, %s6342_s30 }
 0x10b   : > { %5586 = vmatprep.subr.bf16.mxu0 %v5585_v32  ;;  %v6643_v35 = vpop.f32.mrb[12].mxu0  ;;  %v6645_v36 = vpop.f32.mrb[12].mxu1 }
 0x10c   : > { %8592 = vst [vmem:[#allocation20_spill] sm:$0xff] %v6645_v36  ;;  %5588 = vmatpush3.bf16.msra.mxu0 %v5585_v32  ;;  %v6647_v37 = vpop.f32.mrb[13].mxu0  ;;  %v6649_v38 = vpop.f32.mrb[13].mxu1 }
 0x10d   : > { %8593 = vst [vmem:[#allocation21_spill] sm:$0xff] %v6647_v37  ;;  %8594 = vst [vmem:[#allocation22_spill] sm:$0xff] %v6649_v38 }
 0x10f   : > { %v6651_v39 = vpop.f32.mrb[14].mxu0  ;;  %v6653_v40 = vpop.f32.mrb[14].mxu1 }
 0x110   : > { %8595 = vst [vmem:[#allocation23_spill] sm:$0xff] %v6653_v40  ;;  %v6655_v41 = vpop.f32.mrb[15].mxu0  ;;  %v6659_v42 = vpack.i.bf16 %v6651_v39, %v6643_v35  ;;  %v6663_v43 = vpack.i.bf16 %v6653_v40, %v6645_v36  ;;  %v6665_v44 = vpop.f32.mrb[15].mxu1 }
 0x111   : > { %8596 = vst [vmem:[#allocation24_spill] sm:$0xff] %v6655_v41  ;;  %8597 = vst [vmem:[#allocation25_spill] sm:$0xff] %v6665_v44  ;;  %v5589_v46 = vpack.c.bf16 %v6655_v41, %v6647_v37  ;;  %v6675_v48 = vpack.c.bf16 %v6665_v44, %v6649_v38 }
 0x112   : > { %5853 = vrot.lane.b32.xlu1 %v6659_v42, %s6342_s30 }
 0x113   : > { %5590 = vmatprep.subr.bf16.mxu0 %v5589_v46  ;;  %v6679_v49 = vpop.f32.mrb[16].mxu0  ;;  %v6681_v50 = vpop.f32.mrb[16].mxu1 }
 0x114   : > { %8598 = vst [vmem:[#allocation26_spill] sm:$0xff] %v6681_v50  ;;  %5592 = vmatpush3.bf16.msra.mxu0 %v5589_v46  ;;  %v6683_v51 = vpop.f32.mrb[17].mxu0  ;;  %v6685_v52 = vpop.f32.mrb[17].mxu1 }
 0x115   : > { %8599 = vst [vmem:[#allocation27_spill] sm:$0xff] %v6683_v51  ;;  %8600 = vst [vmem:[#allocation28_spill] sm:$0xff] %v6685_v52 }
 0x117   : > { %v6687_v53 = vpop.f32.mrb[18].mxu0  ;;  %v6689_v54 = vpop.f32.mrb[18].mxu1 }
 0x118   : > { %8601 = vst [vmem:[#allocation29_spill] sm:$0xff] %v6689_v54  ;;  %v6693_v55 = vpack.i.bf16 %v6687_v53, %v6679_v49  ;;  %v6695_v56 = vpop.f32.mrb[19].mxu0  ;;  %v6699_v4 = vpack.i.bf16 %v6689_v54, %v6681_v50  ;;  %v6701_v18 = vpop.f32.mrb[19].mxu1 }
 0x119   : > { %8602 = vst [vmem:[#allocation30_spill] sm:$0xff] %v6695_v56  ;;  %8604 = vst [vmem:[#allocation32_spill] sm:$0xff] %v6701_v18  ;;  %v6707_v46 = vpack.c.bf16 %v6695_v56, %v6683_v51  ;;  %v6713_v33 = vpack.c.bf16 %v6701_v18, %v6685_v52 }
 0x11a   : > { %8603 = vst [vmem:[#allocation31_spill] sm:$0xff] %v6699_v4  ;;  %5858 = vrot.lane.b32.xlu0 %v6693_v55, %s6342_s30 }
 0x11b   : > { %8605 = vst [vmem:[#allocation33_spill] sm:$0xff] %v6713_v33  ;;  %v6717_v19 = vpop.f32.mrb[20].mxu0 }
 0x11c   : > { %v6719_v5 = vpop.f32.mrb[21].mxu0 }
 0x11d   : > { %8606 = vst [vmem:[#allocation34_spill] sm:$0xff] %v6719_v5 }
 0x11f   : > { %v6721_v45 = vpop.f32.mrb[22].mxu0 }
 0x120   : > { %v5862_v31 = vpack.i.bf16 %v6721_v45, %v6717_v19  ;;  %v6725_v3 = vpop.f32.mrb[23].mxu0 }
 0x121   : > { %8607 = vst [vmem:[#allocation35_spill] sm:$0xff] %v6725_v3  ;;  %v6731_v32 = vpack.c.bf16 %v6725_v3, %v6719_v5 }
 0x122   : > { %5863 = vrot.lane.b32.xlu1 %v5862_v31, %s6342_s30 }
 0x123   : > { %v6734_v17 = vpop.f32.mrb[24].mxu0 }
 0x124   : > { %v6736_v52 = vpop.f32.mrb[25].mxu0 }
 0x125   : > { %8608 = vst [vmem:[#allocation36_spill] sm:$0xff] %v6736_v52 }
 0x127   : > { %v6738_v18 = vpop.f32.mrb[26].mxu0 }
 0x128   : > { %8609 = vst [vmem:[#allocation37_spill] sm:$0xff] %v6738_v18  ;;  %v5867_v38 = vpack.i.bf16 %v6738_v18, %v6734_v17  ;;  %v6742_v44 = vpop.f32.mrb[27].mxu0 }
 0x129   : > { %8610 = vst [vmem:[#allocation38_spill] sm:$0xff] %v6742_v44  ;;  %v6748_v24 = vpack.c.bf16 %v6742_v44, %v6736_v52 }
 0x12a   : > { %5868 = vrot.lane.b32.xlu0 %v5867_v38, %s6342_s30 }
 0x12b   : > { %v6751_v30 = vpop.f32.mrb[28].mxu0 }
 0x12c   : > { %v6753_v10 = vpop.f32.mrb[29].mxu0 }
 0x12d   : > { %8611 = vst [vmem:[#allocation39_spill] sm:$0xff] %v6753_v10 }
 0x12f   : > { %v6755_v15 = vpop.f32.mrb[30].mxu0 }
 0x130   : > { %8612 = vst [vmem:[#allocation40_spill] sm:$0xff] %v6755_v15  ;;  %v5872_v60 = vpack.i.bf16 %v6755_v15, %v6751_v30  ;;  %v6759_v2 = vpop.f32.mrb[31].mxu0 }
 0x131   : > { %8613 = vst [vmem:[#allocation41_spill] sm:$0xff] %v6759_v2  ;;  %v6765_v5 = vpack.c.bf16 %v6759_v2, %v6753_v10 }
 0x132   : > { %5873 = vrot.lane.b32.xlu1 %v5872_v60, %s6342_s30 }
 0x133   : > { %v6768_v3 = vpop.f32.mrb[32].mxu0 }
 0x134   : > { %8614 = vst [vmem:[#allocation42_spill] sm:$0xff] %v6768_v3  ;;  %v6770_v37 = vpop.f32.mrb[33].mxu0 }
 0x135   : > { %8615 = vst [vmem:[#allocation43_spill] sm:$0xff] %v6770_v37 }
 0x137   : > { %v6772_v41 = vpop.f32.mrb[34].mxu0 }
 0x138   : > { %v5877_v23 = vpack.i.bf16 %v6772_v41, %v6768_v3  ;;  %v6776_v27 = vpop.f32.mrb[35].mxu0 }
 0x139   : > { %8616 = vst [vmem:[#allocation44_spill] sm:$0xff] %v6776_v27  ;;  %v6782_v10 = vpack.c.bf16 %v6776_v27, %v6770_v37 }
 0x13a   : > { %5878 = vrot.lane.b32.xlu0 %v5877_v23, %s6342_s30 }
 0x13b   : > { %v6785_v2 = vpop.f32.mrb[36].mxu0  ;;  %5610 = vmatprep.subr.bf16.mxu0 %v6782_v10 }
 0x13c   : > { %8617 = vst [vmem:[#allocation45_spill] sm:$0xff] %v6785_v2  ;;  %v6788_v59 = vpop.f32.mrb[37].mxu0 }
 0x13d   : > { %8618 = vst [vmem:[#allocation46_spill] sm:$0xff] %v6788_v59 }
 0x13f   : > { %v6790_v63 = vpop.f32.mrb[38].mxu0 }
 0x140   : > { %v5882_v52 = vpack.i.bf16 %v6790_v63, %v6785_v2  ;;  %v6794_v44 = vpop.f32.mrb[39].mxu0 }
 0x141   : > { %8619 = vst [vmem:[#allocation47_spill] sm:$0xff] %v6794_v44  ;;  %v6800_v37 = vpack.c.bf16 %v6794_v44, %v6788_v59 }
 0x142   : > { %5883 = vrot.lane.b32.xlu1 %v5882_v52, %s6342_s30 }
 0x143   : > { %v6803_v27 = vpop.f32.mrb[40].mxu0 }
 0x144   : > { %8620 = vst [vmem:[#allocation48_spill] sm:$0xff] %v6803_v27  ;;  %v6805_v51 = vpop.f32.mrb[41].mxu0 }
 0x145   : > { %8621 = vst [vmem:[#allocation49_spill] sm:$0xff] %v6805_v51 }
 0x146   : > { %5893 = vrot.lane.b32.xlu1 %v6555_v1, %s6342_s30 }
 0x147   : > { %v6809_v56 = vpop.f32.mrb[42].mxu0 }
 0x148   : > { %8622 = vst [vmem:[#allocation50_spill] sm:$0xff] %v6809_v56  ;;  %v5887_v9 = vpack.i.bf16 %v6809_v56, %v6803_v27  ;;  %v6813_v13 = vpop.f32.mrb[43].mxu0 }
 0x149   : > { %8623 = vst [vmem:[#allocation51_spill] sm:$0xff] %v6813_v13  ;;  %v6819_v59 = vpack.c.bf16 %v6813_v13, %v6805_v51 }
 0x14a   : > { %5903 = vrot.lane.b32.xlu1 %v6627_v29, %s6342_s30  ;;  %5888 = vrot.lane.b32.xlu0 %v5887_v9, %s6342_s30 }
 0x14e   : > { %5913 = vrot.lane.b32.xlu1 %v6699_v4, %s6342_s30  ;;  %5898 = vrot.lane.b32.xlu0 %v6593_v16, %s6342_s30 }
 0x152   : > { %5918 = vrot.lane.b32.xlu1 %v6551_v0, %s6343_s5  ;;  %5908 = vrot.lane.b32.xlu0 %v6663_v43, %s6342_s30 }
 0x156   : > { %5928 = vrot.lane.b32.xlu1 %v6623_v28, %s6343_s5  ;;  %5923 = vrot.lane.b32.xlu0 %v6587_v14, %s6343_s5 }
 0x15a   : > { %5938 = vrot.lane.b32.xlu1 %v6659_v42, %s6343_s5  ;;  %5933 = vrot.lane.b32.xlu0 %v6693_v55, %s6343_s5 }
 0x15e   : > { %5948 = vrot.lane.b32.xlu1 %v5867_v38, %s6343_s5  ;;  %5943 = vrot.lane.b32.xlu0 %v5862_v31, %s6343_s5 }
 0x162   : > { %5953 = vrot.lane.b32.xlu1 %v5877_v23, %s6343_s5  ;;  %2133 = vrot.lane.b32.xlu0 %v6533_v57, %s6344_s6 }
 0x166   : > { %2135 = vrot.lane.b32.xlu1 %v6543_v61, %s6344_s6  ;;  %2137 = vrot.lane.b32.xlu0 %v6571_v7, %s6344_s6 }
 0x16a   : > { %2139 = vrot.lane.b32.xlu1 %v6579_v11, %s6344_s6  ;;  %5958 = vrot.lane.b32.xlu0 %v5872_v60, %s6343_s5 }
 0x16c   : > { %v5839_v0 = vpop.permute.xlu0 %5838 }
 0x16d   : > { %v5841_v14 = vunpack.i.h.bf16 %v5839_v0  ;;  %v5840_v28 = vunpack.i.l.bf16 %v5839_v0 }
 0x16e   : > { %5963 = vrot.lane.b32.xlu1 %v5882_v52, %s6343_s5  ;;  %2141 = vrot.lane.b32.xlu0 %v6607_v21, %s6344_s6 }
 0x16f   : > { %v5481_v23 = vpack.c.bf16 %v5841_v14, %v5840_v28 }
 0x171   : > { %5483 = vmatprep.subr.msk.bf16.mxu1 %vm6857_vm2, %v5481_v23 }
 0x172   : > { %5486 = vmatpush3.bf16.xpose.msk.msra.mxu1 %vm6857_vm2, %v5481_v23  ;;  %2143 = vrot.lane.b32.xlu1 %v6615_v25, %s6344_s6 }
 0x173   : > { %2145 = vrot.lane.b32.xlu0 %v6643_v35, %s6344_s6 }
 0x174   : > { %v5844_v60 = vpop.permute.xlu0 %5843 }
 0x175   : > { %v5846_v31 = vunpack.i.h.bf16 %v5844_v60  ;;  %v5845_v38 = vunpack.i.l.bf16 %v5844_v60 }
 0x176   : > { %2147 = vrot.lane.b32.xlu1 %v6651_v39, %s6344_s6 }
 0x177   : > { %v5487_v42 = vpack.c.bf16 %v5846_v31, %v5845_v38  ;;  %2302 = vrot.lane.b32.xlu0 %v6679_v49, %s6344_s6 }
 0x179   : > { %5489 = vmatprep.subr.msk.bf16.mxu1 %vm6857_vm2, %v5487_v42 }
 0x17a   : > { %5492 = vmatpush3.bf16.xpose.msk.msra.mxu1 %vm6857_vm2, %v5487_v42  ;;  %5968 = vrot.lane.b32.xlu1 %v6593_v16, %s6343_s5 }
 0x17b   : > { %5973 = vrot.lane.b32.xlu0 %v5887_v9, %s6343_s5 }
 0x17c   : > { %v5849_v52 = vpop.permute.xlu1 %5848 }
 0x17d   : > { %v5851_v55 = vunpack.i.h.bf16 %v5849_v52  ;;  %v5850_v0 = vunpack.i.l.bf16 %v5849_v52 }
 0x17e   : > { %2304 = vrot.lane.b32.xlu1 %v6687_v53, %s6344_s6 }
 0x17f   : > { %v5493_v14 = vpack.c.bf16 %v5851_v55, %v5850_v0 }
 0x181   : > { %5495 = vmatprep.subr.msk.bf16.mxu1 %vm6857_vm2, %v5493_v14 }
 0x182   : > { %5498 = vmatpush3.bf16.xpose.msk.msra.mxu1 %vm6857_vm2, %v5493_v14 }
 0x184   : > { %v5854_v28 = vpop.permute.xlu1 %5853 }
 0x185   : > { %v5856_v23 = vunpack.i.h.bf16 %v5854_v28  ;;  %v5855_v60 = vunpack.i.l.bf16 %v5854_v28 }
 0x187   : > { %v5499_v31 = vpack.c.bf16 %v5856_v23, %v5855_v60 }
 0x189   : > { %5501 = vmatprep.subr.msk.bf16.mxu1 %vm6857_vm2, %v5499_v31 }
 0x18a   : > { %5504 = vmatpush3.bf16.xpose.msk.msra.mxu1 %vm6857_vm2, %v5499_v31 }
 0x18c   : > { %v5859_v9 = vpop.permute.xlu0 %5858 }
 0x18d   : > { %v5861_v16 = vunpack.i.h.bf16 %v5859_v9  ;;  %v5860_v38 = vunpack.i.l.bf16 %v5859_v9 }
 0x18f   : > { %v5505_v42 = vpack.c.bf16 %v5861_v16, %v5860_v38 }
 0x191   : > { %4970 = vmatmul.mubr.msk.f32.vlgmr.msra.gmra.mrb[20].mxu1 %vm635_vm1, %v6543_v61  ;;  %5507 = vmatprep.subr.msk.bf16.mxu1 %vm6857_vm2, %v5505_v42 }
 0x192   : > { %4972 = vmatprep.mubr.msk.f32.mxu1 %vm635_vm1, %v6571_v7  ;;  %5510 = vmatpush3.bf16.xpose.msk.msra.mxu1 %vm6857_vm2, %v5505_v42 }
 0x194   : > { %v5864_v52 = vpop.permute.xlu1 %5863 }
 0x195   : > { %v5866_v55 = vunpack.i.h.bf16 %v5864_v52  ;;  %v5865_v0 = vunpack.i.l.bf16 %v5864_v52  ;;  %4973 = vmatmul.mubr.msk.f32.gmra.mrb[22].mxu1 %vm635_vm1, %v6579_v11 }
 0x196   : > { %4975 = vmatprep.mubr.msk.f32.mxu1 %vm635_vm1, %v6607_v21 }
 0x197   : > { %v5511_v14 = vpack.c.bf16 %v5866_v55, %v5865_v0 }
 0x199   : > { %4976 = vmatmul.mubr.msk.f32.gmra.mrb[24].mxu1 %vm635_vm1, %v6615_v25  ;;  %5513 = vmatprep.subr.msk.bf16.mxu1 %vm6857_vm2, %v5511_v14 }
 0x19a   : > { %4978 = vmatprep.mubr.msk.f32.mxu1 %vm635_vm1, %v6643_v35  ;;  %5516 = vmatpush3.bf16.xpose.msk.msra.mxu1 %vm6857_vm2, %v5511_v14 }
 0x19c   : > { %v5869_v61 = vpop.permute.xlu0 %5868 }
 0x19d   : > { %v5871_v7 = vunpack.i.h.bf16 %v5869_v61  ;;  %v5870_v28 = vunpack.i.l.bf16 %v5869_v61  ;;  %4979 = vmatmul.mubr.msk.f32.gmra.mrb[26].mxu1 %vm635_vm1, %v6651_v39 }
 0x19e   : > { %4997 = vmatprep.mubr.msk.f32.mxu1 %vm635_vm1, %v6679_v49 }
 0x19f   : > { %v5517_v11 = vpack.c.bf16 %v5871_v7, %v5870_v28 }
 0x1a1   : > { %5519 = vmatprep.subr.msk.bf16.mxu1 %vm6857_vm2, %v5517_v11 }
 0x1a2   : > { %5522 = vmatpush3.bf16.xpose.msk.msra.mxu1 %vm6857_vm2, %v5517_v11 }
 0x1a4   : > { %v5874_v21 = vpop.permute.xlu1 %5873 }
 0x1a5   : > { %v5876_v25 = vunpack.i.h.bf16 %v5874_v21  ;;  %v5875_v35 = vunpack.i.l.bf16 %v5874_v21 }
 0x1a7   : > { %v5523_v23 = vpack.c.bf16 %v5876_v25, %v5875_v35 }
 0x1a9   : > { %5525 = vmatprep.subr.msk.bf16.mxu1 %vm6857_vm2, %v5523_v23 }
 0x1aa   : > { %5528 = vmatpush3.bf16.xpose.msk.msra.mxu1 %vm6857_vm2, %v5523_v23 }
 0x1ac   : > { %v5879_v39 = vpop.permute.xlu0 %5878 }
 0x1ad   : > { %v5881_v60 = vunpack.i.h.bf16 %v5879_v39  ;;  %v5880_v49 = vunpack.i.l.bf16 %v5879_v39 }
 0x1af   : > { %v5529_v31 = vpack.c.bf16 %v5881_v60, %v5880_v49 }
 0x1b1   : > { %4998 = vmatmul.mubr.msk.f32.vlgmr.msra.gmra.mrb[28].mxu1 %vm635_vm1, %v6687_v53  ;;  %5531 = vmatprep.subr.msk.bf16.mxu1 %vm6857_vm2, %v5529_v31 }
 0x1b2   : > { %5000 = vmatprep.mubr.msk.f32.mxu1 %vm635_vm1, %v6717_v19  ;;  %5534 = vmatpush3.bf16.xpose.msk.msra.mxu1 %vm6857_vm2, %v5529_v31 }
 0x1b4   : > { %v5884_v9 = vpop.permute.xlu1 %5883 }
 0x1b5   : > { %v5886_v16 = vunpack.i.h.bf16 %v5884_v9  ;;  %v5885_v38 = vunpack.i.l.bf16 %v5884_v9  ;;  %5001 = vmatmul.mubr.msk.f32.gmra.mrb[30].mxu1 %vm635_vm1, %v6721_v45 }
 0x1b6   : > { %5003 = vmatprep.mubr.msk.f32.mxu1 %vm635_vm1, %v6734_v17 }
 0x1b7   : > { %v5535_v42 = vpack.c.bf16 %v5886_v16, %v5885_v38 }
 0x1b8   : > { %v5894_v53 = vpop.permute.xlu1 %5893 }
 0x1b9   : > { %5004 = vmatmul.mubr.msk.f32.gmra.mrb[32].mxu1 %vm635_vm1, %v6738_v18  ;;  %5537 = vmatprep.subr.msk.bf16.mxu1 %vm6857_vm2, %v5535_v42  ;;  %v5896_v52 = vunpack.i.h.bf16 %v5894_v53  ;;  %v5895_v55 = vunpack.i.l.bf16 %v5894_v53 }
 0x1ba   : > { %5006 = vmatprep.mubr.msk.f32.mxu1 %vm635_vm1, %v6751_v30  ;;  %5540 = vmatpush3.bf16.xpose.msk.msra.mxu1 %vm6857_vm2, %v5535_v42 }
 0x1bb   : > { %v5547_v7 = vpack.c.bf16 %v5896_v52, %v5895_v55 }
 0x1bc   : > { %v5889_v0 = vpop.permute.xlu0 %5888  ;;  %v5904_v23 = vpop.permute.xlu1 %5903 }
 0x1bd   : > { %v5891_v14 = vunpack.i.h.bf16 %v5889_v0  ;;  %v5890_v61 = vunpack.i.l.bf16 %v5889_v0  ;;  %5007 = vmatmul.mubr.msk.f32.gmra.mrb[34].mxu1 %vm635_vm1, %v6755_v15  ;;  %v5906_v39 = vunpack.i.h.bf16 %v5904_v23  ;;  %v5905_v60 = vunpack.i.l.bf16 %v5904_v23  ;;  %v7045_v23 = vld [vmem:[%s8511_s3 + $0x20] sm:$0xff] }
 0x1be   : > { %5025 = vmatprep.mubr.msk.f32.mxu1 %vm635_vm1, %v6768_v3 }
 0x1bf   : > { %v5541_v28 = vpack.c.bf16 %v5891_v14, %v5890_v61  ;;  %v5559_v49 = vpack.c.bf16 %v5906_v39, %v5905_v60 }
 0x1c0   : > { %v5899_v11 = vpop.permute.xlu0 %5898  ;;  %v5914_v42 = vpop.permute.xlu1 %5913 }
 0x1c1   : > { %5543 = vmatprep.subr.msk.bf16.mxu1 %vm6857_vm2, %v5541_v28  ;;  %v5901_v21 = vunpack.i.h.bf16 %v5899_v11  ;;  %v5900_v25 = vunpack.i.l.bf16 %v5899_v11  ;;  %v5916_v53 = vunpack.i.h.bf16 %v5914_v42  ;;  %v5915_v52 = vunpack.i.l.bf16 %v5914_v42 }
 0x1c2   : > { %5546 = vmatpush3.bf16.xpose.msk.msra.mxu1 %vm6857_vm2, %v5541_v28 }
 0x1c3   : > { %5549 = vmatprep.subr.msk.bf16.mxu1 %vm6857_vm2, %v5547_v7  ;;  %v5553_v35 = vpack.c.bf16 %v5901_v21, %v5900_v25  ;;  %v5571_v55 = vpack.c.bf16 %v5916_v53, %v5915_v52 }
 0x1c4   : > { %v5909_v31 = vpop.permute.xlu0 %5908 }
 0x1c5   : > { %v5911_v9 = vunpack.i.h.bf16 %v5909_v31  ;;  %v5910_v16 = vunpack.i.l.bf16 %v5909_v31  ;;  %v7055_v31 = vld [vmem:[%s8511_s3 + $0x28] sm:$0xff] }
 0x1c7   : > { %v5565_v38 = vpack.c.bf16 %v5911_v9, %v5910_v16 }
 0x1ca   : > { %5552 = vmatpush3.bf16.xpose.msk.msra.mxu1 %vm6857_vm2, %v5547_v7 }
 0x1cb   : > { %5555 = vmatprep.subr.msk.bf16.mxu1 %vm6857_vm2, %v5553_v35 }
 0x1d1   : > { %5026 = vmatmul.mubr.msk.f32.vlgmr.msra.gmra.mrb[36].mxu1 %vm635_vm1, %v6772_v41 }
 0x1d2   : > { %5028 = vmatprep.mubr.msk.f32.mxu1 %vm635_vm1, %v6785_v2  ;;  %5558 = vmatpush3.bf16.xpose.msk.msra.mxu1 %vm6857_vm2, %v5553_v35  ;;  %v7040_v35 = vld [vmem:[%s8511_s3 + $0x10] sm:$0xff] }
 0x1d3   : > { %5561 = vmatprep.subr.msk.bf16.mxu1 %vm6857_vm2, %v5559_v49 }
 0x1d5   : > { %5029 = vmatmul.mubr.msk.f32.gmra.mrb[38].mxu1 %vm635_vm1, %v6790_v63 }
 0x1d6   : > { %5031 = vmatprep.mubr.msk.f32.mxu1 %vm635_vm1, %v6803_v27 }
 0x1d9   : > { %5032 = vmatmul.mubr.msk.f32.gmra.mrb[40].mxu1 %vm635_vm1, %v6809_v56 }
 0x1da   : > { %5034 = vmatprep.mubr.msk.f32.mxu1 %vm635_vm1, %v6535_v58  ;;  %5564 = vmatpush3.bf16.xpose.msk.msra.mxu1 %vm6857_vm2, %v5559_v49 }
 0x1db   : > { %5567 = vmatprep.subr.msk.bf16.mxu1 %vm6857_vm2, %v5565_v38 }
 0x1dd   : > { %5035 = vmatmul.mubr.msk.f32.gmra.mrb[42].mxu1 %vm635_vm1, %v6545_v62 }
 0x1de   : > { %5053 = vmatprep.mubr.msk.f32.mxu1 %vm635_vm1, %v6573_v8 }
 0x1e2   : > { %5570 = vmatpush3.bf16.xpose.msk.msra.mxu1 %vm6857_vm2, %v5565_v38 }
 0x1e3   : > { %5573 = vmatprep.subr.msk.bf16.mxu1 %vm6857_vm2, %v5571_v55 }
 0x1ea   : > { %5576 = vmatpush3.bf16.xpose.msk.msra.mxu1 %vm6857_vm2, %v5571_v55  ;;  %v7070_v55 = vld [vmem:[%s8511_s3 + $0x38] sm:$0xff] }
 0x1eb   : > { %5594 = vmatprep.subr.bf16.mxu1 %v6707_v46 }
 0x1f1   : > { %5054 = vmatmul.mubr.msk.f32.vlgmr.msra.gmra.mrb[44].mxu1 %vm635_vm1, %v6581_v12 }
 0x1f2   : > { %5056 = vmatprep.mubr.msk.f32.mxu1 %vm635_vm1, %v6609_v22  ;;  %5596 = vmatpush3.bf16.msra.mxu1 %v6707_v46  ;;  %v7017_v46 = vld [vmem:[%s8511_s3] sm:$0xff] }
 0x1f3   : > { %5598 = vmatprep.subr.bf16.mxu1 %v6731_v32 }
 0x1f5   : > { %5057 = vmatmul.mubr.msk.f32.gmra.mrb[46].mxu1 %vm635_vm1, %v6617_v26 }
 0x1f6   : > { %5059 = vmatprep.mubr.msk.f32.mxu1 %vm635_vm1, %v6645_v36  ;;  %5600 = vmatpush3.bf16.msra.mxu1 %v6731_v32  ;;  %v7012_v32 = vld [vmem:[%s8511_s3 + $0x8] sm:$0xff] }
 0x1f7   : > { %5602 = vmatprep.subr.bf16.mxu1 %v6748_v24 }
 0x1f9   : > { %5060 = vmatmul.mubr.msk.f32.gmra.mrb[48].mxu1 %vm635_vm1, %v6653_v40 }
 0x1fa   : > { %5062 = vmatprep.mubr.msk.f32.mxu1 %vm635_vm1, %v6681_v50  ;;  %5604 = vmatpush3.bf16.msra.mxu1 %v6748_v24  ;;  %v7175_v50 = vpop.permute.xlu0 %5923 }
 0x1fb   : > { %5606 = vmatprep.subr.bf16.mxu1 %v6765_v5  ;;  %8628 = vst [vmem:[#allocation54_spill] sm:$0xff] %v7175_v50 }
 0x1fd   : > { %5063 = vmatmul.mubr.msk.f32.gmra.mrb[50].mxu1 %vm635_vm1, %v6689_v54 }
 0x1fe   : > { %5608 = vmatpush3.bf16.msra.mxu1 %v6765_v5  ;;  %v7028_v5 = vld [vmem:[%s8511_s3 + $0x18] sm:$0xff] }
 0x1ff   : > { %5626 = vmatprep.subr.bf16.mxu1 %v6603_v20 }
 0x264   : > { %v4971_v24 = vpop.f32.mrb[20].mxu1 }
 0x265   : > { %v7020_v0 = vadd.f32 %v4971_v24, %v7012_v32  ;;  %v734_v14 = vpop.f32.mrb[21].mxu1 }
 0x266   : > { %v7023_v61 = vadd.f32 %v734_v14, %v7017_v46 }
 0x267   : > { %v1259_v7 = vsel %vm249_vm0, %v7020_v0, -inf }
 0x268   : > { %v4974_v28 = vpop.f32.mrb[22].mxu1  ;;  %1260 = vmax.xlane.f32.xlu1 %v1259_v7  ;;  %v1256_v11 = vsel %vm249_vm0, %v7023_v61, -inf }
 0x269   : > { %v7035_v21 = vadd.f32 %v4974_v28, %v7028_v5  ;;  %v744_v25 = vpop.f32.mrb[23].mxu1  ;;  %1257 = vmax.xlane.f32.xlu0 %v1256_v11  ;;  %v7080_v28 = vld [vmem:[%s8511_s3 + $0x30] sm:$0xff] }
 0x26a   : > { %v7050_v60 = vadd.f32 %v744_v25, %v7040_v35 }
 0x26b   : > { %v1265_v39 = vsel %vm249_vm0, %v7035_v21, -inf }
 0x26c   : > { %v4977_v49 = vpop.f32.mrb[24].mxu1  ;;  %v1262_v52 = vsel %vm249_vm0, %v7050_v60, -inf }
 0x26d   : > { %v754_v9 = vpop.f32.mrb[25].mxu1  ;;  %1266 = vmax.xlane.f32.xlu0 %v1265_v39  ;;  %v7061_v38 = vadd.f32 %v4977_v49, %v7055_v31 }
 0x26e   : > { %v7058_v16 = vadd.f32 %v754_v9, %v7045_v23 }
 0x26f   : > { %v1271_v7 = vsel %vm249_vm0, %v7061_v38, -inf }
 0x270   : > { %v4980_v42 = vpop.f32.mrb[26].mxu1  ;;  %v1268_v53 = vsel %vm249_vm0, %v7058_v16, -inf }
 0x271   : > { %v764_v24 = vpop.f32.mrb[27].mxu1  ;;  %1269 = vmax.xlane.f32.xlu1 %v1268_v53  ;;  %1263 = vmax.xlane.f32.xlu0 %v1262_v52  ;;  %v7073_v14 = vadd.f32 %v4980_v42, %v7070_v55 }
 0x272   : > { %v7083_v11 = vadd.f32 %v764_v24, %v7080_v28 }
 0x273   : > { %v1277_v25 = vsel %vm249_vm0, %v7073_v14, -inf }
 0x274   : > { %v1274_v39 = vsel %vm249_vm0, %v7083_v11, -inf }
 0x275   : > { %1272 = vmax.xlane.f32.xlu0 %v1271_v7 }
 0x279   : > { %1278 = vmax.xlane.f32.xlu0 %v1277_v25 }
 0x27d   : > { %1275 = vmax.xlane.f32.xlu0 %v1274_v39 }
 0x284   : > { %v4999_v49 = vpop.f32.mrb[28].mxu1 }
 0x285   : > { %v7090_v9 = vadd.f32 %v4999_v49, %v7012_v32  ;;  %v895_v42 = vpop.f32.mrb[29].mxu1 }
 0x286   : > { %v7093_v53 = vadd.f32 %v895_v42, %v7017_v46 }
 0x287   : > { %v1283_v52 = vsel %vm249_vm0, %v7090_v9, -inf }
 0x288   : > { %v5002_v24 = vpop.f32.mrb[30].mxu1  ;;  %1284 = vmax.xlane.f32.xlu1 %v1283_v52  ;;  %v1280_v39 = vsel %vm249_vm0, %v7093_v53, -inf }
 0x289   : > { %v7098_v7 = vadd.f32 %v5002_v24, %v7028_v5  ;;  %v905_v25 = vpop.f32.mrb[31].mxu1 }
 0x28a   : > { %v7101_v47 = vadd.f32 %v905_v25, %v7040_v35 }
 0x28b   : > { %v1289_v49 = vsel %vm249_vm0, %v7098_v7, -inf }
 0x28c   : > { %v5005_v42 = vpop.f32.mrb[32].mxu1  ;;  %1281 = vmax.xlane.f32.xlu1 %v1280_v39  ;;  %1290 = vmax.xlane.f32.xlu0 %v1289_v49  ;;  %v1286_v25 = vsel %vm249_vm0, %v7101_v47, -inf }
 0x28d   : > { %v7108_v44 = vadd.f32 %v5005_v42, %v7055_v31  ;;  %v915_v52 = vpop.f32.mrb[33].mxu1 }
 0x28e   : > { %v7111_v24 = vadd.f32 %v915_v52, %v7045_v23 }
 0x28f   : > { %v1295_v54 = vsel %vm249_vm0, %v7108_v44, -inf }
 0x290   : > { %v5008_v40 = vpop.f32.mrb[34].mxu1  ;;  %1287 = vmax.xlane.f32.xlu1 %v1286_v25  ;;  %1296 = vmax.xlane.f32.xlu0 %v1295_v54  ;;  %v1292_v42 = vsel %vm249_vm0, %v7111_v24, -inf }
 0x291   : > { %v7118_v26 = vadd.f32 %v5008_v40, %v7070_v55  ;;  %v925_v39 = vpop.f32.mrb[35].mxu1 }
 0x292   : > { %v7121_v49 = vadd.f32 %v925_v39, %v7080_v28 }
 0x293   : > { %v1301_v52 = vsel %vm249_vm0, %v7118_v26, -inf }
 0x294   : > { %1293 = vmax.xlane.f32.xlu1 %v1292_v42  ;;  %1302 = vmax.xlane.f32.xlu0 %v1301_v52  ;;  %v1298_v12 = vsel %vm249_vm0, %v7121_v49, -inf }
 0x298   : > { %1299 = vmax.xlane.f32.xlu1 %v1298_v12 }
 0x2a4   : > { %v5027_v54 = vpop.f32.mrb[36].mxu1 }
 0x2a5   : > { %v7130_v40 = vadd.f32 %v5027_v54, %v7012_v32  ;;  %v1056_v25 = vpop.f32.mrb[37].mxu1 }
 0x2a6   : > { %v7133_v39 = vadd.f32 %v1056_v25, %v7017_v46 }
 0x2a7   : > { %v1307_v62 = vsel %vm249_vm0, %v7130_v40, -inf }
 0x2a8   : > { %1308 = vmax.xlane.f32.xlu0 %v1307_v62  ;;  %v5030_v56 = vpop.f32.mrb[38].mxu1  ;;  %v1304_v42 = vsel %vm249_vm0, %v7133_v39, -inf }
 0x2a9   : > { %v7140_v52 = vadd.f32 %v5030_v56, %v7028_v5  ;;  %v1066_v12 = vpop.f32.mrb[39].mxu1  ;;  %1305 = vmax.xlane.f32.xlu1 %v1304_v42  ;;  %v7155_v42 = vpop.permute.xlu1 %5918 }
 0x2aa   : > { %v7143_v54 = vadd.f32 %v1066_v12, %v7040_v35 }
 0x2ab   : > { %v1313_v25 = vsel %vm249_vm0, %v7140_v52, -inf }
 0x2ac   : > { %1314 = vmax.xlane.f32.xlu0 %v1313_v25  ;;  %v5033_v4 = vpop.f32.mrb[40].mxu1  ;;  %v1310_v62 = vsel %vm249_vm0, %v7143_v54, -inf }
 0x2ad   : > { %v7150_v2 = vadd.f32 %v5033_v4, %v7055_v31  ;;  %v1076_v51 = vpop.f32.mrb[41].mxu1  ;;  %1311 = vmax.xlane.f32.xlu1 %v1310_v62 }
 0x2ae   : > { %v7153_v56 = vadd.f32 %v1076_v51, %v7045_v23 }
 0x2af   : > { %v1319_v12 = vsel %vm249_vm0, %v7150_v2, -inf }
 0x2b0   : > { %1320 = vmax.xlane.f32.xlu0 %v1319_v12  ;;  %v5036_v13 = vpop.f32.mrb[42].mxu1  ;;  %v1316_v25 = vsel %vm249_vm0, %v7153_v56, -inf  ;;  %v7171_v12 = vpop.permute.xlu1 %5928 }
 0x2b1   : > { %v7162_v3 = vadd.f32 %v5036_v13, %v7070_v55  ;;  %v1086_v4 = vpop.f32.mrb[43].mxu1  ;;  %1317 = vmax.xlane.f32.xlu1 %v1316_v25  ;;  %8626 = vst [vmem:[#allocation52_spill] sm:$0xff] %v7171_v12  ;;  %v7179_v25 = vpop.permute.xlu0 %5933 }
 0x2b2   : > { %v7165_v62 = vadd.f32 %v1086_v4, %v7080_v28  ;;  %8630 = vst [vmem:[#allocation56_spill] sm:$0xff] %v7179_v25 }
 0x2b3   : > { %v1325_v51 = vsel %vm249_vm0, %v7162_v3, -inf }
 0x2b4   : > { %1326 = vmax.xlane.f32.xlu0 %v1325_v51  ;;  %v1322_v15 = vsel %vm249_vm0, %v7165_v62, -inf  ;;  %v7173_v18 = vpop.permute.xlu1 %5938 }
 0x2b5   : > { %1323 = vmax.xlane.f32.xlu1 %v1322_v15  ;;  %8627 = vst [vmem:[#allocation53_spill] sm:$0xff] %v7173_v18  ;;  %v7191_v18 = vpop.permute.xlu0 %5943 }
 0x2b6   : > { %8632 = vst [vmem:[#allocation58_spill] sm:$0xff] %v7191_v18 }
 0x2b8   : > { %v7177_v13 = vpop.permute.xlu1 %5948 }
 0x2b9   : > { %8629 = vst [vmem:[#allocation55_spill] sm:$0xff] %v7177_v13 }
 0x2bc   : > { %v7187_v8 = vpop.permute.xlu1 %5953 }
 0x2bd   : > { %8631 = vst [vmem:[#allocation57_spill] sm:$0xff] %v7187_v8 }
 0x2c0   : > { %v7205_v18 = vpop.permute.xlu1 %2135 }
 0x2c1   : > { %8633 = vst [vmem:[#allocation59_spill] sm:$0xff] %v7205_v18 }
 0x2c4   : > { %v5055_v4 = vpop.f32.mrb[44].mxu1 }
 0x2c5   : > { %v7182_v36 = vadd.f32 %v5055_v4, %v7012_v32  ;;  %v1217_v22 = vpop.f32.mrb[45].mxu1 }
 0x2c6   : > { %v7185_v51 = vadd.f32 %v1217_v22, %v7017_v46 }
 0x2c7   : > { %v1331_v15 = vsel %vm249_vm0, %v7182_v36, -inf }
 0x2c8   : > { %1332 = vmax.xlane.f32.xlu0 %v1331_v15  ;;  %v5058_v12 = vpop.f32.mrb[46].mxu1  ;;  %v1328_v13 = vsel %vm249_vm0, %v7185_v51, -inf }
 0x2c9   : > { %v7196_v50 = vadd.f32 %v5058_v12, %v7028_v5  ;;  %v1227_v32 = vpop.f32.mrb[47].mxu1  ;;  %1329 = vmax.xlane.f32.xlu1 %v1328_v13  ;;  %v7210_v12 = vpop.permute.xlu0 %2133 }
 0x2ca   : > { %v7199_v22 = vadd.f32 %v1227_v32, %v7040_v35  ;;  %8634 = vst [vmem:[#allocation60_spill] sm:$0xff] %v7210_v12 }
 0x2cb   : > { %v1337_v46 = vsel %vm249_vm0, %v7196_v50, -inf }
 0x2cc   : > { %1338 = vmax.xlane.f32.xlu0 %v1337_v46  ;;  %v5061_v4 = vpop.f32.mrb[48].mxu1  ;;  %v1334_v15 = vsel %vm249_vm0, %v7199_v22, -inf }
 0x2cd   : > { %v7208_v8 = vadd.f32 %v5061_v4, %v7055_v31  ;;  %v1237_v5 = vpop.f32.mrb[49].mxu1  ;;  %1335 = vmax.xlane.f32.xlu1 %v1334_v15  ;;  %v7225_v15 = vpop.permute.xlu1 %2139 }
 0x2ce   : > { %v7213_v35 = vadd.f32 %v1237_v5, %v7045_v23  ;;  %8635 = vst [vmem:[#allocation61_spill] sm:$0xff] %v7225_v15  ;;  %v7229_v5 = vpop.permute.xlu0 %2137 }
 0x2cf   : > { %v1343_v13 = vsel %vm249_vm0, %v7208_v8, -inf  ;;  %8636 = vst [vmem:[#allocation62_spill] sm:$0xff] %v7229_v5 }
 0x2d0   : > { %1344 = vmax.xlane.f32.xlu0 %v1343_v13  ;;  %v5064_v32 = vpop.f32.mrb[50].mxu1  ;;  %v1340_v46 = vsel %vm249_vm0, %v7213_v35, -inf }
 0x2d1   : > { %v7220_v18 = vadd.f32 %v5064_v32, %v7070_v55  ;;  %v1247_v31 = vpop.f32.mrb[51].mxu1  ;;  %1341 = vmax.xlane.f32.xlu1 %v1340_v46  ;;  %v7233_v12 = vpop.permute.xlu1 %5963 }
 0x2d2   : > { %v7223_v4 = vadd.f32 %v1247_v31, %v7080_v28  ;;  %8637 = vst [vmem:[#allocation63_spill] sm:$0xff] %v7233_v12  ;;  %v7235_v55 = vpop.permute.xlu0 %5958 }
 0x2d3   : > { %v1349_v23 = vsel %vm249_vm0, %v7220_v18, -inf  ;;  %8638 = vst [vmem:[#allocation64_spill] sm:$0xff] %v7235_v55 }
 0x2d4   : > { %1350 = vmax.xlane.f32.xlu0 %v1349_v23  ;;  %v1346_v13 = vsel %vm249_vm0, %v7223_v4, -inf }
 0x2d5   : > { %1347 = vmax.xlane.f32.xlu1 %v1346_v13  ;;  %v7237_v32 = vpop.permute.xlu1 %2143 }
 0x2d6   : > { %8639 = vst [vmem:[#allocation65_spill] sm:$0xff] %v7237_v32  ;;  %v7239_v28 = vpop.permute.xlu0 %2141 }
 0x2d7   : > { %8640 = vst [vmem:[#allocation66_spill] sm:$0xff] %v7239_v28 }
 0x2d9   : > { %v7241_v46 = vpop.permute.xlu1 %2147 }
 0x2da   : > { %8641 = vst [vmem:[#allocation67_spill] sm:$0xff] %v7241_v46  ;;  %v7243_v31 = vpop.permute.xlu0 %2145 }
 0x2db   : > { %8642 = vst [vmem:[#allocation68_spill] sm:$0xff] %v7243_v31 }
 0x2dd   : > { %v7245_v15 = vpop.permute.xlu1 %5968 }
 0x2de   : > { %8643 = vst [vmem:[#allocation69_spill] sm:$0xff] %v7245_v15  ;;  %v7247_v5 = vpop.permute.xlu0 %2302 }
 0x2df   : > { %8644 = vst [vmem:[#allocation70_spill] sm:$0xff] %v7247_v5 }
 0x2e1   : > { %v7249_v23 = vpop.permute.xlu1 %2304 }
 0x2e2   : > { %8645 = vst [vmem:[#allocation71_spill] sm:$0xff] %v7249_v23  ;;  %v7251_v58 = vpop.permute.xlu0 %5973 }
 0x2e3   : > { %8646 = vst [vmem:[#allocation72_spill] sm:$0xff] %v7251_v58 }
 0x2f5   : > { %v1261_v13 = vpop.xlane.xlu1 %1260 }
 0x2f6   : > { %v1353_v12 = vsub.f32 %v7020_v0, %v1261_v13  ;;  %v1258_v55 = vpop.xlane.xlu0 %1257 }
 0x2f7   : > { %v1352_v32 = vsub.f32 %v7023_v61, %v1258_v55 }
 0x2f8   : > { %v1386_v33 = vmul.f32 1.442695, %v1353_v12 }
 0x2f9   : > { %v1384_v28 = vmul.f32 1.442695, %v1352_v32 }
 0x2fa   : > { %6077 = vpow2.f32 %v1386_v33  ;;  %v1267_v46 = vpop.xlane.xlu0 %1266 }
 0x2fb   : > { %6079 = vpow2.f32 %v1384_v28  ;;  %v1355_v31 = vsub.f32 %v7035_v21, %v1267_v46 }
 0x2fd   : > { %v1390_v15 = vmul.f32 1.442695, %v1355_v31 }
 0x2fe   : > { %v1270_v25 = vpop.xlane.xlu1 %1269  ;;  %v1264_v5 = vpop.xlane.xlu0 %1263 }
 0x2ff   : > { %6081 = vpow2.f32 %v1390_v15  ;;  %v1356_v23 = vsub.f32 %v7058_v16, %v1270_v25  ;;  %v1354_v58 = vsub.f32 %v7050_v60, %v1264_v5 }
 0x301   : > { %v1388_v27 = vmul.f32 1.442695, %v1354_v58  ;;  %v1392_v0 = vmul.f32 1.442695, %v1356_v23 }
 0x302   : > { %v1273_v13 = vpop.xlane.xlu0 %1272 }
 0x303   : > { %v1357_v61 = vsub.f32 %v7061_v38, %v1273_v13  ;;  %6083 = vpow2.f32 %v1388_v27 }
 0x304   : > { %v7259_v12 = vpop.eup %6077  ;;  %6085 = vpow2.f32 %v1392_v0 }
 0x305   : > { %v7261_v33 = vpop.eup %6079  ;;  %v1394_v55 = vmul.f32 1.442695, %v1357_v61  ;;  %v1451_v21 = vsel %vm249_vm0, %v7259_v12, 0.0 }
 0x306   : > { %v1279_v15 = vpop.xlane.xlu0 %1278  ;;  %1452 = vadd.xlane.f32.xlu0 %v1451_v21  ;;  %v1448_v60 = vsel %vm249_vm0, %v7261_v33, 0.0 }
 0x307   : > { %6087 = vpow2.f32 %v1394_v55  ;;  %v1359_v58 = vsub.f32 %v7073_v14, %v1279_v15  ;;  %1449 = vadd.xlane.f32.xlu1 %v1448_v60 }
 0x309   : > { %v7268_v16 = vpop.eup %6081  ;;  %v1398_v38 = vmul.f32 1.442695, %v1359_v58 }
 0x30a   : > { %v1276_v27 = vpop.xlane.xlu0 %1275  ;;  %v1457_v25 = vsel %vm249_vm0, %v7268_v16, 0.0 }
 0x30b   : > { %6089 = vpow2.f32 %v1398_v38  ;;  %v1358_v5 = vsub.f32 %v7083_v11, %v1276_v27  ;;  %1458 = vadd.xlane.f32.xlu0 %v1457_v25 }
 0x30d   : > { %v1396_v32 = vmul.f32 1.442695, %v1358_v5  ;;  %v7273_v28 = vpop.eup %6083 }
 0x30e   : > { %v1454_v46 = vsel %vm249_vm0, %v7273_v28, 0.0  ;;  %v7277_v14 = vpop.eup %6085 }
 0x30f   : > { %6091 = vpow2.f32 %v1396_v32  ;;  %1455 = vadd.xlane.f32.xlu1 %v1454_v46  ;;  %v1460_v11 = vsel %vm249_vm0, %v7277_v14, 0.0 }
 0x311   : > { %v7279_v31 = vpop.eup %6087 }
 0x312   : > { %v1463_v23 = vsel %vm249_vm0, %v7279_v31, 0.0 }
 0x313   : > { %1464 = vadd.xlane.f32.xlu0 %v1463_v23  ;;  %1461 = vadd.xlane.f32.xlu1 %v1460_v11 }
 0x315   : > { %v7285_v0 = vpop.eup %6089  ;;  %v1285_v13 = vpop.xlane.xlu1 %1284 }
 0x316   : > { %v1361_v61 = vsub.f32 %v7090_v9, %v1285_v13  ;;  %v1469_v55 = vsel %vm249_vm0, %v7285_v0, 0.0 }
 0x317   : > { %1470 = vadd.xlane.f32.xlu0 %v1469_v55 }
 0x318   : > { %v1402_v21 = vmul.f32 1.442695, %v1361_v61 }
 0x319   : > { %v7290_v15 = vpop.eup %6091  ;;  %v1282_v60 = vpop.xlane.xlu1 %1281 }
 0x31a   : > { %v1291_v58 = vpop.xlane.xlu0 %1290  ;;  %6093 = vpow2.f32 %v1402_v21  ;;  %v1360_v38 = vsub.f32 %v7093_v53, %v1282_v60  ;;  %v1466_v25 = vsel %vm249_vm0, %v7290_v15, 0.0 }
 0x31b   : > { %v1363_v27 = vsub.f32 %v7098_v7, %v1291_v58  ;;  %1467 = vadd.xlane.f32.xlu0 %v1466_v25 }
 0x31c   : > { %v1400_v5 = vmul.f32 1.442695, %v1360_v38 }
 0x31d   : > { %v1406_v9 = vmul.f32 1.442695, %v1363_v27  ;;  %v1288_v32 = vpop.xlane.xlu1 %1287 }
 0x31e   : > { %v1297_v46 = vpop.xlane.xlu0 %1296  ;;  %6095 = vpow2.f32 %v1400_v5  ;;  %v1362_v23 = vsub.f32 %v7101_v47, %v1288_v32 }
 0x31f   : > { %v1365_v11 = vsub.f32 %v7108_v44, %v1297_v46  ;;  %6097 = vpow2.f32 %v1406_v9 }
 0x320   : > { %v1404_v13 = vmul.f32 1.442695, %v1362_v23 }
 0x321   : > { %v1410_v61 = vmul.f32 1.442695, %v1365_v11  ;;  %v1294_v55 = vpop.xlane.xlu1 %1293 }
 0x322   : > { %v1303_v53 = vpop.xlane.xlu0 %1302  ;;  %6099 = vpow2.f32 %v1404_v13  ;;  %v1364_v7 = vsub.f32 %v7111_v24, %v1294_v55 }
 0x323   : > { %v1367_v21 = vsub.f32 %v7118_v26, %v1303_v53  ;;  %6101 = vpow2.f32 %v1410_v61 }
 0x324   : > { %v7300_v60 = vpop.eup %6093  ;;  %v1408_v58 = vmul.f32 1.442695, %v1364_v7 }
 0x325   : > { %v1414_v38 = vmul.f32 1.442695, %v1367_v21  ;;  %v1300_v27 = vpop.xlane.xlu1 %1299  ;;  %v1475_v47 = vsel %vm249_vm0, %v7300_v60, 0.0 }
 0x326   : > { %6103 = vpow2.f32 %v1408_v58  ;;  %v1366_v44 = vsub.f32 %v7121_v49, %v1300_v27  ;;  %1476 = vadd.xlane.f32.xlu1 %v1475_v47 }
 0x327   : > { %6105 = vpow2.f32 %v1414_v38 }
 0x328   : > { %v7305_v25 = vpop.eup %6095  ;;  %v1412_v5 = vmul.f32 1.442695, %v1366_v44 }
 0x329   : > { %v7307_v24 = vpop.eup %6097  ;;  %v1472_v26 = vsel %vm249_vm0, %v7305_v25, 0.0 }
 0x32a   : > { %6107 = vpow2.f32 %v1412_v5  ;;  %v1481_v9 = vsel %vm249_vm0, %v7307_v24, 0.0  ;;  %1473 = vadd.xlane.f32.xlu1 %v1472_v26 }
 0x32b   : > { %1482 = vadd.xlane.f32.xlu0 %v1481_v9 }
 0x32c   : > { %v7313_v32 = vpop.eup %6099 }
 0x32d   : > { %v7315_v46 = vpop.eup %6101  ;;  %v1478_v49 = vsel %vm249_vm0, %v7313_v32, 0.0 }
 0x32e   : > { %v1487_v23 = vsel %vm249_vm0, %v7315_v46, 0.0  ;;  %1479 = vadd.xlane.f32.xlu1 %v1478_v49 }
 0x32f   : > { %1488 = vadd.xlane.f32.xlu0 %v1487_v23 }
 0x330   : > { %v7321_v11 = vpop.eup %6103 }
 0x331   : > { %v7323_v13 = vpop.eup %6105  ;;  %v1484_v61 = vsel %vm249_vm0, %v7321_v11, 0.0 }
 0x332   : > { %v1493_v55 = vsel %vm249_vm0, %v7323_v13, 0.0  ;;  %1485 = vadd.xlane.f32.xlu1 %v1484_v61 }
 0x333   : > { %1494 = vadd.xlane.f32.xlu0 %v1493_v55 }
 0x334   : > { %v7329_v53 = vpop.eup %6107 }
 0x335   : > { %v1309_v7 = vpop.xlane.xlu0 %1308  ;;  %v1490_v21 = vsel %vm249_vm0, %v7329_v53, 0.0 }
 0x336   : > { %v1369_v58 = vsub.f32 %v7130_v40, %v1309_v7  ;;  %1491 = vadd.xlane.f32.xlu1 %v1490_v21  ;;  %v1306_v38 = vpop.xlane.xlu1 %1305 }
 0x337   : > { %v1368_v27 = vsub.f32 %v7133_v39, %v1306_v38 }
 0x338   : > { %v1418_v47 = vmul.f32 1.442695, %v1369_v58 }
 0x339   : > { %v1416_v44 = vmul.f32 1.442695, %v1368_v27  ;;  %v1315_v5 = vpop.xlane.xlu0 %1314 }
 0x33a   : > { %6109 = vpow2.f32 %v1418_v47  ;;  %v1371_v26 = vsub.f32 %v7140_v52, %v1315_v5  ;;  %v1312_v9 = vpop.xlane.xlu1 %1311 }
 0x33b   : > { %6111 = vpow2.f32 %v1416_v44  ;;  %v1370_v49 = vsub.f32 %v7143_v54, %v1312_v9 }
 0x33c   : > { %v1422_v23 = vmul.f32 1.442695, %v1371_v26 }
 0x33d   : > { %v1420_v61 = vmul.f32 1.442695, %v1370_v49  ;;  %v1321_v55 = vpop.xlane.xlu0 %1320 }
 0x33e   : > { %6113 = vpow2.f32 %v1422_v23  ;;  %v1373_v40 = vsub.f32 %v7150_v2, %v1321_v55  ;;  %v1318_v7 = vpop.xlane.xlu1 %1317 }
 0x33f   : > { %6115 = vpow2.f32 %v1420_v61  ;;  %v1372_v39 = vsub.f32 %v7153_v56, %v1318_v7 }
 0x340   : > { %v1426_v21 = vmul.f32 1.442695, %v1373_v40 }
 0x341   : > { %v1424_v58 = vmul.f32 1.442695, %v1372_v39  ;;  %v1327_v38 = vpop.xlane.xlu0 %1326 }
 0x342   : > { %6117 = vpow2.f32 %v1426_v21  ;;  %v1375_v52 = vsub.f32 %v7162_v3, %v1327_v38  ;;  %v1324_v27 = vpop.xlane.xlu1 %1323 }
 0x343   : > { %6119 = vpow2.f32 %v1424_v58  ;;  %v1374_v54 = vsub.f32 %v7165_v62, %v1324_v27 }
 0x344   : > { %v7341_v47 = vpop.eup %6109  ;;  %v1430_v44 = vmul.f32 1.442695, %v1375_v52 }
 0x345   : > { %v7343_v5 = vpop.eup %6111  ;;  %v1428_v2 = vmul.f32 1.442695, %v1374_v54  ;;  %v1499_v26 = vsel %vm249_vm0, %v7341_v47, 0.0 }
 0x346   : > { %6121 = vpow2.f32 %v1430_v44  ;;  %1500 = vadd.xlane.f32.xlu0 %v1499_v26  ;;  %v1496_v56 = vsel %vm249_vm0, %v7343_v5, 0.0 }
 0x347   : > { %1497 = vadd.xlane.f32.xlu1 %v1496_v56  ;;  %6123 = vpow2.f32 %v1428_v2 }
 0x348   : > { %v7349_v3 = vpop.eup %6113 }
 0x349   : > { %v7351_v9 = vpop.eup %6115  ;;  %v1505_v62 = vsel %vm249_vm0, %v7349_v3, 0.0 }
 0x34a   : > { %1506 = vadd.xlane.f32.xlu0 %v1505_v62  ;;  %v1502_v49 = vsel %vm249_vm0, %v7351_v9, 0.0 }
 0x34b   : > { %1503 = vadd.xlane.f32.xlu1 %v1502_v49 }
 0x34c   : > { %v7357_v23 = vpop.eup %6117 }
 0x34d   : > { %v7359_v61 = vpop.eup %6119  ;;  %v1511_v55 = vsel %vm249_vm0, %v7357_v23, 0.0 }
 0x34e   : > { %1512 = vadd.xlane.f32.xlu0 %v1511_v55  ;;  %v1508_v40 = vsel %vm249_vm0, %v7359_v61, 0.0 }
 0x34f   : > { %1509 = vadd.xlane.f32.xlu1 %v1508_v40 }
 0x350   : > { %v7365_v7 = vpop.eup %6121 }
 0x351   : > { %v1517_v39 = vsel %vm249_vm0, %v7365_v7, 0.0  ;;  %v7369_v21 = vpop.eup %6123 }
 0x352   : > { %1518 = vadd.xlane.f32.xlu0 %v1517_v39  ;;  %v1514_v38 = vsel %vm249_vm0, %v7369_v21, 0.0 }
 0x355   : > { %v1333_v58 = vpop.xlane.xlu0 %1332 }
 0x356   : > { %v1377_v52 = vsub.f32 %v7182_v36, %v1333_v58  ;;  %1515 = vadd.xlane.f32.xlu0 %v1514_v38  ;;  %v1330_v27 = vpop.xlane.xlu1 %1329 }
 0x357   : > { %v1376_v54 = vsub.f32 %v7185_v51, %v1330_v27 }
 0x358   : > { %v1434_v44 = vmul.f32 1.442695, %v1377_v52 }
 0x359   : > { %v1432_v2 = vmul.f32 1.442695, %v1376_v54  ;;  %v1339_v26 = vpop.xlane.xlu0 %1338 }
 0x35a   : > { %6125 = vpow2.f32 %v1434_v44  ;;  %v1379_v56 = vsub.f32 %v7196_v50, %v1339_v26  ;;  %v1336_v58 = vpop.xlane.xlu1 %1335 }
 0x35b   : > { %6127 = vpow2.f32 %v1432_v2  ;;  %v1378_v38 = vsub.f32 %v7199_v22, %v1336_v58 }
 0x35c   : > { %v1438_v62 = vmul.f32 1.442695, %v1379_v56 }
 0x35d   : > { %v1345_v39 = vpop.xlane.xlu0 %1344  ;;  %v1436_v54 = vmul.f32 1.442695, %v1378_v38 }
 0x35e   : > { %6129 = vpow2.f32 %v1438_v62  ;;  %v1381_v44 = vsub.f32 %v7208_v8, %v1345_v39  ;;  %v1342_v2 = vpop.xlane.xlu1 %1341 }
 0x35f   : > { %6131 = vpow2.f32 %v1436_v54  ;;  %v1380_v62 = vsub.f32 %v7213_v35, %v1342_v2 }
 0x360   : > { %v1442_v56 = vmul.f32 1.442695, %v1381_v44 }
 0x361   : > { %v1351_v52 = vpop.xlane.xlu0 %1350 }
 0x362   : > { %v1383_v27 = vsub.f32 %v7220_v18, %v1351_v52 }
 0x364   : > { %v7376_v49 = vpop.eup %6125  ;;  %v1446_v26 = vmul.f32 1.442695, %v1383_v27 }
 0x365   : > { %v7378_v55 = vpop.eup %6127  ;;  %v1523_v36 = vsel %vm249_vm0, %v7376_v49, 0.0 }
 0x366   : > { %1524 = vadd.xlane.f32.xlu0 %v1523_v36  ;;  %v1520_v51 = vsel %vm249_vm0, %v7378_v55, 0.0  ;;  %6133 = vpow2.f32 %v1446_v26 }
 0x367   : > { %1521 = vadd.xlane.f32.xlu1 %v1520_v51  ;;  %6135 = vpow2.f32 %v1442_v56 }
 0x368   : > { %v7384_v40 = vpop.eup %6129 }
 0x369   : > { %v1529_v50 = vsel %vm249_vm0, %v7384_v40, 0.0  ;;  %v7398_v18 = vpop.eup %6131 }
 0x36a   : > { %1530 = vadd.xlane.f32.xlu0 %v1529_v50  ;;  %v1526_v50 = vsel %vm249_vm0, %v7398_v18, 0.0 }
 0x370   : > { %v7400_v8 = vpop.eup %6133 }
 0x371   : > { %v7404_v39 = vpop.eup %6135  ;;  %v1541_v38 = vsel %vm249_vm0, %v7400_v8, 0.0 }
 0x372   : > { %v1535_v27 = vsel %vm249_vm0, %v7404_v39, 0.0 }
 0x378   : > { %2308 = vrot.lane.b32.xlu1 %v6721_v45, %s6344_s6  ;;  %v7396_v45 = vpop.xlane.xlu1 %1347 }
 0x380   : > { %2306 = vrot.lane.b32.xlu0 %v6717_v19, %s6344_s6  ;;  %v1440_v19 = vmul.f32 1.442695, %v1380_v62 }
 0x393   : > { %v1453_v36 = vpop.xlane.xlu0 %1452 }
 0x394   : > { %6137 = vrcp.f32 %v1453_v36  ;;  %v1450_v22 = vpop.xlane.xlu1 %1449 }
 0x395   : > { %6139 = vrcp.f32 %v1450_v22 }
 0x396   : > { %6141 = vpow2.f32 %v1440_v19 }
 0x398   : > { %v1459_v51 = vpop.xlane.xlu0 %1458 }
 0x399   : > { %6143 = vrcp.f32 %v1459_v51 }
 0x39c   : > { %1527 = vadd.xlane.f32.xlu1 %v1526_v50  ;;  %v1456_v35 = vpop.xlane.xlu1 %1455 }
 0x39d   : > { %6145 = vrcp.f32 %v1456_v35  ;;  %v5921_v35 = vunpack.i.h.bf16 %v7155_v42 }
 0x39e   : > { %v6138_v58 = vpop.eup %6137 }
 0x39f   : > { %v6140_v52 = vpop.eup %6139  ;;  %1542 = vadd.xlane.f32.xlu0 %v1541_v38  ;;  %v1547_v26 = vmul.f32 %v6138_v58, %v7259_v12  ;;  %v5920_v58 = vunpack.i.l.bf16 %v7155_v42 }
 0x3a0   : > { %v7410_v54 = vpop.eup %6141  ;;  %v1465_v44 = vpop.xlane.xlu0 %1464  ;;  %1536 = vadd.xlane.f32.xlu1 %v1535_v27  ;;  %v1545_v2 = vmul.f32 %v6140_v52, %v7261_v33 }
 0x3a1   : > { %6147 = vrcp.f32 %v1465_v44  ;;  %v1462_v56 = vpop.xlane.xlu1 %1461  ;;  %v1532_v62 = vsel %vm249_vm0, %v7410_v54, 0.0 }
 0x3a2   : > { %6149 = vrcp.f32 %v1462_v56  ;;  %5081 = vmatprep.mubr.msk.f32.mxu0 %vm249_vm0, %v1545_v2  ;;  %v1382_v2 = vsub.f32 %v7223_v4, %v7396_v45 }
 0x3a3   : > { %5082 = vmatmul.mubr.msk.f32.vlgmr.msra.gmra.mrb[44].mxu0 %vm249_vm0, %v1547_v26  ;;  %v6144_v36 = vpop.eup %6143 }
 0x3a4   : > { %5612 = vmatpush3.bf16.msra.mxu0 %v6782_v10  ;;  %v1471_v19 = vpop.xlane.xlu0 %1470  ;;  %1533 = vadd.xlane.f32.xlu1 %v1532_v62  ;;  %v1551_v51 = vmul.f32 %v6144_v36, %v7268_v16  ;;  %v7433_v16 = vpack.c.bf16 %v5921_v35, %v5920_v58  ;;  %v8652_v58 = vld [vmem:[#allocation14_spill] sm:$0xff] }
 0x3a5   : > { %5614 = vmatprep.subr.bf16.mxu0 %v6800_v37  ;;  %6151 = vrcp.f32 %v1471_v19  ;;  %v8648_v19 = vld [vmem:[#allocation56_spill] sm:$0xff] }
 0x3a6   : > { %v5936_v36 = vunpack.i.h.bf16 %v8648_v19 }
 0x3a7   : > { %v6146_v33 = vpop.eup %6145 }
 0x3a8   : > { %5616 = vmatpush3.bf16.msra.mxu0 %v6800_v37  ;;  %v1468_v12 = vpop.xlane.xlu0 %1467  ;;  %v1549_v22 = vmul.f32 %v6146_v33, %v7273_v28  ;;  %v5935_v33 = vunpack.i.l.bf16 %v8648_v19  ;;  %v8667_v19 = vld [vmem:[#allocation40_spill] sm:$0xff] }
 0x3a9   : > { %6153 = vrcp.f32 %v1468_v12  ;;  %5618 = vmatprep.subr.bf16.mxu0 %v6819_v59  ;;  %v8650_v12 = vld [vmem:[#allocation2_spill] sm:$0xff] }
 0x3aa   : > { %5084 = vmatprep.mubr.msk.f32.mxu0 %vm249_vm0, %v1549_v22  ;;  %v7487_v22 = vpack.c.bf16 %v5936_v36, %v5935_v33  ;;  %v8668_v36 = vld [vmem:[#allocation53_spill] sm:$0xff] }
 0x3ab   : > { %v6148_v50 = vpop.eup %6147  ;;  %5085 = vmatmul.mubr.msk.f32.gmra.mrb[46].mxu0 %vm249_vm0, %v1551_v51  ;;  %v5941_v33 = vunpack.i.h.bf16 %v8668_v36 }
 0x3ac   : > { %v6150_v10 = vpop.eup %6149  ;;  %v1555_v37 = vmul.f32 %v6148_v50, %v7279_v31  ;;  %5620 = vmatpush3.bf16.msra.mxu0 %v6819_v59 }
 0x3ad   : > { %v1553_v38 = vmul.f32 %v6150_v10, %v7277_v14  ;;  %5622 = vmatprep.subr.bf16.mxu0 %v6567_v6 }
 0x3af   : > { %5087 = vmatprep.mubr.msk.f32.mxu0 %vm249_vm0, %v1553_v38  ;;  %v6152_v28 = vpop.eup %6151 }
 0x3b0   : > { %5088 = vmatmul.mubr.msk.f32.gmra.mrb[48].mxu0 %vm249_vm0, %v1555_v37  ;;  %v1559_v14 = vmul.f32 %v6152_v28, %v7285_v0  ;;  %v8653_v28 = vld [vmem:[#allocation20_spill] sm:$0xff] }
 0x3b1   : > { %5624 = vmatpush3.bf16.msra.mxu0 %v6567_v6 }
 0x3b2   : > { %5643 = vmatprep.subr.msk.bf16.mxu0 %vm6857_vm2, %v7433_v16 }
 0x3b3   : > { %v6154_v42 = vpop.eup %6153  ;;  %v1477_v31 = vpop.xlane.xlu1 %1476 }
 0x3b4   : > { %v1557_v59 = vmul.f32 %v6154_v42, %v7290_v15  ;;  %6155 = vrcp.f32 %v1477_v31 }
 0x3b5   : > { %5978 = vrot.lane.b32.xlu0 %v6555_v1, %s6343_s5  ;;  %5983 = vrot.lane.b32.xlu1 %v6627_v29, %s6343_s5 }
 0x3b6   : > { %5090 = vmatprep.mubr.msk.f32.mxu0 %vm249_vm0, %v1557_v59  ;;  %v8654_v59 = vld [vmem:[#allocation54_spill] sm:$0xff] }
 0x3b7   : > { %5091 = vmatmul.mubr.msk.f32.gmra.mrb[50].mxu0 %vm249_vm0, %v1559_v14  ;;  %v1474_v6 = vpop.xlane.xlu1 %1473  ;;  %v5926_v14 = vunpack.i.h.bf16 %v8654_v59 }
 0x3b8   : > { %v1483_v52 = vpop.xlane.xlu0 %1482  ;;  %6157 = vrcp.f32 %v1474_v6  ;;  %v5925_v6 = vunpack.i.l.bf16 %v8654_v59  ;;  %v8679_v59 = vld [vmem:[#allocation31_spill] sm:$0xff] }
 0x3b9   : > { %2310 = vrot.lane.b32.xlu0 %v6734_v17, %s6344_s6  ;;  %6159 = vrcp.f32 %v1483_v52 }
 0x3bb   : > { %v1480_v15 = vpop.xlane.xlu1 %1479 }
 0x3bc   : > { %v1489_v27 = vpop.xlane.xlu0 %1488  ;;  %6161 = vrcp.f32 %v1480_v15 }
 0x3bd   : > { %2314 = vrot.lane.b32.xlu0 %v6751_v30, %s6344_s6  ;;  %6163 = vrcp.f32 %v1489_v27 }
 0x3be   : > { %v6156_v0 = vpop.eup %6155 }
 0x3bf   : > { %v1486_v1 = vpop.xlane.xlu1 %1485  ;;  %v1563_v56 = vmul.f32 %v6156_v0, %v7300_v60 }
 0x3c0   : > { %v1495_v29 = vpop.xlane.xlu0 %1494  ;;  %6165 = vrcp.f32 %v1486_v1  ;;  %v8655_v1 = vld [vmem:[#allocation26_spill] sm:$0xff] }
 0x3c1   : > { %5988 = vrot.lane.b32.xlu0 %v6663_v43, %s6343_s5  ;;  %6167 = vrcp.f32 %v1495_v29  ;;  %v1444_v43 = vmul.f32 1.442695, %v1382_v2 }
 0x3c2   : > { %v6158_v44 = vpop.eup %6157 }
 0x3c3   : > { %v1492_v17 = vpop.xlane.xlu1 %1491  ;;  %v1561_v26 = vmul.f32 %v6158_v44, %v7305_v25  ;;  %v6160_v30 = vpop.eup %6159  ;;  %v5647_v44 = vpack.c.bf16 %v5926_v14, %v5925_v6 }
 0x3c4   : > { %6169 = vrcp.f32 %v1492_v17  ;;  %v1567_v25 = vmul.f32 %v6160_v30, %v7307_v24  ;;  %v8647_v24 = vld [vmem:[#allocation48_spill] sm:$0xff]  ;;  %v8657_v17 = vld [vmem:[#allocation9_spill] sm:$0xff] }
 0x3c5   : > { %2473 = vrot.lane.b32.xlu0 %v6772_v41, %s6344_s6  ;;  %5109 = vmatprep.mubr.msk.f32.mxu1 %vm249_vm0, %v1561_v26  ;;  %6171 = vpow2.f32 %v1444_v43  ;;  %v8659_v43 = vld [vmem:[#allocation52_spill] sm:$0xff] }
 0x3c6   : > { %v6162_v62 = vpop.eup %6161  ;;  %5110 = vmatmul.mubr.msk.f32.vlgmr.msra.gmra.mrb[52].mxu1 %vm249_vm0, %v1563_v56 }
 0x3c7   : > { %5628 = vmatpush3.bf16.msra.mxu1 %v6603_v20  ;;  %v1565_v4 = vmul.f32 %v6162_v62, %v7313_v32  ;;  %v6164_v60 = vpop.eup %6163 }
 0x3c8   : > { %5630 = vmatprep.subr.bf16.mxu1 %v6639_v34  ;;  %v1571_v32 = vmul.f32 %v6164_v60, %v7315_v46  ;;  %v8661_v60 = vld [vmem:[#allocation27_spill] sm:$0xff] }
 0x3c9   : > { %2477 = vrot.lane.b32.xlu0 %v6790_v63, %s6344_s6  ;;  %5112 = vmatprep.mubr.msk.f32.mxu1 %vm249_vm0, %v1565_v4  ;;  %v5931_v4 = vunpack.i.h.bf16 %v8659_v43 }
 0x3ca   : > { %v6166_v41 = vpop.eup %6165  ;;  %5113 = vmatmul.mubr.msk.f32.gmra.mrb[54].mxu1 %vm249_vm0, %v1567_v25  ;;  %v8660_v25 = vld [vmem:[#allocation30_spill] sm:$0xff] }
 0x3cb   : > { %5632 = vmatpush3.bf16.msra.mxu1 %v6639_v34  ;;  %v1569_v20 = vmul.f32 %v6166_v41, %v7321_v11  ;;  %v6168_v45 = vpop.eup %6167  ;;  %v8649_v11 = vld [vmem:[#allocation33_spill] sm:$0xff]  ;;  %v8662_v41 = vpack.i.bf16 %v8660_v25, %v8661_v60  ;;  %v8690_v60 = vld [vmem:[#allocation66_spill] sm:$0xff] }
 0x3cc   : > { %5634 = vmatprep.subr.bf16.mxu1 %v6675_v48  ;;  %v1575_v46 = vmul.f32 %v6168_v45, %v7323_v13  ;;  %v8651_v13 = vld [vmem:[#allocation8_spill] sm:$0xff] }
 0x3cd   : > { %2479 = vrot.lane.b32.xlu0 %v8647_v24, %s6344_s6  ;;  %5115 = vmatprep.mubr.msk.f32.mxu1 %vm249_vm0, %v1569_v20  ;;  %v8665_v24 = vld [vmem:[#allocation36_spill] sm:$0xff] }
 0x3ce   : > { %v6170_v63 = vpop.eup %6169  ;;  %5116 = vmatmul.mubr.msk.f32.gmra.mrb[56].mxu1 %vm249_vm0, %v1571_v32 }
 0x3cf   : > { %5636 = vmatpush3.bf16.msra.mxu1 %v6675_v48  ;;  %v1573_v34 = vmul.f32 %v6170_v63, %v7329_v53  ;;  %v7494_v53 = vpop.eup %6171 }
 0x3d0   : > { %5638 = vmatprep.subr.bf16.mxu1 %v8649_v11  ;;  %v1538_v35 = vsel %vm249_vm0, %v7494_v53, 0.0 }
 0x3d1   : > { %2483 = vrot.lane.b32.xlu0 %v8650_v12, %s6344_s6  ;;  %5118 = vmatprep.mubr.msk.f32.mxu1 %vm249_vm0, %v1573_v34  ;;  %v5940_v34 = vunpack.i.l.bf16 %v8668_v36  ;;  %v8669_v12 = vld [vmem:[#allocation44_spill] sm:$0xff]  ;;  %v8697_v36 = vld [vmem:[#allocation29_spill] sm:$0xff] }
 0x3d2   : > { %5119 = vmatmul.mubr.msk.f32.gmra.mrb[58].mxu1 %vm249_vm0, %v1575_v46 }
 0x3d3   : > { %5640 = vmatpush3.bf16.msra.mxu1 %v8649_v11  ;;  %v1501_v51 = vpop.xlane.xlu0 %1500 }
 0x3d4   : > { %6173 = vrcp.f32 %v1501_v51  ;;  %5667 = vmatprep.subr.msk.bf16.mxu1 %vm6857_vm2, %v7487_v22  ;;  %v1498_v48 = vpop.xlane.xlu1 %1497  ;;  %v8670_v51 = vld [vmem:[#allocation43_spill] sm:$0xff] }
 0x3d5   : > { %6175 = vrcp.f32 %v1498_v48  ;;  %2640 = vrot.lane.b32.xlu0 %v8651_v13, %s6344_s6  ;;  %v8671_v48 = vpack.i.bf16 %v8669_v12, %v8670_v51  ;;  %v8672_v13 = vld [vmem:[#allocation42_spill] sm:$0xff]  ;;  %v8701_v12 = vld [vmem:[#allocation69_spill] sm:$0xff] }
 0x3d6   : > { %v5971_v51 = vunpack.i.h.bf16 %v8701_v12 }
 0x3d7   : > { %v1507_v50 = vpop.xlane.xlu0 %1506 }
 0x3d8   : > { %6177 = vrcp.f32 %v1507_v50  ;;  %v1504_v10 = vpop.xlane.xlu1 %1503  ;;  %v5659_v50 = vpack.c.bf16 %v5941_v33, %v5940_v34  ;;  %v8698_v34 = vld [vmem:[#allocation6_spill] sm:$0xff] }
 0x3d9   : > { %6179 = vrcp.f32 %v1504_v10  ;;  %2644 = vrot.lane.b32.xlu0 %v8652_v58, %s6344_s6  ;;  %1539 = vadd.xlane.f32.xlu1 %v1538_v35  ;;  %v8673_v35 = vld [vmem:[#allocation60_spill] sm:$0xff]  ;;  %v8675_v58 = vld [vmem:[#allocation49_spill] sm:$0xff] }
 0x3db   : > { %v1513_v37 = vpop.xlane.xlu0 %1512 }
 0x3dc   : > { %6181 = vrcp.f32 %v1513_v37  ;;  %v1510_v38 = vpop.xlane.xlu1 %1509 }
 0x3dd   : > { %6183 = vrcp.f32 %v1510_v38  ;;  %2648 = vrot.lane.b32.xlu0 %v8653_v28, %s6344_s6  ;;  %v8677_v38 = vld [vmem:[#allocation45_spill] sm:$0xff] }
 0x3de   : > { %v6174_v42 = vpop.eup %6173  ;;  %v8678_v28 = vld [vmem:[#allocation57_spill] sm:$0xff] }
 0x3df   : > { %v6176_v31 = vpop.eup %6175  ;;  %v1519_v52 = vpop.xlane.xlu0 %1518  ;;  %v1579_v27 = vmul.f32 %v6174_v42, %v7341_v47  ;;  %v8656_v47 = vld [vmem:[#allocation12_spill] sm:$0xff]  ;;  %v5956_v42 = vunpack.i.h.bf16 %v8678_v28 }
 0x3e0   : > { %v1577_v15 = vmul.f32 %v6176_v31, %v7343_v5  ;;  %6185 = vrcp.f32 %v1519_v52  ;;  %v8658_v26 = vpack.i.bf16 %v8656_v47, %v8657_v17  ;;  %v5955_v31 = vunpack.i.l.bf16 %v8678_v28  ;;  %v8680_v52 = vld [vmem:[#allocation50_spill] sm:$0xff]  ;;  %v8683_v17 = vld [vmem:[#allocation5_spill] sm:$0xff] }
 0x3e1   : > { %2652 = vrot.lane.b32.xlu0 %v8655_v1, %s6344_s6  ;;  %v8709_v28 = vld [vmem:[#allocation34_spill] sm:$0xff] }
 0x3e2   : > { %v6178_v29 = vpop.eup %6177  ;;  %5137 = vmatprep.mubr.msk.f32.mxu0 %vm249_vm0, %v1577_v15  ;;  %v5689_v14 = vpack.c.bf16 %v5956_v42, %v5955_v31 }
 0x3e3   : > { %v6180_v0 = vpop.eup %6179  ;;  %v1516_v2 = vpop.xlane.xlu0 %1515  ;;  %5138 = vmatmul.mubr.msk.f32.vlgmr.msra.gmra.mrb[52].mxu0 %vm249_vm0, %v1579_v27  ;;  %v1583_v56 = vmul.f32 %v6178_v29, %v7349_v3  ;;  %v8663_v3 = vld [vmem:[#allocation37_spill] sm:$0xff]  ;;  %v8681_v27 = vld [vmem:[#allocation58_spill] sm:$0xff] }
 0x3e4   : > { %6187 = vrcp.f32 %v1516_v2  ;;  %5646 = vmatpush3.bf16.xpose.msk.msra.mxu0 %vm6857_vm2, %v7433_v16  ;;  %v1581_v5 = vmul.f32 %v6180_v0, %v7351_v9  ;;  %v5930_v16 = vunpack.i.l.bf16 %v8659_v43  ;;  %v5946_v1 = vunpack.i.h.bf16 %v8681_v27  ;;  %v8682_v0 = vld [vmem:[#allocation63_spill] sm:$0xff] }
 0x3e5   : > { %5649 = vmatprep.subr.msk.bf16.mxu0 %vm6857_vm2, %v5647_v44  ;;  %6003 = vrot.lane.b32.xlu0 %v8658_v26, %s6344_s6  ;;  %v5945_v29 = vunpack.i.l.bf16 %v8681_v27  ;;  %v5965_v2 = vunpack.i.l.bf16 %v8682_v0  ;;  %v8714_v27 = vld [vmem:[#allocation47_spill] sm:$0xff] }
 0x3e6   : > { %v6182_v30 = vpop.eup %6181  ;;  %5140 = vmatprep.mubr.msk.f32.mxu0 %vm249_vm0, %v1581_v5  ;;  %v5653_v32 = vpack.c.bf16 %v5931_v4, %v5930_v16  ;;  %v8688_v16 = vld [vmem:[#allocation61_spill] sm:$0xff] }
 0x3e7   : > { %v6184_v62 = vpop.eup %6183  ;;  %5141 = vmatmul.mubr.msk.f32.gmra.mrb[54].mxu0 %vm249_vm0, %v1583_v56  ;;  %v1587_v20 = vmul.f32 %v6182_v30, %v7357_v23  ;;  %v5671_v26 = vpack.c.bf16 %v5946_v1, %v5945_v29  ;;  %v8684_v56 = vld [vmem:[#allocation59_spill] sm:$0xff]  ;;  %v8715_v1 = vld [vmem:[#allocation46_spill] sm:$0xff] }
 0x3e8   : > { %v1585_v9 = vmul.f32 %v6184_v62, %v7359_v61  ;;  %v8664_v61 = vld [vmem:[#allocation38_spill] sm:$0xff]  ;;  %v8716_v29 = vpack.i.bf16 %v8714_v27, %v8715_v1 }
 0x3e9   : > { %6018 = vrot.lane.b32.xlu0 %v8662_v41, %s6344_s6  ;;  %v8666_v63 = vpack.i.bf16 %v8664_v61, %v8665_v24  ;;  %v8685_v62 = vld [vmem:[#allocation62_spill] sm:$0xff]  ;;  %v8691_v41 = vld [vmem:[#allocation17_spill] sm:$0xff]  ;;  %v8694_v61 = vld [vmem:[#allocation23_spill] sm:$0xff] }
 0x3ea   : > { %2312 = vrot.lane.b32.xlu1 %v8663_v3, %s6344_s6  ;;  %5143 = vmatprep.mubr.msk.f32.mxu0 %vm249_vm0, %v1585_v9  ;;  %v6186_v45 = vpop.eup %6185  ;;  %v8692_v3 = vld [vmem:[#allocation65_spill] sm:$0xff]  ;;  %v8695_v24 = vld [vmem:[#allocation64_spill] sm:$0xff] }
 0x3eb   : > { %5144 = vmatmul.mubr.msk.f32.gmra.mrb[56].mxu0 %vm249_vm0, %v1587_v20  ;;  %v1591_v46 = vmul.f32 %v6186_v45, %v7365_v7  ;;  %v8693_v45 = vld [vmem:[#allocation68_spill] sm:$0xff] }
 0x3ec   : > { %5652 = vmatpush3.bf16.xpose.msk.msra.mxu0 %vm6857_vm2, %v5647_v44  ;;  %v5966_v44 = vunpack.i.h.bf16 %v8682_v0 }
 0x3ed   : > { %5655 = vmatprep.subr.msk.bf16.mxu0 %vm6857_vm2, %v5653_v32  ;;  %6028 = vrot.lane.b32.xlu0 %v8666_v63, %s6344_s6  ;;  %v5961_v63 = vunpack.i.h.bf16 %v8695_v24 }
 0x3ee   : > { %v6188_v23 = vpop.eup %6187  ;;  %2316 = vrot.lane.b32.xlu1 %v8667_v19, %s6344_s6  ;;  %v5695_v30 = vpack.c.bf16 %v5966_v44, %v5965_v2  ;;  %v8696_v19 = vld [vmem:[#allocation67_spill] sm:$0xff] }
 0x3ef   : > { %v1589_v11 = vmul.f32 %v6188_v23, %v7369_v21  ;;  %v8674_v21 = vld [vmem:[#allocation51_spill] sm:$0xff]  ;;  %v5960_v23 = vunpack.i.l.bf16 %v8695_v24 }
 0x3f0   : > { %v8676_v37 = vpack.i.bf16 %v8674_v21, %v8675_v58  ;;  %v8706_v21 = vld [vmem:[#allocation21_spill] sm:$0xff]  ;;  %v8717_v2 = vld [vmem:[#allocation7_spill] sm:$0xff] }
 0x3f1   : > { %6038 = vrot.lane.b32.xlu0 %v8671_v48, %s6344_s6  ;;  %5146 = vmatprep.mubr.msk.f32.mxu0 %vm249_vm0, %v1589_v11  ;;  %v5683_v33 = vpack.c.bf16 %v5961_v63, %v5960_v23  ;;  %v8699_v11 = vld [vmem:[#allocation3_spill] sm:$0xff]  ;;  %v5970_v48 = vunpack.i.l.bf16 %v8701_v12  ;;  %v8720_v12 = vld [vmem:[#allocation70_spill] sm:$0xff] }
 0x3f2   : > { %2471 = vrot.lane.b32.xlu1 %v8672_v13, %s6344_s6  ;;  %5147 = vmatmul.mubr.msk.f32.gmra.mrb[58].mxu0 %vm249_vm0, %v1591_v46  ;;  %v8700_v46 = vpack.i.bf16 %v8698_v34, %v8699_v11  ;;  %v8702_v13 = vld [vmem:[#allocation18_spill] sm:$0xff] }
 0x3f3   : > { %v1525_v10 = vpop.xlane.xlu0 %1524  ;;  %5193 = vmatprep.mubr.msk.f32.mxu0 %vm635_vm1, %v8673_v35  ;;  %v7652_v35 = vpack.c.bf16 %v5971_v51, %v5970_v48 }
 0x3f4   : > { %6189 = vrcp.f32 %v1525_v10  ;;  %5658 = vmatpush3.bf16.xpose.msk.msra.mxu0 %vm6857_vm2, %v5653_v32  ;;  %v1522_v7 = vpop.xlane.xlu1 %1521 }
 0x3f5   : > { %6191 = vrcp.f32 %v1522_v7  ;;  %5661 = vmatprep.subr.msk.bf16.mxu0 %vm6857_vm2, %v5659_v50  ;;  %6048 = vrot.lane.b32.xlu0 %v8676_v37, %s6344_s6  ;;  %v8705_v7 = vld [vmem:[#allocation24_spill] sm:$0xff] }
 0x3f6   : > { %2475 = vrot.lane.b32.xlu1 %v8677_v38, %s6344_s6  ;;  %v8707_v58 = vpack.i.bf16 %v8705_v7, %v8706_v21  ;;  %v8708_v38 = vld [vmem:[#allocation35_spill] sm:$0xff] }
 0x3f7   : > { %v1531_v37 = vpop.xlane.xlu0 %1530  ;;  %v8710_v42 = vpack.i.bf16 %v8708_v38, %v8709_v28 }
 0x3f8   : > { %v7667_v31 = vpop.permute.xlu1 %2308  ;;  %6193 = vrcp.f32 %v1531_v37 }
 0x3fa   : > { %5993 = vrot.lane.b32.xlu1 %v8679_v59, %s6343_s5  ;;  %v8711_v59 = vld [vmem:[#allocation41_spill] sm:$0xff] }
 0x3fc   : > { %5664 = vmatpush3.bf16.xpose.msk.msra.mxu0 %vm6857_vm2, %v5659_v50  ;;  %v8703_v50 = vld [vmem:[#allocation15_spill] sm:$0xff] }
 0x3fd   : > { %5691 = vmatprep.subr.msk.bf16.mxu0 %vm6857_vm2, %v5689_v14  ;;  %v8704_v10 = vpack.i.bf16 %v8702_v13, %v8703_v50  ;;  %v8721_v50 = vld [vmem:[#allocation71_spill] sm:$0xff] }
 0x3fe   : > { %v6190_v6 = vpop.eup %6189  ;;  %2481 = vrot.lane.b32.xlu1 %v8680_v52, %s6344_s6  ;;  %v7673_v52 = vpop.permute.xlu0 %2306 }
 0x3ff   : > { %v6192_v15 = vpop.eup %6191  ;;  %v1595_v47 = vmul.f32 %v6190_v6, %v7376_v49  ;;  %v8686_v49 = vld [vmem:[#allocation11_spill] sm:$0xff] }
 0x400   : > { %v1593_v5 = vmul.f32 %v6192_v15, %v7378_v55  ;;  %v8687_v55 = vld [vmem:[#allocation55_spill] sm:$0xff] }
 0x401   : > { %v5951_v43 = vunpack.i.h.bf16 %v8687_v55  ;;  %v5950_v4 = vunpack.i.l.bf16 %v8687_v55 }
 0x402   : > { %2485 = vrot.lane.b32.xlu1 %v8683_v17, %s6344_s6  ;;  %5165 = vmatprep.mubr.msk.f32.mxu1 %vm249_vm0, %v1593_v5  ;;  %v8718_v5 = vld [vmem:[#allocation4_spill] sm:$0xff] }
 0x403   : > { %5194 = vmatmul.mubr.msk.f32.vlgmr.msra.gmra.mrb[60].mxu0 %vm635_vm1, %v8684_v56  ;;  %5166 = vmatmul.mubr.msk.f32.vlgmr.msra.gmra.mrb[60].mxu1 %vm249_vm0, %v1595_v47  ;;  %v5677_v20 = vpack.c.bf16 %v5951_v43, %v5950_v4  ;;  %v8719_v47 = vpack.i.bf16 %v8717_v2, %v8718_v5 }
 0x404   : > { %5196 = vmatprep.mubr.msk.f32.mxu0 %vm635_vm1, %v8685_v62  ;;  %5670 = vmatpush3.bf16.xpose.msk.msra.mxu1 %vm6857_vm2, %v7487_v22  ;;  %v8689_v22 = vld [vmem:[#allocation72_spill] sm:$0xff]  ;;  %v6194_v62 = vpop.eup %6193 }
 0x405   : > { %5694 = vmatpush3.bf16.xpose.msk.msra.mxu0 %vm6857_vm2, %v5689_v14  ;;  %5673 = vmatprep.subr.msk.bf16.mxu1 %vm6857_vm2, %v5671_v26  ;;  %v5976_v9 = vunpack.i.h.bf16 %v8689_v22  ;;  %v5975_v25 = vunpack.i.l.bf16 %v8689_v22  ;;  %v8712_v14 = vld [vmem:[#allocation39_spill] sm:$0xff]  ;;  %v1599_v4 = vmul.f32 %v6194_v62, %v7384_v40 }
 0x406   : > { %5697 = vmatprep.subr.msk.bf16.mxu0 %vm6857_vm2, %v5695_v30  ;;  %2642 = vrot.lane.b32.xlu1 %v8686_v49, %s6344_s6  ;;  %v8713_v6 = vpack.i.bf16 %v8711_v59, %v8712_v14 }
 0x407   : > { %5197 = vmatmul.mubr.msk.f32.gmra.mrb[62].mxu0 %vm635_vm1, %v8688_v16  ;;  %v5701_v32 = vpack.c.bf16 %v5976_v9, %v5975_v25 }
 0x408   : > { %5199 = vmatprep.mubr.msk.f32.mxu0 %vm635_vm1, %v8690_v60 }
 0x40a   : > { %2646 = vrot.lane.b32.xlu1 %v8691_v41, %s6344_s6 }
 0x40b   : > { %5200 = vmatmul.mubr.msk.f32.gmra.mrb[64].mxu0 %vm635_vm1, %v8692_v3 }
 0x40c   : > { %5202 = vmatprep.mubr.msk.f32.mxu0 %vm635_vm1, %v8693_v45  ;;  %5676 = vmatpush3.bf16.xpose.msk.msra.mxu1 %vm6857_vm2, %v5671_v26 }
 0x40d   : > { %5700 = vmatpush3.bf16.xpose.msk.msra.mxu0 %vm6857_vm2, %v5695_v30  ;;  %5679 = vmatprep.subr.msk.bf16.mxu1 %vm6857_vm2, %v5677_v20 }
 0x40e   : > { %5703 = vmatprep.subr.msk.bf16.mxu0 %vm6857_vm2, %v5701_v32  ;;  %2650 = vrot.lane.b32.xlu1 %v8694_v61, %s6344_s6 }
 0x40f   : > { %5203 = vmatmul.mubr.msk.f32.gmra.mrb[66].mxu0 %vm635_vm1, %v8696_v19 }
 0x412   : > { %2654 = vrot.lane.b32.xlu1 %v8697_v36, %s6344_s6 }
 0x414   : > { %5682 = vmatpush3.bf16.xpose.msk.msra.mxu1 %vm6857_vm2, %v5677_v20 }
 0x415   : > { %5706 = vmatpush3.bf16.xpose.msk.msra.mxu0 %vm6857_vm2, %v5701_v32  ;;  %5685 = vmatprep.subr.msk.bf16.mxu1 %vm6857_vm2, %v5683_v33 }
 0x416   : > { %5998 = vrot.lane.b32.xlu1 %v8700_v46, %s6344_s6 }
 0x41a   : > { %6008 = vrot.lane.b32.xlu1 %v8704_v10, %s6344_s6 }
 0x41c   : > { %5688 = vmatpush3.bf16.xpose.msk.msra.mxu1 %vm6857_vm2, %v5683_v33 }
 0x41d   : > { %5715 = vmatprep.subr.msk.bf16.mxu1 %vm6857_vm2, %v7652_v35 }
 0x41e   : > { %6013 = vrot.lane.b32.xlu1 %v8707_v58, %s6344_s6 }
 0x422   : > { %6023 = vrot.lane.b32.xlu1 %v8710_v42, %s6344_s6 }
 0x426   : > { %6033 = vrot.lane.b32.xlu1 %v8713_v6, %s6344_s6 }
 0x429   : > { %v1528_v15 = vpop.xlane.xlu1 %1527 }
 0x42a   : > { %6195 = vrcp.f32 %v1528_v15  ;;  %6043 = vrot.lane.b32.xlu1 %v8716_v29, %s6344_s6 }
 0x42c   : > { %v1543_v0 = vpop.xlane.xlu0 %1542 }
 0x42d   : > { %v1537_v44 = vpop.xlane.xlu1 %1536 }
 0x42e   : > { %6053 = vrot.lane.b32.xlu1 %v8719_v47, %s6344_s6  ;;  %6197 = vrcp.f32 %v1537_v44 }
 0x430   : > { %v5979_v17 = vpop.permute.xlu0 %5978 }
 0x431   : > { %v5981_v26 = vunpack.i.h.bf16 %v5979_v17  ;;  %v5980_v56 = vunpack.i.l.bf16 %v5979_v17  ;;  %v1534_v30 = vpop.xlane.xlu1 %1533 }
 0x432   : > { %6199 = vrcp.f32 %v1534_v30 }
 0x433   : > { %v5707_v49 = vpack.c.bf16 %v5981_v26, %v5980_v56  ;;  %6201 = vrcp.f32 %v1543_v0 }
 0x434   : > { %v6196_v55 = vpop.eup %6195 }
 0x435   : > { %5709 = vmatprep.subr.msk.bf16.mxu0 %vm6857_vm2, %v5707_v49  ;;  %v1597_v43 = vmul.f32 %v6196_v55, %v7398_v18  ;;  %v2311_v18 = vpop.permute.xlu0 %2310  ;;  %v5984_v32 = vpop.permute.xlu1 %5983 }
 0x436   : > { %5712 = vmatpush3.bf16.xpose.msk.msra.mxu0 %vm6857_vm2, %v5707_v49  ;;  %v5986_v11 = vunpack.i.h.bf16 %v5984_v32  ;;  %v5985_v46 = vunpack.i.l.bf16 %v5984_v32 }
 0x437   : > { %5168 = vmatprep.mubr.msk.f32.mxu1 %vm249_vm0, %v1597_v43 }
 0x438   : > { %5169 = vmatmul.mubr.msk.f32.gmra.mrb[62].mxu1 %vm249_vm0, %v1599_v4  ;;  %v6198_v16 = vpop.eup %6197 }
 0x439   : > { %v1603_v25 = vmul.f32 %v6198_v16, %v7404_v39  ;;  %v2315_v60 = vpop.permute.xlu0 %2314 }
 0x43c   : > { %v6200_v22 = vpop.eup %6199 }
 0x43d   : > { %v1601_v9 = vmul.f32 %v6200_v22, %v7410_v54  ;;  %v5989_v41 = vpop.permute.xlu0 %5988  ;;  %v6202_v23 = vpop.eup %6201 }
 0x43e   : > { %v1607_v34 = vmul.f32 %v6202_v23, %v7400_v8  ;;  %v5719_v8 = vpack.c.bf16 %v5986_v11, %v5985_v46  ;;  %v5991_v7 = vunpack.i.h.bf16 %v5989_v41  ;;  %v5990_v21 = vunpack.i.l.bf16 %v5989_v41 }
 0x43f   : > { %5171 = vmatprep.mubr.msk.f32.mxu1 %vm249_vm0, %v1601_v9 }
 0x440   : > { %5172 = vmatmul.mubr.msk.f32.gmra.mrb[64].mxu1 %vm249_vm0, %v1603_v25  ;;  %v5725_v28 = vpack.c.bf16 %v5991_v7, %v5990_v21 }
 0x441   : > { %v2474_v20 = vpop.permute.xlu0 %2473 }
 0x445   : > { %v2478_v3 = vpop.permute.xlu0 %2477 }
 0x449   : > { %v2480_v40 = vpop.permute.xlu0 %2479 }
 0x44d   : > { %v2484_v45 = vpop.permute.xlu0 %2483 }
 0x451   : > { %v2641_v63 = vpop.permute.xlu0 %2640 }
 0x455   : > { %v7695_v19 = vpop.permute.xlu0 %2644 }
 0x459   : > { %v7707_v13 = vpop.permute.xlu0 %2648 }
 0x45d   : > { %v7723_v58 = vpop.permute.xlu0 %2652 }
 0x466   : > { %v1540_v61 = vpop.xlane.xlu1 %1539 }
 0x467   : > { %6203 = vrcp.f32 %v1540_v61 }
 0x46a   : > { %v2313_v24 = vpop.permute.xlu1 %2312 }
 0x46e   : > { %v2317_v54 = vpop.permute.xlu1 %2316 }
 0x471   : > { %v6204_v39 = vpop.eup %6203 }
 0x472   : > { %v2472_v36 = vpop.permute.xlu1 %2471  ;;  %v1605_v33 = vmul.f32 %v6204_v39, %v7494_v53 }
 0x473   : > { %5249 = vmatprep.mubr.msk.f32.mxu0 %vm635_vm1, %v2472_v36 }
 0x474   : > { %5174 = vmatprep.mubr.msk.f32.mxu1 %vm249_vm0, %v1605_v33  ;;  %5250 = vmatmul.mubr.msk.f32.vlgmr.msra.gmra.mrb[68].mxu0 %vm635_vm1, %v2474_v20 }
 0x475   : > { %5175 = vmatmul.mubr.msk.f32.gmra.mrb[66].mxu1 %vm249_vm0, %v1607_v34 }
 0x476   : > { %5221 = vmatprep.mubr.msk.f32.mxu1 %vm635_vm1, %v8720_v12  ;;  %v2476_v51 = vpop.permute.xlu1 %2475  ;;  %v7705_v48 = vpop.f32.mrb[44].mxu0 }
 0x477   : > { %v7709_v53 = vpop.f32.mrb[45].mxu0  ;;  %5252 = vmatprep.mubr.msk.f32.mxu0 %vm635_vm1, %v2476_v51 }
 0x478   : > { %5253 = vmatmul.mubr.msk.f32.gmra.mrb[70].mxu0 %vm635_vm1, %v2478_v3 }
 0x479   : > { %5222 = vmatmul.mubr.msk.f32.vlgmr.msra.gmra.mrb[68].mxu1 %vm635_vm1, %v8721_v50  ;;  %5255 = vmatprep.mubr.msk.f32.mxu0 %vm635_vm1, %v2480_v40 }
 0x47a   : > { %5718 = vmatpush3.bf16.xpose.msk.msra.mxu1 %vm6857_vm2, %v7652_v35  ;;  %5224 = vmatprep.mubr.msk.f32.mxu1 %vm635_vm1, %v7673_v52  ;;  %v5994_v10 = vpop.permute.xlu1 %5993 }
 0x47b   : > { %5721 = vmatprep.subr.msk.bf16.mxu1 %vm6857_vm2, %v5719_v8  ;;  %v5996_v6 = vunpack.i.h.bf16 %v5994_v10  ;;  %v5995_v52 = vunpack.i.l.bf16 %v5994_v10 }
 0x47d   : > { %5225 = vmatmul.mubr.msk.f32.gmra.mrb[70].mxu1 %vm635_vm1, %v7667_v31  ;;  %v6004_v31 = vpop.permute.xlu0 %6003  ;;  %v5731_v1 = vpack.c.bf16 %v5996_v6, %v5995_v52 }
 0x47e   : > { %5227 = vmatprep.mubr.msk.f32.mxu1 %vm635_vm1, %v2311_v18  ;;  %v2482_v37 = vpop.permute.xlu1 %2481  ;;  %v7728_v38 = vpop.f32.mrb[46].mxu0  ;;  %v6006_v30 = vunpack.i.h.bf16 %v6004_v31  ;;  %v6005_v62 = vunpack.i.l.bf16 %v6004_v31 }
 0x47f   : > { %5256 = vmatmul.mubr.msk.f32.gmra.mrb[72].mxu0 %vm635_vm1, %v2482_v37  ;;  %v7731_v35 = vpop.f32.mrb[47].mxu0 }
 0x480   : > { %5258 = vmatprep.mubr.msk.f32.mxu0 %vm635_vm1, %v2484_v45  ;;  %v5741_v18 = vpack.c.bf16 %v6006_v30, %v6005_v62 }
 0x481   : > { %5228 = vmatmul.mubr.msk.f32.gmra.mrb[72].mxu1 %vm635_vm1, %v2313_v24  ;;  %v6019_v27 = vpop.permute.xlu0 %6018 }
 0x482   : > { %5724 = vmatpush3.bf16.xpose.msk.msra.mxu1 %vm6857_vm2, %v5719_v8  ;;  %5230 = vmatprep.mubr.msk.f32.mxu1 %vm635_vm1, %v2315_v60  ;;  %v2486_v42 = vpop.permute.xlu1 %2485  ;;  %v6021_v2 = vunpack.i.h.bf16 %v6019_v27  ;;  %v6020_v5 = vunpack.i.l.bf16 %v6019_v27  ;;  %v7810_v27 = vld [vmem:[%s8511_s3 + $0x40] sm:$0xff] }
 0x483   : > { %v7738_v59 = vpop.f32.mrb[48].mxu0  ;;  %5727 = vmatprep.subr.msk.bf16.mxu1 %vm6857_vm2, %v5725_v28  ;;  %5259 = vmatmul.mubr.msk.f32.gmra.mrb[74].mxu0 %vm635_vm1, %v2486_v42 }
 0x484   : > { %v7743_v14 = vpop.f32.mrb[49].mxu0  ;;  %v5753_v17 = vpack.c.bf16 %v6021_v2, %v6020_v5 }
 0x485   : > { %5231 = vmatmul.mubr.msk.f32.gmra.mrb[74].mxu1 %vm635_vm1, %v2317_v54  ;;  %v6029_v43 = vpop.permute.xlu0 %6028 }
 0x486   : > { %5277 = vmatprep.mubr.msk.f32.mxu1 %vm635_vm1, %v2641_v63  ;;  %v2643_v15 = vpop.permute.xlu1 %2642  ;;  %v6031_v24 = vunpack.i.h.bf16 %v6029_v43  ;;  %v6030_v63 = vunpack.i.l.bf16 %v6029_v43  ;;  %v7837_v43 = vld [vmem:[%s8511_s3 + $0x50] sm:$0xff] }
 0x488   : > { %v5761_v50 = vpack.c.bf16 %v6031_v24, %v6030_v63 }
 0x489   : > { %v6039_v3 = vpop.permute.xlu0 %6038 }
 0x48a   : > { %5730 = vmatpush3.bf16.xpose.msk.msra.mxu1 %vm6857_vm2, %v5725_v28  ;;  %v2647_v29 = vpop.permute.xlu1 %2646  ;;  %v7749_v0 = vpop.f32.mrb[50].mxu0  ;;  %v6041_v54 = vunpack.i.h.bf16 %v6039_v3 }
 0x48b   : > { %5733 = vmatprep.subr.msk.bf16.mxu1 %vm6857_vm2, %v5731_v1  ;;  %v7753_v44 = vpop.f32.mrb[51].mxu0 }
 0x48e   : > { %v2651_v47 = vpop.permute.xlu1 %2650 }
 0x492   : > { %5736 = vmatpush3.bf16.xpose.msk.msra.mxu1 %vm6857_vm2, %v5731_v1  ;;  %v2655_v26 = vpop.permute.xlu1 %2654 }
 0x493   : > { %5754 = vmatprep.subr.bf16.mxu1 %v5753_v17 }
 0x496   : > { %v5999_v56 = vpop.permute.xlu1 %5998 }
 0x497   : > { %v6001_v49 = vunpack.i.h.bf16 %v5999_v56  ;;  %v6000_v55 = vunpack.i.l.bf16 %v5999_v56 }
 0x499   : > { %5278 = vmatmul.mubr.msk.f32.vlgmr.msra.gmra.mrb[76].mxu1 %vm635_vm1, %v2643_v15  ;;  %v7758_v4 = vpop.f32.mrb[52].mxu1  ;;  %v5737_v16 = vpack.c.bf16 %v6001_v49, %v6000_v55  ;;  %v7805_v15 = vld [vmem:[%s8511_s3 + $0x48] sm:$0xff] }
 0x49a   : > { %5280 = vmatprep.mubr.msk.f32.mxu1 %vm635_vm1, %v7695_v19  ;;  %5756 = vmatpush3.bf16.msra.mxu1 %v5753_v17  ;;  %v7762_v22 = vpop.f32.mrb[53].mxu1  ;;  %v6009_v57 = vpop.permute.xlu1 %6008  ;;  %v6040_v19 = vunpack.i.l.bf16 %v6039_v3 }
 0x49b   : > { %v6011_v9 = vunpack.i.h.bf16 %v6009_v57  ;;  %v6010_v25 = vunpack.i.l.bf16 %v6009_v57  ;;  %5738 = vmatprep.subr.bf16.mxu0 %v5737_v16 }
 0x49c   : > { %5740 = vmatpush3.bf16.msra.mxu0 %v5737_v16  ;;  %v7783_v10 = vpack.c.bf16 %v6041_v54, %v6040_v19  ;;  %v7842_v16 = vld [vmem:[%s8511_s3 + $0x60] sm:$0xff]  ;;  %v7872_v54 = vld [vmem:[%s8511_s3 + $0x78] sm:$0xff] }
 0x49d   : > { %5281 = vmatmul.mubr.msk.f32.gmra.mrb[78].mxu1 %vm635_vm1, %v2647_v29  ;;  %v7765_v60 = vpop.f32.mrb[54].mxu1  ;;  %5742 = vmatprep.subr.bf16.mxu0 %v5741_v18  ;;  %v5745_v45 = vpack.c.bf16 %v6011_v9, %v6010_v25 }
 0x49e   : > { %8722 = vst [vmem:[#allocation48_spill] sm:$0xff] %v7765_v60  ;;  %5283 = vmatprep.mubr.msk.f32.mxu1 %vm635_vm1, %v7707_v13  ;;  %v7769_v41 = vpop.f32.mrb[55].mxu1  ;;  %v6014_v20 = vpop.permute.xlu1 %6013 }
 0x49f   : > { %8723 = vst [vmem:[#allocation56_spill] sm:$0xff] %v7769_v41  ;;  %v6016_v40 = vunpack.i.h.bf16 %v6014_v20  ;;  %v6015_v32 = vunpack.i.l.bf16 %v6014_v20 }
 0x4a0   : > { %5744 = vmatpush3.bf16.msra.mxu0 %v5741_v18  ;;  %v7852_v18 = vld [vmem:[%s8511_s3 + $0x68] sm:$0xff] }
 0x4a1   : > { %5284 = vmatmul.mubr.msk.f32.gmra.mrb[80].mxu1 %vm635_vm1, %v2651_v47  ;;  %v7772_v61 = vpop.f32.mrb[56].mxu1  ;;  %5746 = vmatprep.subr.bf16.mxu0 %v5745_v45  ;;  %v5749_v34 = vpack.c.bf16 %v6016_v40, %v6015_v32  ;;  %v7860_v40 = vld [vmem:[%s8511_s3 + $0x70] sm:$0xff] }
 0x4a2   : > { %8724 = vst [vmem:[#allocation33_spill] sm:$0xff] %v7772_v61  ;;  %5286 = vmatprep.mubr.msk.f32.mxu1 %vm635_vm1, %v7723_v58  ;;  %v7776_v23 = vpop.f32.mrb[57].mxu1  ;;  %v6024_v39 = vpop.permute.xlu1 %6023 }
 0x4a3   : > { %8725 = vst [vmem:[#allocation2_spill] sm:$0xff] %v7776_v23  ;;  %v6026_v36 = vunpack.i.h.bf16 %v6024_v39  ;;  %v6025_v33 = vunpack.i.l.bf16 %v6024_v39 }
 0x4a4   : > { %5748 = vmatpush3.bf16.msra.mxu0 %v5745_v45 }
 0x4a5   : > { %5287 = vmatmul.mubr.msk.f32.gmra.mrb[82].mxu1 %vm635_vm1, %v2655_v26  ;;  %v7779_v11 = vpop.f32.mrb[58].mxu1  ;;  %5750 = vmatprep.subr.bf16.mxu0 %v5749_v34  ;;  %v5757_v46 = vpack.c.bf16 %v6026_v36, %v6025_v33  ;;  %v7825_v26 = vld [vmem:[%s8511_s3 + $0x58] sm:$0xff] }
 0x4a6   : > { %8726 = vst [vmem:[#allocation8_spill] sm:$0xff] %v7779_v11  ;;  %v7781_v12 = vpop.f32.mrb[59].mxu1  ;;  %v6034_v51 = vpop.permute.xlu1 %6033 }
 0x4a7   : > { %8727 = vst [vmem:[#allocation14_spill] sm:$0xff] %v7781_v12  ;;  %v6036_v13 = vunpack.i.h.bf16 %v6034_v51  ;;  %v6035_v8 = vunpack.i.l.bf16 %v6034_v51  ;;  %5758 = vmatprep.subr.bf16.mxu1 %v5757_v46 }
 0x4a8   : > { %5752 = vmatpush3.bf16.msra.mxu0 %v5749_v34  ;;  %5760 = vmatpush3.bf16.msra.mxu1 %v5757_v46 }
 0x4a9   : > { %5762 = vmatprep.subr.bf16.mxu1 %v5761_v50  ;;  %5770 = vmatprep.subr.bf16.mxu0 %v7783_v10  ;;  %v5765_v7 = vpack.c.bf16 %v6036_v13, %v6035_v8 }
 0x4ac   : > { %5764 = vmatpush3.bf16.msra.mxu1 %v5761_v50 }
 0x4ad   : > { %5766 = vmatprep.subr.bf16.mxu1 %v5765_v7 }
 0x4b0   : > { %5768 = vmatpush3.bf16.msra.mxu1 %v5765_v7 }
 0x4b6   : > { %v7786_v21 = vpop.f32.mrb[52].mxu0 }
 0x4b7   : > { %8728 = vst [vmem:[#allocation20_spill] sm:$0xff] %v7786_v21  ;;  %v7788_v58 = vpop.f32.mrb[53].mxu0  ;;  %v8001_v21 = vpop.permute.xlu1 %6043 }
 0x4b8   : > { %8729 = vst [vmem:[#allocation54_spill] sm:$0xff] %v7788_v58  ;;  %v8747_v58 = vld [vmem:[#allocation19_spill] sm:$0xff] }
 0x4ba   : > { %v7790_v37 = vpop.f32.mrb[54].mxu0 }
 0x4bb   : > { %8730 = vst [vmem:[#allocation26_spill] sm:$0xff] %v7790_v37  ;;  %v7792_v28 = vpop.f32.mrb[55].mxu0 }
 0x4bc   : > { %8731 = vst [vmem:[#allocation12_spill] sm:$0xff] %v7792_v28  ;;  %v8745_v28 = vld [vmem:[#allocation10_spill] sm:$0xff] }
 0x4be   : > { %v7794_v42 = vpop.f32.mrb[56].mxu0 }
 0x4bf   : > { %8732 = vst [vmem:[#allocation9_spill] sm:$0xff] %v7794_v42  ;;  %v7796_v31 = vpop.f32.mrb[57].mxu0 }
 0x4c0   : > { %8733 = vst [vmem:[#allocation52_spill] sm:$0xff] %v7796_v31 }
 0x4c5   : > { %v7798_v6 = vpop.f32.mrb[58].mxu0 }
 0x4c6   : > { %8734 = vst [vmem:[#allocation30_spill] sm:$0xff] %v7798_v6  ;;  %v7800_v52 = vpop.f32.mrb[59].mxu0 }
 0x4c7   : > { %8735 = vst [vmem:[#allocation27_spill] sm:$0xff] %v7800_v52 }
 0x4d6   : > { %v5195_v1 = vpop.f32.mrb[60].mxu0  ;;  %v7812_v29 = vpop.f32.mrb[60].mxu1 }
 0x4d7   : > { %8736 = vst [vmem:[#allocation37_spill] sm:$0xff] %v7812_v29  ;;  %v7815_v2 = vadd.f32 %v5195_v1, %v7805_v15  ;;  %v2263_v5 = vpop.f32.mrb[61].mxu0  ;;  %v7817_v47 = vpop.f32.mrb[61].mxu1 }
 0x4d8   : > { %8737 = vst [vmem:[#allocation38_spill] sm:$0xff] %v7817_v47  ;;  %v7820_v17 = vadd.f32 %v7810_v27, %v2263_v5 }
 0x4d9   : > { %v2812_v56 = vsel %vm249_vm0, %v7815_v2, -inf }
 0x4da   : > { %2813 = vmax.xlane.f32.xlu1 %v2812_v56  ;;  %v5198_v30 = vpop.f32.mrb[62].mxu0  ;;  %v2809_v62 = vsel %vm249_vm0, %v7820_v17, -inf }
 0x4db   : > { %v7832_v49 = vadd.f32 %v5198_v30, %v7825_v26  ;;  %v2273_v55 = vpop.f32.mrb[63].mxu0  ;;  %2810 = vmax.xlane.f32.xlu0 %v2809_v62 }
 0x4dc   : > { %v7847_v9 = vadd.f32 %v7837_v43, %v2273_v55 }
 0x4dd   : > { %v2818_v57 = vsel %vm249_vm0, %v7832_v49, -inf }
 0x4de   : > { %v5201_v25 = vpop.f32.mrb[64].mxu0  ;;  %v2815_v63 = vsel %vm249_vm0, %v7847_v9, -inf }
 0x4df   : > { %v2283_v20 = vpop.f32.mrb[65].mxu0  ;;  %2819 = vmax.xlane.f32.xlu0 %v2818_v57  ;;  %v7863_v32 = vadd.f32 %v5201_v25, %v7852_v18 }
 0x4e0   : > { %v7855_v3 = vadd.f32 %v7842_v16, %v2283_v20 }
 0x4e1   : > { %v2824_v34 = vsel %vm249_vm0, %v7863_v32, -inf }
 0x4e2   : > { %v5204_v45 = vpop.f32.mrb[66].mxu0  ;;  %v2821_v24 = vsel %vm249_vm0, %v7855_v3, -inf }
 0x4e3   : > { %v2293_v39 = vpop.f32.mrb[67].mxu0  ;;  %2822 = vmax.xlane.f32.xlu1 %v2821_v24  ;;  %2816 = vmax.xlane.f32.xlu0 %v2815_v63  ;;  %v7878_v36 = vadd.f32 %v5204_v45, %v7872_v54 }
 0x4e4   : > { %v7875_v19 = vadd.f32 %v7860_v40, %v2293_v39 }
 0x4e5   : > { %v2830_v46 = vsel %vm249_vm0, %v7878_v36, -inf }
 0x4e6   : > { %v2827_v33 = vsel %vm249_vm0, %v7875_v19, -inf }
 0x4e7   : > { %2828 = vmax.xlane.f32.xlu1 %v2827_v33  ;;  %2825 = vmax.xlane.f32.xlu0 %v2824_v34 }
 0x4eb   : > { %2831 = vmax.xlane.f32.xlu0 %v2830_v46 }
 0x50b   : > { %v7886_v51 = vpop.f32.mrb[62].mxu1 }
 0x50c   : > { %8738 = vst [vmem:[#allocation36_spill] sm:$0xff] %v7886_v51  ;;  %v7888_v13 = vpop.f32.mrb[63].mxu1 }
 0x50d   : > { %8739 = vst [vmem:[#allocation40_spill] sm:$0xff] %v7888_v13 }
 0x513   : > { %v7890_v8 = vpop.f32.mrb[64].mxu1 }
 0x514   : > { %8740 = vst [vmem:[#allocation53_spill] sm:$0xff] %v7890_v8  ;;  %v7892_v50 = vpop.f32.mrb[65].mxu1 }
 0x515   : > { %8741 = vst [vmem:[#allocation44_spill] sm:$0xff] %v7892_v50 }
 0x547   : > { %v5251_v7 = vpop.f32.mrb[68].mxu0 }
 0x548   : > { %v7894_v1 = vpop.f32.mrb[66].mxu1  ;;  %v2601_v5 = vpop.f32.mrb[69].mxu0  ;;  %v7905_v45 = vadd.f32 %v5251_v7, %v7805_v15 }
 0x549   : > { %8742 = vst [vmem:[#allocation43_spill] sm:$0xff] %v7894_v1  ;;  %v7896_v56 = vpop.f32.mrb[67].mxu1  ;;  %v7910_v63 = vadd.f32 %v7810_v27, %v2601_v5 }
 0x54a   : > { %8743 = vst [vmem:[#allocation42_spill] sm:$0xff] %v7896_v56  ;;  %v2860_v7 = vsel %vm249_vm0, %v7905_v45, -inf }
 0x54b   : > { %v5254_v30 = vpop.f32.mrb[70].mxu0 }
 0x54c   : > { %v5223_v62 = vpop.f32.mrb[68].mxu1  ;;  %v2611_v55 = vpop.f32.mrb[71].mxu0 }
 0x54d   : > { %v7899_v57 = vadd.f32 %v5223_v62, %v7805_v15  ;;  %v2432_v25 = vpop.f32.mrb[69].mxu1  ;;  %v7932_v51 = vadd.f32 %v7837_v43, %v2611_v55 }
 0x54e   : > { %v7902_v20 = vadd.f32 %v7810_v27, %v2432_v25 }
 0x54f   : > { %v2836_v24 = vsel %vm249_vm0, %v7899_v57, -inf  ;;  %v2863_v55 = vsel %vm249_vm0, %v7932_v51, -inf }
 0x550   : > { %v5226_v39 = vpop.f32.mrb[70].mxu1  ;;  %2837 = vmax.xlane.f32.xlu0 %v2836_v24  ;;  %v2833_v33 = vsel %vm249_vm0, %v7902_v20, -inf  ;;  %v2857_v24 = vsel %vm249_vm0, %v7910_v63, -inf }
 0x551   : > { %v2442_v34 = vpop.f32.mrb[71].mxu1  ;;  %2834 = vmax.xlane.f32.xlu1 %v2833_v33  ;;  %v7915_v62 = vadd.f32 %v5226_v39, %v7825_v26  ;;  %v7927_v33 = vadd.f32 %v5254_v30, %v7825_v26 }
 0x552   : > { %v5257_v46 = vpop.f32.mrb[72].mxu0  ;;  %v7920_v1 = vadd.f32 %v7837_v43, %v2442_v34 }
 0x553   : > { %v2621_v25 = vpop.f32.mrb[73].mxu0  ;;  %v2842_v50 = vsel %vm249_vm0, %v7915_v62, -inf  ;;  %v2866_v30 = vsel %vm249_vm0, %v7927_v33, -inf }
 0x554   : > { %v5229_v5 = vpop.f32.mrb[72].mxu1  ;;  %2861 = vmax.xlane.f32.xlu0 %v2860_v7  ;;  %v2839_v7 = vsel %vm249_vm0, %v7920_v1, -inf }
 0x555   : > { %v2452_v56 = vpop.f32.mrb[73].mxu1  ;;  %2858 = vmax.xlane.f32.xlu1 %v2857_v24  ;;  %v7937_v24 = vadd.f32 %v5229_v5, %v7852_v18  ;;  %v7952_v5 = vadd.f32 %v7842_v16, %v2621_v25 }
 0x556   : > { %v7924_v8 = vpop.f32.mrb[74].mxu0  ;;  %v7942_v29 = vadd.f32 %v7842_v16, %v2452_v56 }
 0x557   : > { %v2631_v39 = vpop.f32.mrb[75].mxu0 }
 0x558   : > { %v5232_v34 = vpop.f32.mrb[74].mxu1  ;;  %2843 = vmax.xlane.f32.xlu0 %v2842_v50  ;;  %v7947_v50 = vadd.f32 %v5257_v46, %v7852_v18  ;;  %v2845_v47 = vsel %vm249_vm0, %v7942_v29, -inf }
 0x559   : > { %v2462_v13 = vpop.f32.mrb[75].mxu1  ;;  %2840 = vmax.xlane.f32.xlu1 %v2839_v7  ;;  %v2848_v7 = vsel %vm249_vm0, %v7937_v24, -inf  ;;  %v7957_v56 = vadd.f32 %v5232_v34, %v7872_v54 }
 0x55a   : > { %v7962_v46 = vadd.f32 %v7860_v40, %v2462_v13 }
 0x55b   : > { %v2854_v25 = vsel %vm249_vm0, %v7957_v56, -inf }
 0x55c   : > { %2867 = vmax.xlane.f32.xlu0 %v2866_v30  ;;  %v2872_v30 = vsel %vm249_vm0, %v7947_v50, -inf }
 0x55d   : > { %2864 = vmax.xlane.f32.xlu1 %v2863_v55  ;;  %v2869_v55 = vsel %vm249_vm0, %v7952_v5, -inf }
 0x560   : > { %2849 = vmax.xlane.f32.xlu0 %v2848_v7  ;;  %v7969_v7 = vadd.f32 %v7860_v40, %v2631_v39 }
 0x561   : > { %2846 = vmax.xlane.f32.xlu1 %v2845_v47  ;;  %v2851_v47 = vsel %vm249_vm0, %v7962_v46, -inf }
 0x562   : > { %v2875_v13 = vsel %vm249_vm0, %v7969_v7, -inf }
 0x564   : > { %2873 = vmax.xlane.f32.xlu0 %v2872_v30 }
 0x565   : > { %2870 = vmax.xlane.f32.xlu1 %v2869_v55 }
 0x568   : > { %2855 = vmax.xlane.f32.xlu0 %v2854_v25 }
 0x569   : > { %2852 = vmax.xlane.f32.xlu1 %v2851_v47 }
 0x56c   : > { %v5279_v34 = vpop.f32.mrb[76].mxu1 }
 0x56d   : > { %v2770_v30 = vpop.f32.mrb[77].mxu1  ;;  %2876 = vmax.xlane.f32.xlu1 %v2875_v13  ;;  %v8016_v61 = vadd.f32 %v5279_v34, %v7805_v15 }
 0x56e   : > { %v7976_v6 = vadd.f32 %v7810_v27, %v2770_v30 }
 0x570   : > { %v5282_v55 = vpop.f32.mrb[78].mxu1  ;;  %v2881_v52 = vsel %vm249_vm0, %v7976_v6, -inf }
 0x571   : > { %v2780_v39 = vpop.f32.mrb[79].mxu1  ;;  %2882 = vmax.xlane.f32.xlu1 %v2881_v52 }
 0x572   : > { %v7981_v25 = vadd.f32 %v7837_v43, %v2780_v39  ;;  %v8744_v39 = vld [vmem:[#allocation13_spill] sm:$0xff] }
 0x574   : > { %v5285_v42 = vpop.f32.mrb[80].mxu1  ;;  %v2887_v47 = vsel %vm249_vm0, %v7981_v25, -inf }
 0x575   : > { %v2790_v31 = vpop.f32.mrb[81].mxu1  ;;  %2888 = vmax.xlane.f32.xlu1 %v2887_v47  ;;  %v8746_v47 = vpack.i.bf16 %v8744_v39, %v8745_v28 }
 0x576   : > { %v7986_v13 = vadd.f32 %v7842_v16, %v2790_v31  ;;  %v7999_v31 = vpop.permute.xlu0 %6048 }
 0x578   : > { %v5288_v27 = vpop.f32.mrb[82].mxu1  ;;  %v2893_v30 = vsel %vm249_vm0, %v7986_v13, -inf }
 0x579   : > { %v2800_v37 = vpop.f32.mrb[83].mxu1  ;;  %2894 = vmax.xlane.f32.xlu1 %v2893_v30  ;;  %v8748_v30 = vld [vmem:[#allocation16_spill] sm:$0xff] }
 0x57a   : > { %v7991_v52 = vadd.f32 %v7860_v40, %v2800_v37  ;;  %v2811_v16 = vpop.xlane.xlu0 %2810  ;;  %v8749_v11 = vpack.i.bf16 %v8747_v58, %v8748_v30  ;;  %v8007_v40 = vpop.permute.xlu1 %6053 }
 0x57c   : > { %v2899_v43 = vsel %vm249_vm0, %v7991_v52, -inf }
 0x57d   : > { %2900 = vmax.xlane.f32.xlu1 %v2899_v43  ;;  %v8011_v43 = vadd.f32 %v7924_v8, %v7872_v54  ;;  %v8022_v8 = vadd.f32 %v5282_v55, %v7825_v26 }
 0x57e   : > { %6058 = vrot.lane.b32.xlu0 %v8746_v47, %s6344_s6  ;;  %v2820_v37 = vpop.xlane.xlu0 %2819  ;;  %v2814_v12 = vpop.xlane.xlu1 %2813  ;;  %v2905_v47 = vsub.f32 %v7820_v17, %v2811_v16 }
 0x57f   : > { %v2906_v39 = vsub.f32 %v7815_v2, %v2814_v12  ;;  %v2878_v58 = vsel %vm249_vm0, %v8011_v43, -inf  ;;  %v2908_v60 = vsub.f32 %v7832_v49, %v2820_v37  ;;  %v2884_v12 = vsel %vm249_vm0, %v8016_v61, -inf }
 0x580   : > { %v2937_v23 = vmul.f32 1.442695, %v2905_v47  ;;  %v8030_v49 = vadd.f32 %v5285_v42, %v7852_v18 }
 0x581   : > { %v2943_v15 = vmul.f32 1.442695, %v2908_v60 }
 0x582   : > { %v2817_v28 = vpop.xlane.xlu0 %2816  ;;  %v2823_v2 = vpop.xlane.xlu1 %2822 }
 0x583   : > { %v2907_v41 = vsub.f32 %v7847_v9, %v2817_v28  ;;  %v2909_v34 = vsub.f32 %v7855_v3, %v2823_v2  ;;  %v2890_v9 = vsel %vm249_vm0, %v8022_v8, -inf }
 0x585   : > { %v2941_v16 = vmul.f32 1.442695, %v2907_v41  ;;  %v2945_v28 = vmul.f32 1.442695, %v2909_v34  ;;  %v2896_v41 = vsel %vm249_vm0, %v8030_v49, -inf }
 0x586   : > { %v2826_v30 = vpop.xlane.xlu0 %2825  ;;  %v2829_v60 = vpop.xlane.xlu1 %2828 }
 0x587   : > { %v2910_v17 = vsub.f32 %v7863_v32, %v2826_v30  ;;  %v2911_v42 = vsub.f32 %v7875_v19, %v2829_v60 }
 0x589   : > { %v2947_v55 = vmul.f32 1.442695, %v2910_v17 }
 0x58a   : > { %v2832_v26 = vpop.xlane.xlu0 %2831 }
 0x58b   : > { %v2912_v37 = vsub.f32 %v7878_v36, %v2832_v26 }
 0x58d   : > { %v2951_v18 = vmul.f32 1.442695, %v2912_v37 }
 0x58e   : > { %6063 = vrot.lane.b32.xlu1 %v8749_v11, %s6344_s6  ;;  %v2939_v11 = vmul.f32 1.442695, %v2906_v39  ;;  %v2949_v39 = vmul.f32 1.442695, %v2911_v42 }
 0x590   : > { %6205 = vpow2.f32 %v2939_v11 }
 0x591   : > { %6207 = vpow2.f32 %v2937_v23  ;;  %v8036_v23 = vadd.f32 %v5288_v27, %v7872_v54 }
 0x592   : > { %6209 = vpow2.f32 %v2943_v15 }
 0x593   : > { %6211 = vpow2.f32 %v2941_v16  ;;  %v2902_v32 = vsel %vm249_vm0, %v8036_v23, -inf }
 0x594   : > { %6213 = vpow2.f32 %v2947_v55 }
 0x595   : > { %6215 = vpow2.f32 %v2945_v28 }
 0x596   : > { %6217 = vpow2.f32 %v2951_v18 }
 0x597   : > { %6219 = vpow2.f32 %v2949_v39 }
 0x59a   : > { %v8041_v3 = vpop.eup %6205 }
 0x59b   : > { %v8045_v36 = vpop.eup %6207  ;;  %v3004_v54 = vsel %vm249_vm0, %v8041_v3, 0.0 }
 0x59c   : > { %v8049_v27 = vpop.eup %6209  ;;  %v3001_v19 = vsel %vm249_vm0, %v8045_v36, 0.0 }
 0x59d   : > { %2879 = vmax.xlane.f32.xlu0 %v2878_v58  ;;  %v8053_v47 = vpop.eup %6211  ;;  %v3010_v58 = vsel %vm249_vm0, %v8049_v27, 0.0 }
 0x59e   : > { %v8057_v11 = vpop.eup %6213  ;;  %v3007_v30 = vsel %vm249_vm0, %v8053_v47, 0.0 }
 0x59f   : > { %v3016_v2 = vsel %vm249_vm0, %v8057_v11, 0.0 }
 0x5a1   : > { %2885 = vmax.xlane.f32.xlu0 %v2884_v12  ;;  %v8061_v12 = vpop.eup %6215 }
 0x5a2   : > { %v8065_v15 = vpop.eup %6217  ;;  %v3013_v17 = vsel %vm249_vm0, %v8061_v12, 0.0 }
 0x5a3   : > { %v3022_v34 = vsel %vm249_vm0, %v8065_v15, 0.0  ;;  %v8071_v16 = vpop.eup %6219 }
 0x5a4   : > { %v3019_v26 = vsel %vm249_vm0, %v8071_v16, 0.0 }
 0x5a5   : > { %2891 = vmax.xlane.f32.xlu0 %v2890_v9 }
 0x5a9   : > { %2897 = vmax.xlane.f32.xlu0 %v2896_v41 }
 0x5ad   : > { %2903 = vmax.xlane.f32.xlu0 %v2902_v32 }
 0x5b1   : > { %3005 = vadd.xlane.f32.xlu0 %v3004_v54 }
 0x5b2   : > { %3002 = vadd.xlane.f32.xlu1 %v3001_v19 }
 0x5b5   : > { %3011 = vadd.xlane.f32.xlu0 %v3010_v58 }
 0x5b6   : > { %3008 = vadd.xlane.f32.xlu1 %v3007_v30 }
 0x5b9   : > { %3017 = vadd.xlane.f32.xlu0 %v3016_v2 }
 0x5ba   : > { %3014 = vadd.xlane.f32.xlu1 %v3013_v17 }
 0x5bd   : > { %3023 = vadd.xlane.f32.xlu0 %v3022_v34 }
 0x5c1   : > { %3020 = vadd.xlane.f32.xlu0 %v3019_v26 }
 0x5dd   : > { %v2838_v9 = vpop.xlane.xlu0 %2837 }
 0x5de   : > { %v2914_v55 = vsub.f32 %v7899_v57, %v2838_v9  ;;  %v2835_v37 = vpop.xlane.xlu1 %2834 }
 0x5df   : > { %v2913_v60 = vsub.f32 %v7902_v20, %v2835_v37 }
 0x5e0   : > { %v2955_v28 = vmul.f32 1.442695, %v2914_v55 }
 0x5e1   : > { %v2862_v41 = vpop.xlane.xlu0 %2861  ;;  %v2953_v39 = vmul.f32 1.442695, %v2913_v60 }
 0x5e2   : > { %6221 = vpow2.f32 %v2955_v28  ;;  %v2922_v42 = vsub.f32 %v7905_v45, %v2862_v41  ;;  %v2859_v18 = vpop.xlane.xlu1 %2858 }
 0x5e3   : > { %v2921_v32 = vsub.f32 %v7910_v63, %v2859_v18 }
 0x5e4   : > { %v2971_v54 = vmul.f32 1.442695, %v2922_v42 }
 0x5e5   : > { %v2969_v19 = vmul.f32 1.442695, %v2921_v32  ;;  %v2844_v58 = vpop.xlane.xlu0 %2843 }
 0x5e6   : > { %6223 = vpow2.f32 %v2971_v54  ;;  %v2916_v30 = vsub.f32 %v7915_v62, %v2844_v58  ;;  %v2841_v2 = vpop.xlane.xlu1 %2840 }
 0x5e7   : > { %6225 = vpow2.f32 %v2969_v19  ;;  %v2915_v57 = vsub.f32 %v7920_v1, %v2841_v2 }
 0x5e8   : > { %6227 = vpow2.f32 %v2953_v39  ;;  %v2959_v20 = vmul.f32 1.442695, %v2916_v30 }
 0x5e9   : > { %v2957_v17 = vmul.f32 1.442695, %v2915_v57  ;;  %v2868_v34 = vpop.xlane.xlu0 %2867 }
 0x5ea   : > { %6229 = vpow2.f32 %v2959_v20  ;;  %v2924_v45 = vsub.f32 %v7927_v33, %v2868_v34  ;;  %v2865_v26 = vpop.xlane.xlu1 %2864 }
 0x5eb   : > { %v2923_v63 = vsub.f32 %v7932_v51, %v2865_v26  ;;  %6231 = vpow2.f32 %v2957_v17 }
 0x5ec   : > { %v8083_v9 = vpop.eup %6221  ;;  %v2975_v55 = vmul.f32 1.442695, %v2924_v45 }
 0x5ed   : > { %v2973_v37 = vmul.f32 1.442695, %v2923_v63  ;;  %v2850_v62 = vpop.xlane.xlu0 %2849  ;;  %v3028_v28 = vsel %vm249_vm0, %v8083_v9, 0.0 }
 0x5ee   : > { %6233 = vpow2.f32 %v2975_v55  ;;  %v2918_v1 = vsub.f32 %v7937_v24, %v2850_v62  ;;  %v2847_v60 = vpop.xlane.xlu1 %2846  ;;  %3029 = vadd.xlane.f32.xlu0 %v3028_v28 }
 0x5ef   : > { %v2917_v41 = vsub.f32 %v7942_v29, %v2847_v60  ;;  %6235 = vpow2.f32 %v2973_v37 }
 0x5f0   : > { %v8089_v33 = vpop.eup %6223  ;;  %v2963_v42 = vmul.f32 1.442695, %v2918_v1 }
 0x5f1   : > { %v8091_v51 = vpop.eup %6225  ;;  %v2961_v18 = vmul.f32 1.442695, %v2917_v41  ;;  %v2874_v32 = vpop.xlane.xlu0 %2873  ;;  %v3052_v39 = vsel %vm249_vm0, %v8089_v33, 0.0 }
 0x5f2   : > { %v8095_v54 = vpop.eup %6227  ;;  %6237 = vpow2.f32 %v2963_v42  ;;  %v2926_v24 = vsub.f32 %v7947_v50, %v2874_v32  ;;  %v2871_v19 = vpop.xlane.xlu1 %2870  ;;  %3053 = vadd.xlane.f32.xlu1 %v3052_v39  ;;  %v3049_v29 = vsel %vm249_vm0, %v8091_v51, 0.0 }
 0x5f3   : > { %v2925_v58 = vsub.f32 %v7952_v5, %v2871_v19  ;;  %3050 = vadd.xlane.f32.xlu0 %v3049_v29  ;;  %6239 = vpow2.f32 %v2961_v18  ;;  %v3025_v17 = vsel %vm249_vm0, %v8095_v54, 0.0 }
 0x5f4   : > { %v8101_v30 = vpop.eup %6229  ;;  %v2979_v2 = vmul.f32 1.442695, %v2926_v24 }
 0x5f5   : > { %v2977_v57 = vmul.f32 1.442695, %v2925_v58  ;;  %v2856_v20 = vpop.xlane.xlu0 %2855  ;;  %v3034_v50 = vsel %vm249_vm0, %v8101_v30, 0.0  ;;  %v8108_v26 = vpop.eup %6231 }
 0x5f6   : > { %6241 = vpow2.f32 %v2979_v2  ;;  %v2920_v34 = vsub.f32 %v7957_v56, %v2856_v20  ;;  %v2853_v45 = vpop.xlane.xlu1 %2852  ;;  %3026 = vadd.xlane.f32.xlu1 %v3025_v17  ;;  %v3031_v41 = vsel %vm249_vm0, %v8108_v26, 0.0 }
 0x5f7   : > { %v2919_v5 = vsub.f32 %v7962_v46, %v2853_v45  ;;  %3035 = vadd.xlane.f32.xlu0 %v3034_v50  ;;  %6243 = vpow2.f32 %v2977_v57 }
 0x5f8   : > { %v8111_v63 = vpop.eup %6233  ;;  %v2967_v55 = vmul.f32 1.442695, %v2920_v34 }
 0x5f9   : > { %v2965_v37 = vmul.f32 1.442695, %v2919_v5  ;;  %v6059_v62 = vpop.permute.xlu0 %6058  ;;  %v3058_v28 = vsel %vm249_vm0, %v8111_v63, 0.0  ;;  %v8117_v42 = vpop.eup %6235 }
 0x5fa   : > { %6245 = vpow2.f32 %v2967_v55  ;;  %v6061_v1 = vunpack.i.h.bf16 %v6059_v62  ;;  %v6060_v60 = vunpack.i.l.bf16 %v6059_v62  ;;  %v2877_v56 = vpop.xlane.xlu1 %2876  ;;  %3059 = vadd.xlane.f32.xlu1 %v3058_v28  ;;  %v3055_v29 = vsel %vm249_vm0, %v8117_v42, 0.0 }
 0x5fb   : > { %v2927_v46 = vsub.f32 %v7969_v7, %v2877_v56  ;;  %3032 = vadd.xlane.f32.xlu0 %v3031_v41  ;;  %6247 = vpow2.f32 %v2965_v37 }
 0x5fc   : > { %v8120_v18 = vpop.eup %6237  ;;  %v8122_v32 = vpack.c.bf16 %v6061_v1, %v6060_v60 }
 0x5fd   : > { %v2981_v39 = vmul.f32 1.442695, %v2927_v46  ;;  %v3040_v24 = vsel %vm249_vm0, %v8120_v18, 0.0  ;;  %v8129_v58 = vpop.eup %6239 }
 0x5fe   : > { %v2883_v19 = vpop.xlane.xlu1 %2882  ;;  %3041 = vadd.xlane.f32.xlu1 %v3040_v24  ;;  %5786 = vmatprep.subr.bf16.mxu1 %v8122_v32  ;;  %v3037_v50 = vsel %vm249_vm0, %v8129_v58, 0.0 }
 0x5ff   : > { %v2929_v7 = vsub.f32 %v7976_v6, %v2883_v19  ;;  %3056 = vadd.xlane.f32.xlu0 %v3055_v29  ;;  %6249 = vpow2.f32 %v2981_v39 }
 0x600   : > { %v8132_v2 = vpop.eup %6241 }
 0x601   : > { %v2985_v57 = vmul.f32 1.442695, %v2929_v7  ;;  %v3064_v20 = vsel %vm249_vm0, %v8132_v2, 0.0  ;;  %v8138_v34 = vpop.eup %6243 }
 0x602   : > { %v2889_v17 = vpop.xlane.xlu1 %2888  ;;  %3065 = vadd.xlane.f32.xlu1 %v3064_v20  ;;  %v3061_v62 = vsel %vm249_vm0, %v8138_v34, 0.0 }
 0x603   : > { %v2931_v45 = vsub.f32 %v7981_v25, %v2889_v17  ;;  %3038 = vadd.xlane.f32.xlu0 %v3037_v50  ;;  %6251 = vpow2.f32 %v2985_v57 }
 0x604   : > { %v8141_v5 = vpop.eup %6245 }
 0x605   : > { %v2989_v6 = vmul.f32 1.442695, %v2931_v45  ;;  %v3046_v55 = vsel %vm249_vm0, %v8141_v5, 0.0  ;;  %v8147_v28 = vpop.eup %6247 }
 0x606   : > { %v2895_v37 = vpop.xlane.xlu1 %2894  ;;  %3047 = vadd.xlane.f32.xlu1 %v3046_v55  ;;  %v3043_v56 = vsel %vm249_vm0, %v8147_v28, 0.0 }
 0x607   : > { %v2933_v1 = vsub.f32 %v7986_v13, %v2895_v37  ;;  %3062 = vadd.xlane.f32.xlu0 %v3061_v62  ;;  %6253 = vpow2.f32 %v2989_v6 }
 0x609   : > { %v2993_v25 = vmul.f32 1.442695, %v2933_v1  ;;  %v8152_v41 = vpop.eup %6249 }
 0x60a   : > { %v2901_v60 = vpop.xlane.xlu1 %2900  ;;  %v3067_v24 = vsel %vm249_vm0, %v8152_v41, 0.0 }
 0x60b   : > { %v2935_v46 = vsub.f32 %v7991_v52, %v2901_v60  ;;  %3044 = vadd.xlane.f32.xlu0 %v3043_v56  ;;  %6255 = vpow2.f32 %v2993_v25  ;;  %v8750_v56 = vld [vmem:[#allocation25_spill] sm:$0xff] }
 0x60d   : > { %v2997_v39 = vmul.f32 1.442695, %v2935_v46  ;;  %v8157_v19 = vpop.eup %6251  ;;  %v8751_v46 = vld [vmem:[#allocation22_spill] sm:$0xff] }
 0x60e   : > { %v3073_v13 = vsel %vm249_vm0, %v8157_v19, 0.0 }
 0x60f   : > { %3068 = vadd.xlane.f32.xlu0 %v3067_v24  ;;  %6257 = vpow2.f32 %v2997_v39  ;;  %v8752_v39 = vpack.i.bf16 %v8750_v56, %v8751_v46 }
 0x611   : > { %v8161_v29 = vpop.eup %6253 }
 0x612   : > { %v3079_v7 = vsel %vm249_vm0, %v8161_v29, 0.0 }
 0x613   : > { %3074 = vadd.xlane.f32.xlu0 %v3073_v13 }
 0x615   : > { %v8165_v52 = vpop.eup %6255 }
 0x616   : > { %v3085_v57 = vsel %vm249_vm0, %v8165_v52, 0.0 }
 0x617   : > { %3080 = vadd.xlane.f32.xlu0 %v3079_v7 }
 0x619   : > { %v8169_v20 = vpop.eup %6257 }
 0x61a   : > { %v3091_v17 = vsel %vm249_vm0, %v8169_v20, 0.0 }
 0x61b   : > { %3086 = vadd.xlane.f32.xlu0 %v3085_v57 }
 0x61f   : > { %3092 = vadd.xlane.f32.xlu0 %v3091_v17  ;;  %v8185_v17 = vpop.permute.xlu1 %6063 }
 0x62a   : > { %v2880_v50 = vpop.xlane.xlu0 %2879 }
 0x62b   : > { %v2928_v45 = vsub.f32 %v8011_v43, %v2880_v50 }
 0x62d   : > { %v2983_v6 = vmul.f32 1.442695, %v2928_v45 }
 0x62e   : > { %v2886_v55 = vpop.xlane.xlu0 %2885 }
 0x62f   : > { %6259 = vpow2.f32 %v2983_v6  ;;  %v2930_v37 = vsub.f32 %v8016_v61, %v2886_v55 }
 0x631   : > { %v2987_v62 = vmul.f32 1.442695, %v2930_v37 }
 0x632   : > { %v2892_v1 = vpop.xlane.xlu0 %2891 }
 0x633   : > { %6261 = vpow2.f32 %v2987_v62  ;;  %v2932_v25 = vsub.f32 %v8022_v8, %v2892_v1 }
 0x635   : > { %v2991_v60 = vmul.f32 1.442695, %v2932_v25  ;;  %6068 = vrot.lane.b32.xlu0 %v8752_v39, %s6344_s6 }
 0x636   : > { %v2898_v24 = vpop.xlane.xlu0 %2897 }
 0x637   : > { %6263 = vpow2.f32 %v2991_v60  ;;  %v2934_v43 = vsub.f32 %v8030_v49, %v2898_v24 }
 0x639   : > { %v8181_v13 = vpop.eup %6259  ;;  %v2995_v7 = vmul.f32 1.442695, %v2934_v43 }
 0x63a   : > { %v2904_v57 = vpop.xlane.xlu0 %2903  ;;  %v3070_v61 = vsel %vm249_vm0, %v8181_v13, 0.0 }
 0x63b   : > { %6265 = vpow2.f32 %v2995_v7  ;;  %v2936_v8 = vsub.f32 %v8036_v23, %v2904_v57  ;;  %3071 = vadd.xlane.f32.xlu1 %v3070_v61  ;;  %v6046_v61 = vunpack.i.h.bf16 %v8001_v21 }
 0x63d   : > { %v8188_v50 = vpop.eup %6261  ;;  %v2999_v45 = vmul.f32 1.442695, %v2936_v8  ;;  %v6045_v8 = vunpack.i.l.bf16 %v8001_v21 }
 0x63e   : > { %v3006_v6 = vpop.xlane.xlu0 %3005  ;;  %v3076_v49 = vsel %vm249_vm0, %v8188_v50, 0.0 }
 0x63f   : > { %6267 = vpow2.f32 %v2999_v45  ;;  %v3003_v55 = vpop.xlane.xlu1 %3002  ;;  %3077 = vadd.xlane.f32.xlu1 %v3076_v49 }
 0x640   : > { %6269 = vrcp.f32 %v3006_v6 }
 0x641   : > { %v8192_v37 = vpop.eup %6263  ;;  %6271 = vrcp.f32 %v3003_v55 }
 0x642   : > { %v3012_v62 = vpop.xlane.xlu0 %3011  ;;  %v3082_v1 = vsel %vm249_vm0, %v8192_v37, 0.0 }
 0x643   : > { %6273 = vrcp.f32 %v3012_v62  ;;  %v3009_v23 = vpop.xlane.xlu1 %3008  ;;  %3083 = vadd.xlane.f32.xlu1 %v3082_v1  ;;  %v6051_v62 = vunpack.i.h.bf16 %v7999_v31 }
 0x644   : > { %6275 = vrcp.f32 %v3009_v23  ;;  %v6050_v23 = vunpack.i.l.bf16 %v7999_v31 }
 0x645   : > { %v8196_v25 = vpop.eup %6265 }
 0x646   : > { %v3018_v60 = vpop.xlane.xlu0 %3017  ;;  %v3088_v56 = vsel %vm249_vm0, %v8196_v25, 0.0  ;;  %v5777_v31 = vpack.c.bf16 %v6051_v62, %v6050_v23 }
 0x647   : > { %6277 = vrcp.f32 %v3018_v60  ;;  %v3015_v46 = vpop.xlane.xlu1 %3014  ;;  %3089 = vadd.xlane.f32.xlu1 %v3088_v56  ;;  %v5773_v60 = vpack.c.bf16 %v6046_v61, %v6045_v8  ;;  %v8754_v61 = vld [vmem:[#allocation28_spill] sm:$0xff] }
 0x648   : > { %6279 = vrcp.f32 %v3015_v46  ;;  %v6056_v46 = vunpack.i.h.bf16 %v8007_v40 }
 0x649   : > { %v8200_v39 = vpop.eup %6267 }
 0x64a   : > { %v6270_v24 = vpop.eup %6269  ;;  %v3024_v43 = vpop.xlane.xlu0 %3023  ;;  %v3094_v7 = vsel %vm249_vm0, %v8200_v39, 0.0 }
 0x64b   : > { %v6272_v57 = vpop.eup %6271  ;;  %3095 = vadd.xlane.f32.xlu1 %v3094_v7  ;;  %v3100_v49 = vmul.f32 %v6270_v24, %v8041_v3  ;;  %6281 = vrcp.f32 %v3024_v43  ;;  %v6055_v24 = vunpack.i.l.bf16 %v8007_v40 }
 0x64c   : > { %v3098_v45 = vmul.f32 %v6272_v57, %v8045_v36  ;;  %v8753_v57 = vld [vmem:[#allocation32_spill] sm:$0xff] }
 0x64d   : > { %v6274_v6 = vpop.eup %6273 }
 0x64e   : > { %v6276_v55 = vpop.eup %6275  ;;  %5305 = vmatprep.mubr.msk.f32.mxu0 %vm249_vm0, %v3098_v45  ;;  %v3021_v1 = vpop.xlane.xlu0 %3020  ;;  %v3104_v3 = vmul.f32 %v6274_v6, %v8049_v27 }
 0x64f   : > { %5306 = vmatmul.mubr.msk.f32.vlgmr.msra.gmra.mrb[76].mxu0 %vm249_vm0, %v3100_v49  ;;  %6283 = vrcp.f32 %v3021_v1  ;;  %v3102_v21 = vmul.f32 %v6276_v55, %v8053_v47  ;;  %v5781_v47 = vpack.c.bf16 %v6056_v46, %v6055_v24  ;;  %v6066_v46 = vunpack.i.h.bf16 %v8185_v17 }
 0x650   : > { %5772 = vmatpush3.bf16.msra.mxu0 %v7783_v10  ;;  %v6065_v24 = vunpack.i.l.bf16 %v8185_v17 }
 0x651   : > { %v6278_v36 = vpop.eup %6277  ;;  %5774 = vmatprep.subr.bf16.mxu0 %v5773_v60  ;;  %5308 = vmatprep.mubr.msk.f32.mxu0 %vm249_vm0, %v3102_v21 }
 0x652   : > { %v6280_v56 = vpop.eup %6279  ;;  %v3108_v10 = vmul.f32 %v6278_v36, %v8057_v11 }
 0x653   : > { %5309 = vmatmul.mubr.msk.f32.gmra.mrb[78].mxu0 %vm249_vm0, %v3104_v3  ;;  %v3106_v43 = vmul.f32 %v6280_v56, %v8061_v12  ;;  %v8755_v12 = vpack.i.bf16 %v8753_v57, %v8754_v61 }
 0x654   : > { %5776 = vmatpush3.bf16.msra.mxu0 %v5773_v60 }
 0x655   : > { %5778 = vmatprep.subr.bf16.mxu0 %v5777_v31  ;;  %5311 = vmatprep.mubr.msk.f32.mxu0 %vm249_vm0, %v3106_v43  ;;  %v6282_v27 = vpop.eup %6281 }
 0x656   : > { %v3112_v8 = vmul.f32 %v6282_v27, %v8065_v15 }
 0x657   : > { %5312 = vmatmul.mubr.msk.f32.gmra.mrb[80].mxu0 %vm249_vm0, %v3108_v10 }
 0x658   : > { %5780 = vmatpush3.bf16.msra.mxu0 %v5777_v31 }
 0x659   : > { %v6284_v7 = vpop.eup %6283  ;;  %5782 = vmatprep.subr.bf16.mxu0 %v5781_v47 }
 0x65a   : > { %v3110_v40 = vmul.f32 %v6284_v7, %v8071_v16 }
 0x65c   : > { %5784 = vmatpush3.bf16.msra.mxu0 %v5781_v47  ;;  %6073 = vrot.lane.b32.xlu1 %v8755_v12, %s6344_s6  ;;  %v5789_v47 = vpack.c.bf16 %v6066_v46, %v6065_v24 }
 0x65d   : > { %5314 = vmatprep.mubr.msk.f32.mxu0 %vm249_vm0, %v3110_v40 }
 0x65e   : > { %5315 = vmatmul.mubr.msk.f32.gmra.mrb[82].mxu0 %vm249_vm0, %v3112_v8 }
 0x67b   : > { %v3030_v11 = vpop.xlane.xlu0 %3029 }
 0x67f   : > { %v3054_v45 = vpop.xlane.xlu1 %3053 }
 0x680   : > { %6285 = vrcp.f32 %v3054_v45  ;;  %v3051_v6 = vpop.xlane.xlu0 %3050 }
 0x681   : > { %6287 = vrcp.f32 %v3051_v6 }
 0x682   : > { %6289 = vrcp.f32 %v3030_v11 }
 0x683   : > { %v3027_v49 = vpop.xlane.xlu1 %3026 }
 0x684   : > { %6291 = vrcp.f32 %v3027_v49  ;;  %v3036_v16 = vpop.xlane.xlu0 %3035 }
 0x685   : > { %6293 = vrcp.f32 %v3036_v16 }
 0x687   : > { %v3060_v55 = vpop.xlane.xlu1 %3059 }
 0x688   : > { %v3033_v62 = vpop.xlane.xlu0 %3032 }
 0x689   : > { %6295 = vrcp.f32 %v3033_v62 }
 0x68a   : > { %v6286_v1 = vpop.eup %6285  ;;  %6297 = vrcp.f32 %v3060_v55 }
 0x68b   : > { %v6288_v23 = vpop.eup %6287  ;;  %v3042_v15 = vpop.xlane.xlu1 %3041  ;;  %v3132_v3 = vmul.f32 %v6286_v1, %v8089_v33 }
 0x68c   : > { %v3057_v60 = vpop.xlane.xlu0 %3056  ;;  %v3130_v21 = vmul.f32 %v6288_v23, %v8091_v51  ;;  %v6290_v36 = vpop.eup %6289 }
 0x68d   : > { %6299 = vrcp.f32 %v3057_v60  ;;  %v3116_v10 = vmul.f32 %v6290_v36, %v8083_v9 }
 0x68e   : > { %v6292_v56 = vpop.eup %6291  ;;  %5361 = vmatprep.mubr.msk.f32.mxu0 %vm249_vm0, %v3130_v21  ;;  %6301 = vrcp.f32 %v3042_v15 }
 0x68f   : > { %v3066_v31 = vpop.xlane.xlu1 %3065  ;;  %5362 = vmatmul.mubr.msk.f32.vlgmr.msra.gmra.mrb[84].mxu0 %vm249_vm0, %v3132_v3  ;;  %v3114_v43 = vmul.f32 %v6292_v56, %v8095_v54  ;;  %v6294_v33 = vpop.eup %6293 }
 0x690   : > { %v3039_v51 = vpop.xlane.xlu0 %3038  ;;  %v3120_v40 = vmul.f32 %v6294_v33, %v8101_v30 }
 0x691   : > { %6303 = vrcp.f32 %v3039_v51  ;;  %5333 = vmatprep.mubr.msk.f32.mxu1 %vm249_vm0, %v3114_v43 }
 0x692   : > { %5334 = vmatmul.mubr.msk.f32.vlgmr.msra.gmra.mrb[84].mxu1 %vm249_vm0, %v3116_v10  ;;  %6305 = vrcp.f32 %v3066_v31 }
 0x693   : > { %v6296_v27 = vpop.eup %6295  ;;  %5788 = vmatpush3.bf16.msra.mxu1 %v8122_v32  ;;  %v3048_v54 = vpop.xlane.xlu1 %3047 }
 0x694   : > { %5790 = vmatprep.subr.bf16.mxu1 %v5789_v47  ;;  %v3063_v17 = vpop.xlane.xlu0 %3062  ;;  %v3118_v7 = vmul.f32 %v6296_v27, %v8108_v26  ;;  %v6298_v9 = vpop.eup %6297 }
 0x695   : > { %6307 = vrcp.f32 %v3063_v17  ;;  %v3136_v12 = vmul.f32 %v6298_v9, %v8111_v63 }
 0x696   : > { %5336 = vmatprep.mubr.msk.f32.mxu1 %vm249_vm0, %v3118_v7  ;;  %6309 = vrcp.f32 %v3048_v54 }
 0x697   : > { %v6300_v57 = vpop.eup %6299  ;;  %5792 = vmatpush3.bf16.msra.mxu1 %v5789_v47 }
 0x698   : > { %5337 = vmatmul.mubr.msk.f32.gmra.mrb[86].mxu1 %vm249_vm0, %v3120_v40  ;;  %v3045_v61 = vpop.xlane.xlu0 %3044  ;;  %v3134_v32 = vmul.f32 %v6300_v57, %v8117_v42  ;;  %v6302_v8 = vpop.eup %6301 }
 0x699   : > { %6311 = vrcp.f32 %v3045_v61  ;;  %v3124_v45 = vmul.f32 %v6302_v8, %v8120_v18 }
 0x69a   : > { %5364 = vmatprep.mubr.msk.f32.mxu0 %vm249_vm0, %v3134_v32 }
 0x69b   : > { %v6304_v26 = vpop.eup %6303  ;;  %5365 = vmatmul.mubr.msk.f32.gmra.mrb[86].mxu0 %vm249_vm0, %v3136_v12 }
 0x69c   : > { %v3069_v11 = vpop.xlane.xlu0 %3068  ;;  %v3122_v30 = vmul.f32 %v6304_v26, %v8129_v58  ;;  %v6306_v6 = vpop.eup %6305  ;;  %v3968_v26 = vld [vmem:[%s8510_s2 + $0x18] sm:$0xff] }
 0x69d   : > { %6313 = vrcp.f32 %v3069_v11  ;;  %v3140_v16 = vmul.f32 %v6306_v6, %v8132_v2  ;;  %v3969_v11 = vld [vmem:[%s8510_s2 + $0x20] sm:$0xff]  ;;  %v3971_v6 = vld [vmem:[%s8510_s2 + $0x30] sm:$0xff] }
 0x69e   : > { %5339 = vmatprep.mubr.msk.f32.mxu1 %vm249_vm0, %v3122_v30  ;;  %v3970_v30 = vld [vmem:[%s8510_s2 + $0x28] sm:$0xff] }
 0x69f   : > { %v6308_v49 = vpop.eup %6307  ;;  %5340 = vmatmul.mubr.msk.f32.gmra.mrb[88].mxu1 %vm249_vm0, %v3124_v45  ;;  %v5809_v45 = vpack.c.bf16 %v3970_v30, %v3969_v11  ;;  %v8757_v11 = vld [vmem:[#allocation48_spill] sm:$0xff] }
 0x6a0   : > { %v3075_v42 = vpop.xlane.xlu0 %3074  ;;  %v3138_v63 = vmul.f32 %v6308_v49, %v8138_v34  ;;  %v6310_v55 = vpop.eup %6309  ;;  %v3972_v49 = vld [vmem:[%s8510_s2 + $0x38] sm:$0xff] }
 0x6a1   : > { %6315 = vrcp.f32 %v3075_v42  ;;  %v3128_v1 = vmul.f32 %v6310_v55, %v8141_v5  ;;  %v5813_v42 = vpack.c.bf16 %v3972_v49, %v3971_v6  ;;  %v8758_v6 = vld [vmem:[#allocation2_spill] sm:$0xff]  ;;  %v8759_v49 = vld [vmem:[#allocation33_spill] sm:$0xff] }
 0x6a2   : > { %5367 = vmatprep.mubr.msk.f32.mxu0 %vm249_vm0, %v3138_v63 }
 0x6a3   : > { %v6312_v62 = vpop.eup %6311  ;;  %5368 = vmatmul.mubr.msk.f32.gmra.mrb[88].mxu0 %vm249_vm0, %v3140_v16 }
 0x6a4   : > { %v3081_v58 = vpop.xlane.xlu0 %3080  ;;  %v3126_v18 = vmul.f32 %v6312_v62, %v8147_v28 }
 0x6a6   : > { %5342 = vmatprep.mubr.msk.f32.mxu1 %vm249_vm0, %v3126_v18 }
 0x6a7   : > { %v6314_v23 = vpop.eup %6313  ;;  %5343 = vmatmul.mubr.msk.f32.gmra.mrb[90].mxu1 %vm249_vm0, %v3128_v1 }
 0x6a8   : > { %v3087_v34 = vpop.xlane.xlu0 %3086  ;;  %v3142_v15 = vmul.f32 %v6314_v23, %v8152_v41 }
 0x6aa   : > { %5370 = vmatprep.mubr.msk.f32.mxu0 %vm249_vm0, %v3142_v15 }
 0x6ab   : > { %v6316_v2 = vpop.eup %6315 }
 0x6ac   : > { %v3093_v60 = vpop.xlane.xlu0 %3092  ;;  %v3146_v21 = vmul.f32 %v6316_v2, %v8157_v19 }
 0x6ae   : > { %5389 = vmatprep.mubr.msk.f32.mxu1 %vm249_vm0, %v3146_v21 }
 0x6b0   : > { %v6069_v36 = vpop.permute.xlu0 %6068 }
 0x6b1   : > { %v6071_v28 = vunpack.i.h.bf16 %v6069_v36  ;;  %v6070_v3 = vunpack.i.l.bf16 %v6069_v36 }
 0x6b3   : > { %v5793_v5 = vpack.c.bf16 %v6071_v28, %v6070_v3 }
 0x6b5   : > { %5794 = vmatprep.subr.bf16.mxu1 %v5793_v5 }
 0x6b6   : > { %5796 = vmatpush3.bf16.msra.mxu1 %v5793_v5 }
 0x6c8   : > { %v3072_v56 = vpop.xlane.xlu1 %3071 }
 0x6c9   : > { %6317 = vrcp.f32 %v3072_v56 }
 0x6cc   : > { %v3078_v46 = vpop.xlane.xlu1 %3077 }
 0x6cd   : > { %6319 = vrcp.f32 %v3078_v46 }
 0x6ce   : > { %6321 = vrcp.f32 %v3081_v58 }
 0x6d0   : > { %v3084_v24 = vpop.xlane.xlu1 %3083 }
 0x6d1   : > { %6323 = vrcp.f32 %v3084_v24 }
 0x6d2   : > { %6325 = vrcp.f32 %v3087_v34 }
 0x6d3   : > { %v6318_v31 = vpop.eup %6317 }
 0x6d4   : > { %v3090_v41 = vpop.xlane.xlu1 %3089  ;;  %v3144_v43 = vmul.f32 %v6318_v31, %v8181_v13 }
 0x6d5   : > { %6327 = vrcp.f32 %v3090_v41 }
 0x6d6   : > { %5371 = vmatmul.mubr.msk.f32.gmra.mrb[90].mxu0 %vm249_vm0, %v3144_v43  ;;  %6329 = vrcp.f32 %v3093_v60 }
 0x6d7   : > { %v6320_v27 = vpop.eup %6319 }
 0x6d8   : > { %v3096_v19 = vpop.xlane.xlu1 %3095  ;;  %v6322_v17 = vpop.eup %6321  ;;  %v3148_v13 = vmul.f32 %v6320_v27, %v8188_v50 }
 0x6d9   : > { %6331 = vrcp.f32 %v3096_v19  ;;  %v3150_v54 = vmul.f32 %v6322_v17, %v8161_v29 }
 0x6db   : > { %v6324_v7 = vpop.eup %6323 }
 0x6dc   : > { %v6074_v10 = vpop.permute.xlu1 %6073  ;;  %v6326_v9 = vpop.eup %6325  ;;  %v3152_v40 = vmul.f32 %v6324_v7, %v8192_v37  ;;  %v3966_v37 = vld [vmem:[%s8510_s2 + $0x8] sm:$0xff] }
 0x6dd   : > { %v6076_v51 = vunpack.i.h.bf16 %v6074_v10  ;;  %v6075_v33 = vunpack.i.l.bf16 %v6074_v10  ;;  %v3154_v61 = vmul.f32 %v6326_v9, %v8165_v52  ;;  %v3965_v52 = vld [vmem:[%s8510_s2] sm:$0xff] }
 0x6df   : > { %v5797_v47 = vpack.c.bf16 %v6076_v51, %v6075_v33  ;;  %v6328_v57 = vpop.eup %6327 }
 0x6e0   : > { %v6330_v32 = vpop.eup %6329  ;;  %v3156_v50 = vmul.f32 %v6328_v57, %v8196_v25  ;;  %v5801_v25 = vpack.c.bf16 %v3966_v37, %v3965_v52 }
 0x6e1   : > { %5798 = vmatprep.subr.bf16.mxu1 %v5797_v47  ;;  %v3158_v29 = vmul.f32 %v6330_v32, %v8169_v20  ;;  %v3967_v20 = vld [vmem:[%s8510_s2 + $0x10] sm:$0xff] }
 0x6e2   : > { %5800 = vmatpush3.bf16.msra.mxu1 %v5797_v47  ;;  %5802 = vmatprep.subr.bf16.mxu0 %v5801_v25 }
 0x6e3   : > { %v6332_v12 = vpop.eup %6331  ;;  %5804 = vmatpush3.bf16.msra.mxu0 %v5801_v25 }
 0x6e4   : > { %v3160_v8 = vmul.f32 %v6332_v12, %v8200_v39  ;;  %v5805_v39 = vpack.c.bf16 %v3968_v26, %v3967_v20  ;;  %v8756_v26 = vld [vmem:[#allocation56_spill] sm:$0xff] }
 0x6e5   : > { %5390 = vmatmul.mubr.msk.f32.vlgmr.msra.gmra.mrb[92].mxu1 %vm249_vm0, %v3148_v13 }
 0x6e6   : > { %5392 = vmatprep.mubr.msk.f32.mxu1 %vm249_vm0, %v3150_v54  ;;  %5806 = vmatprep.subr.bf16.mxu0 %v5805_v39 }
 0x6e7   : > { %5808 = vmatpush3.bf16.msra.mxu0 %v5805_v39 }
 0x6e8   : > { %5810 = vmatprep.subr.bf16.mxu0 %v5809_v45 }
 0x6e9   : > { %5393 = vmatmul.mubr.msk.f32.gmra.mrb[94].mxu1 %vm249_vm0, %v3152_v40 }
 0x6ea   : > { %5395 = vmatprep.mubr.msk.f32.mxu1 %vm249_vm0, %v3154_v61 }
 0x6eb   : > { %5812 = vmatpush3.bf16.msra.mxu0 %v5809_v45 }
 0x6ec   : > { %5814 = vmatprep.subr.bf16.mxu0 %v5813_v42 }
 0x6ed   : > { %5396 = vmatmul.mubr.msk.f32.gmra.mrb[96].mxu1 %vm249_vm0, %v3156_v50 }
 0x6ee   : > { %5398 = vmatprep.mubr.msk.f32.mxu1 %vm249_vm0, %v3158_v29 }
 0x6ef   : > { %5816 = vmatpush3.bf16.msra.mxu0 %v5813_v42 }
 0x6f1   : > { %5399 = vmatmul.mubr.msk.f32.gmra.mrb[98].mxu1 %vm249_vm0, %v3160_v8 }
 0x722   : > { %v5307_v63 = vpop.f32.mrb[76].mxu0 }
 0x723   : > { %3839 = vrot.lane.b32.xlu1 %v5307_v63, %s6343_s5  ;;  %v3283_v16 = vpop.f32.mrb[77].mxu0 }
 0x726   : > { %v5310_v55 = vpop.f32.mrb[78].mxu0 }
 0x727   : > { %3837 = vrot.lane.b32.xlu1 %v3283_v16, %s6343_s5  ;;  %v3293_v62 = vpop.f32.mrb[79].mxu0 }
 0x72a   : > { %v5313_v58 = vpop.f32.mrb[80].mxu0 }
 0x72b   : > { %3841 = vrot.lane.b32.xlu1 %v3293_v62, %s6343_s5  ;;  %v3303_v18 = vpop.f32.mrb[81].mxu0 }
 0x72c   : > { %3845 = vrot.lane.b32.xlu0 %v3303_v18, %s6343_s5 }
 0x72f   : > { %3843 = vrot.lane.b32.xlu1 %v5310_v55, %s6343_s5  ;;  %v8760_v55 = vld [vmem:[#allocation14_spill] sm:$0xff] }
 0x731   : > { %v5316_v1 = vpop.f32.mrb[82].mxu0 }
 0x732   : > { %v3313_v23 = vpop.f32.mrb[83].mxu0 }
 0x733   : > { %3847 = vrot.lane.b32.xlu1 %v5313_v58, %s6343_s5  ;;  %3849 = vrot.lane.b32.xlu0 %v3313_v23, %s6343_s5  ;;  %v8761_v58 = vld [vmem:[#allocation8_spill] sm:$0xff] }
 0x737   : > { %3851 = vrot.lane.b32.xlu1 %v5316_v1, %s6343_s5 }
 0x762   : > { %v5363_v34 = vpop.f32.mrb[84].mxu0 }
 0x763   : > { %v3605_v15 = vpop.f32.mrb[85].mxu0 }
 0x765   : > { %v5335_v2 = vpop.f32.mrb[84].mxu1 }
 0x766   : > { %3855 = vrot.lane.b32.xlu1 %v5335_v2, %s6343_s5  ;;  %v3444_v60 = vpop.f32.mrb[85].mxu1  ;;  %v8763_v2 = vld [vmem:[#allocation20_spill] sm:$0xff] }
 0x767   : > { %3853 = vrot.lane.b32.xlu0 %v3444_v60, %s6343_s5 }
 0x76b   : > { %v5338_v21 = vpop.f32.mrb[86].mxu1 }
 0x76c   : > { %3859 = vrot.lane.b32.xlu1 %v5338_v21, %s6343_s5  ;;  %v3454_v36 = vpop.f32.mrb[87].mxu1 }
 0x76d   : > { %3857 = vrot.lane.b32.xlu0 %v3454_v36, %s6343_s5 }
 0x76e   : > { %v5366_v28 = vpop.f32.mrb[86].mxu0 }
 0x76f   : > { %v3615_v3 = vpop.f32.mrb[87].mxu0 }
 0x772   : > { %v5341_v5 = vpop.f32.mrb[88].mxu1 }
 0x773   : > { %3863 = vrot.lane.b32.xlu1 %v5341_v5, %s6343_s5  ;;  %v3464_v56 = vpop.f32.mrb[89].mxu1  ;;  %v8765_v5 = vld [vmem:[#allocation26_spill] sm:$0xff] }
 0x774   : > { %3861 = vrot.lane.b32.xlu0 %v3464_v56, %s6343_s5 }
 0x776   : > { %v5369_v46 = vpop.f32.mrb[88].mxu0 }
 0x777   : > { %v3625_v24 = vpop.f32.mrb[89].mxu0 }
 0x77a   : > { %v5344_v31 = vpop.f32.mrb[90].mxu1 }
 0x77b   : > { %3867 = vrot.lane.b32.xlu1 %v5344_v31, %s6343_s5  ;;  %v3474_v41 = vpop.f32.mrb[91].mxu1  ;;  %v8766_v31 = vld [vmem:[#allocation52_spill] sm:$0xff] }
 0x77c   : > { %3865 = vrot.lane.b32.xlu0 %v3474_v41, %s6343_s5 }
 0x77f   : > { %3871 = vrot.lane.b32.xlu1 %v5363_v34, %s6343_s5  ;;  %v8762_v34 = vld [vmem:[#allocation54_spill] sm:$0xff] }
 0x780   : > { %3869 = vrot.lane.b32.xlu0 %v3605_v15, %s6343_s5 }
 0x783   : > { %3875 = vrot.lane.b32.xlu1 %v5366_v28, %s6343_s5  ;;  %v8764_v28 = vld [vmem:[#allocation12_spill] sm:$0xff] }
 0x784   : > { %3873 = vrot.lane.b32.xlu0 %v3615_v3, %s6343_s5 }
 0x787   : > { %3879 = vrot.lane.b32.xlu1 %v5369_v46, %s6343_s5 }
 0x788   : > { %3877 = vrot.lane.b32.xlu0 %v3625_v24, %s6343_s5 }
 0x795   : > { %v3840_v43 = vpop.permute.xlu1 %3839 }
 0x796   : > { %v3934_v51 = vsel %vm635_vm1, %v7705_v48, %v3840_v43  ;;  %v8767_v43 = vld [vmem:[#allocation9_spill] sm:$0xff] }
 0x799   : > { %v3838_v19 = vpop.permute.xlu1 %3837 }
 0x79a   : > { %v3933_v10 = vsel %vm635_vm1, %v7709_v53, %v3838_v19 }
 0x79b   : > { %5417 = vmatprep.mubr.msk.f32.mxu0 %vm249_vm0, %v3933_v10 }
 0x79c   : > { %5418 = vmatmul.mubr.msk.f32.vlgmr.msra.gmra.mrb[92].mxu0 %vm249_vm0, %v3934_v51 }
 0x79d   : > { %v3842_v33 = vpop.permute.xlu1 %3841 }
 0x79e   : > { %v3935_v47 = vsel %vm635_vm1, %v7731_v35, %v3842_v33  ;;  %v3846_v27 = vpop.permute.xlu0 %3845  ;;  %v8768_v33 = vld [vmem:[#allocation27_spill] sm:$0xff] }
 0x79f   : > { %5420 = vmatprep.mubr.msk.f32.mxu0 %vm249_vm0, %v3935_v47  ;;  %v3937_v53 = vsel %vm635_vm1, %v7743_v14, %v3846_v27  ;;  %v8769_v27 = vld [vmem:[#allocation30_spill] sm:$0xff] }
 0x7a1   : > { %v3844_v17 = vpop.permute.xlu1 %3843 }
 0x7a2   : > { %v3936_v13 = vsel %vm635_vm1, %v7728_v38, %v3844_v17 }
 0x7a3   : > { %5421 = vmatmul.mubr.msk.f32.gmra.mrb[94].mxu0 %vm249_vm0, %v3936_v13 }
 0x7a4   : > { %5423 = vmatprep.mubr.msk.f32.mxu0 %vm249_vm0, %v3937_v53 }
 0x7a5   : > { %v3848_v48 = vpop.permute.xlu1 %3847  ;;  %v3850_v7 = vpop.permute.xlu0 %3849 }
 0x7a6   : > { %v3938_v54 = vsel %vm635_vm1, %v7738_v59, %v3848_v48  ;;  %v3939_v35 = vsel %vm635_vm1, %v7753_v44, %v3850_v7  ;;  %v8770_v48 = vld [vmem:[#allocation38_spill] sm:$0xff] }
 0x7a7   : > { %5424 = vmatmul.mubr.msk.f32.gmra.mrb[96].mxu0 %vm249_vm0, %v3938_v54  ;;  %v8771_v54 = vld [vmem:[#allocation37_spill] sm:$0xff] }
 0x7a8   : > { %5426 = vmatprep.mubr.msk.f32.mxu0 %vm249_vm0, %v3939_v35 }
 0x7a9   : > { %v3852_v38 = vpop.permute.xlu1 %3851  ;;  %v5372_v9 = vpop.f32.mrb[90].mxu0 }
 0x7aa   : > { %v3940_v14 = vsel %vm635_vm1, %v7749_v0, %v3852_v38  ;;  %3883 = vrot.lane.b32.xlu1 %v5372_v9, %s6343_s5  ;;  %v3635_v40 = vpop.f32.mrb[91].mxu0 }
 0x7ab   : > { %5427 = vmatmul.mubr.msk.f32.gmra.mrb[98].mxu0 %vm249_vm0, %v3940_v14  ;;  %3881 = vrot.lane.b32.xlu0 %v3635_v40, %s6343_s5  ;;  %v8772_v14 = vld [vmem:[#allocation40_spill] sm:$0xff] }
 0x7b8   : > { %v5391_v59 = vpop.f32.mrb[92].mxu1 }
 0x7b9   : > { %3887 = vrot.lane.b32.xlu1 %v5391_v59, %s6343_s5  ;;  %v3766_v44 = vpop.f32.mrb[93].mxu1  ;;  %v8773_v59 = vld [vmem:[#allocation36_spill] sm:$0xff] }
 0x7ba   : > { %3885 = vrot.lane.b32.xlu0 %v3766_v44, %s6343_s5 }
 0x7bc   : > { %v5394_v57 = vpop.f32.mrb[94].mxu1 }
 0x7bd   : > { %3891 = vrot.lane.b32.xlu1 %v5394_v57, %s6343_s5  ;;  %v3776_v61 = vpop.f32.mrb[95].mxu1 }
 0x7be   : > { %3889 = vrot.lane.b32.xlu0 %v3776_v61, %s6343_s5 }
 0x7c0   : > { %v5397_v0 = vpop.f32.mrb[96].mxu1 }
 0x7c1   : > { %3895 = vrot.lane.b32.xlu1 %v5397_v0, %s6343_s5  ;;  %v3786_v32 = vpop.f32.mrb[97].mxu1  ;;  %v8774_v0 = vld [vmem:[#allocation44_spill] sm:$0xff] }
 0x7c2   : > { %3893 = vrot.lane.b32.xlu0 %v3786_v32, %s6343_s5 }
 0x7c4   : > { %v5400_v50 = vpop.f32.mrb[98].mxu1 }
 0x7c5   : > { %3899 = vrot.lane.b32.xlu1 %v5400_v50, %s6343_s5  ;;  %v3796_v12 = vpop.f32.mrb[99].mxu1  ;;  %v8775_v50 = vld [vmem:[#allocation53_spill] sm:$0xff] }
 0x7c6   : > { %3897 = vrot.lane.b32.xlu0 %v3796_v12, %s6343_s5 }
 0x7d8   : > { %v3856_v29 = vpop.permute.xlu1 %3855 }
 0x7d9   : > { %v3854_v8 = vpop.permute.xlu0 %3853  ;;  %v3942_v37 = vsel %vm635_vm1, %v7758_v4, %v3856_v29 }
 0x7da   : > { %v3941_v52 = vsel %vm635_vm1, %v7762_v22, %v3854_v8 }
 0x7db   : > { %5429 = vmatprep.mubr.msk.f32.mxu0 %vm249_vm0, %v3941_v52  ;;  %v8776_v52 = vld [vmem:[#allocation42_spill] sm:$0xff] }
 0x7dc   : > { %5430 = vmatmul.mubr.msk.f32.gmra.mrb[100].mxu0 %vm249_vm0, %v3942_v37 }
 0x7de   : > { %v3860_v20 = vpop.permute.xlu1 %3859 }
 0x7df   : > { %v3858_v25 = vpop.permute.xlu0 %3857  ;;  %v3944_v30 = vsel %vm635_vm1, %v8757_v11, %v3860_v20  ;;  %v8777_v20 = vld [vmem:[#allocation43_spill] sm:$0xff] }
 0x7e0   : > { %v3943_v39 = vsel %vm635_vm1, %v8756_v26, %v3858_v25 }
 0x7e1   : > { %5432 = vmatprep.mubr.msk.f32.mxu0 %vm249_vm0, %v3943_v39 }
 0x7e2   : > { %5433 = vmatmul.mubr.msk.f32.gmra.mrb[102].mxu0 %vm249_vm0, %v3944_v30 }
 0x7e5   : > { %v3864_v22 = vpop.permute.xlu1 %3863 }
 0x7e6   : > { %v3862_v45 = vpop.permute.xlu0 %3861  ;;  %v3946_v42 = vsel %vm635_vm1, %v8759_v49, %v3864_v22 }
 0x7e7   : > { %v3945_v4 = vsel %vm635_vm1, %v8758_v6, %v3862_v45 }
 0x7e8   : > { %5435 = vmatprep.mubr.msk.f32.mxu0 %vm249_vm0, %v3945_v4 }
 0x7e9   : > { %5436 = vmatmul.mubr.msk.f32.gmra.mrb[104].mxu0 %vm249_vm0, %v3946_v42 }
 0x7ed   : > { %v3868_v63 = vpop.permute.xlu1 %3867 }
 0x7ee   : > { %v3866_v16 = vpop.permute.xlu0 %3865  ;;  %v3948_v18 = vsel %vm635_vm1, %v8761_v58, %v3868_v63 }
 0x7ef   : > { %v3947_v62 = vsel %vm635_vm1, %v8760_v55, %v3866_v16 }
 0x7f0   : > { %5438 = vmatprep.mubr.msk.f32.mxu0 %vm249_vm0, %v3947_v62 }
 0x7f1   : > { %v3872_v1 = vpop.permute.xlu1 %3871  ;;  %5439 = vmatmul.mubr.msk.f32.gmra.mrb[106].mxu0 %vm249_vm0, %v3948_v18 }
 0x7f2   : > { %v3870_v23 = vpop.permute.xlu0 %3869  ;;  %v3950_v60 = vsel %vm635_vm1, %v8763_v2, %v3872_v1 }
 0x7f3   : > { %v3949_v15 = vsel %vm635_vm1, %v8762_v34, %v3870_v23 }
 0x7f4   : > { %5441 = vmatprep.mubr.msk.f32.mxu0 %vm249_vm0, %v3949_v15 }
 0x7f5   : > { %v3876_v21 = vpop.permute.xlu1 %3875  ;;  %5442 = vmatmul.mubr.msk.f32.gmra.mrb[108].mxu0 %vm249_vm0, %v3950_v60 }
 0x7f6   : > { %v3874_v36 = vpop.permute.xlu0 %3873  ;;  %v3952_v56 = vsel %vm635_vm1, %v8765_v5, %v3876_v21 }
 0x7f7   : > { %v3951_v3 = vsel %vm635_vm1, %v8764_v28, %v3874_v36 }
 0x7f8   : > { %5444 = vmatprep.mubr.msk.f32.mxu0 %vm249_vm0, %v3951_v3 }
 0x7f9   : > { %v3880_v46 = vpop.permute.xlu1 %3879  ;;  %5445 = vmatmul.mubr.msk.f32.gmra.mrb[110].mxu0 %vm249_vm0, %v3952_v56 }
 0x7fa   : > { %v3878_v24 = vpop.permute.xlu0 %3877  ;;  %v3954_v19 = vsel %vm635_vm1, %v8767_v43, %v3880_v46 }
 0x7fb   : > { %v3953_v41 = vsel %vm635_vm1, %v8766_v31, %v3878_v24 }
 0x7fc   : > { %5447 = vmatprep.mubr.msk.f32.mxu0 %vm249_vm0, %v3953_v41 }
 0x7fd   : > { %5448 = vmatmul.mubr.msk.f32.gmra.mrb[112].mxu0 %vm249_vm0, %v3954_v19 }
 0x81c   : > { %v3884_v10 = vpop.permute.xlu1 %3883 }
 0x81d   : > { %v3882_v51 = vpop.permute.xlu0 %3881  ;;  %v3956_v17 = vsel %vm635_vm1, %v8769_v27, %v3884_v10 }
 0x81e   : > { %v3955_v47 = vsel %vm635_vm1, %v8768_v33, %v3882_v51 }
 0x81f   : > { %5450 = vmatprep.mubr.msk.f32.mxu0 %vm249_vm0, %v3955_v47 }
 0x820   : > { %5451 = vmatmul.mubr.msk.f32.gmra.mrb[114].mxu0 %vm249_vm0, %v3956_v17 }
 0x82b   : > { %v3888_v13 = vpop.permute.xlu1 %3887 }
 0x82c   : > { %v3886_v53 = vpop.permute.xlu0 %3885  ;;  %v3958_v35 = vsel %vm635_vm1, %v8771_v54, %v3888_v13 }
 0x82d   : > { %v3957_v7 = vsel %vm635_vm1, %v8770_v48, %v3886_v53 }
 0x82e   : > { %5453 = vmatprep.mubr.msk.f32.mxu0 %vm249_vm0, %v3957_v7 }
 0x82f   : > { %5454 = vmatmul.mubr.msk.f32.gmra.mrb[116].mxu0 %vm249_vm0, %v3958_v35  ;;  %v3892_v38 = vpop.permute.xlu1 %3891 }
 0x830   : > { %v3890_v9 = vpop.permute.xlu0 %3889  ;;  %v3960_v44 = vsel %vm635_vm1, %v8773_v59, %v3892_v38 }
 0x831   : > { %v3959_v40 = vsel %vm635_vm1, %v8772_v14, %v3890_v9 }
 0x832   : > { %5456 = vmatprep.mubr.msk.f32.mxu0 %vm249_vm0, %v3959_v40 }
 0x833   : > { %5457 = vmatmul.mubr.msk.f32.gmra.mrb[118].mxu0 %vm249_vm0, %v3960_v44  ;;  %v3896_v57 = vpop.permute.xlu1 %3895 }
 0x834   : > { %v3894_v61 = vpop.permute.xlu0 %3893  ;;  %v3962_v12 = vsel %vm635_vm1, %v8775_v50, %v3896_v57 }
 0x835   : > { %v3961_v32 = vsel %vm635_vm1, %v8774_v0, %v3894_v61 }
 0x836   : > { %5459 = vmatprep.mubr.msk.f32.mxu0 %vm249_vm0, %v3961_v32 }
 0x837   : > { %5460 = vmatmul.mubr.msk.f32.gmra.mrb[120].mxu0 %vm249_vm0, %v3962_v12  ;;  %v3900_v29 = vpop.permute.xlu1 %3899 }
 0x838   : > { %v3898_v8 = vpop.permute.xlu0 %3897  ;;  %v3964_v25 = vsel %vm635_vm1, %v8777_v20, %v3900_v29 }
 0x839   : > { %v3963_v37 = vsel %vm635_vm1, %v8776_v52, %v3898_v8 }
 0x83a   : > { %5462 = vmatprep.mubr.msk.f32.mxu0 %vm249_vm0, %v3963_v37 }
 0x83b   : > { %5463 = vmatmul.mubr.msk.f32.gmra.mrb[122].mxu0 %vm249_vm0, %v3964_v25 }
 0x86f   : > { %v5419_v26 = vpop.f32.mrb[92].mxu0 }
 0x870   : > { %4295 = vst.msk [vmem:[%s8439_s13 + $0x8] sm:$0xff] %vm249_vm0, %v5419_v26  ;;  %v4135_v39 = vpop.f32.mrb[93].mxu0 }
 0x871   : > { %4294 = vst.msk [vmem:[%s8439_s13] sm:$0xff] %vm249_vm0, %v4135_v39 }
 0x876   : > { %v5422_v11 = vpop.f32.mrb[94].mxu0 }
 0x877   : > { %4297 = vst.msk [vmem:[%s8439_s13 + $0x18] sm:$0xff] %vm249_vm0, %v5422_v11  ;;  %v4145_v30 = vpop.f32.mrb[95].mxu0 }
 0x878   : > { %4296 = vst.msk [vmem:[%s8439_s13 + $0x10] sm:$0xff] %vm249_vm0, %v4145_v30 }
 0x87a   : > { %v5425_v22 = vpop.f32.mrb[96].mxu0 }
 0x87b   : > { %4299 = vst.msk [vmem:[%s8439_s13 + $0x28] sm:$0xff] %vm249_vm0, %v5425_v22  ;;  %v4155_v45 = vpop.f32.mrb[97].mxu0 }
 0x87c   : > { %4298 = vst.msk [vmem:[%s8439_s13 + $0x20] sm:$0xff] %vm249_vm0, %v4155_v45 }
 0x87e   : > { %v5428_v6 = vpop.f32.mrb[98].mxu0 }
 0x87f   : > { %4301 = vst.msk [vmem:[%s8439_s13 + $0x38] sm:$0xff] %vm249_vm0, %v5428_v6  ;;  %v4165_v4 = vpop.f32.mrb[99].mxu0 }
 0x880   : > { %4300 = vst.msk [vmem:[%s8439_s13 + $0x30] sm:$0xff] %vm249_vm0, %v4165_v4 }
 0x8af   : > { %v5431_v49 = vpop.f32.mrb[100].mxu0 }
 0x8b0   : > { %4303 = vst.msk [vmem:[%s8439_s13 + $0x48] sm:$0xff] %vm249_vm0, %v5431_v49  ;;  %v4175_v42 = vpop.f32.mrb[101].mxu0 }
 0x8b1   : > { %4302 = vst.msk [vmem:[%s8439_s13 + $0x40] sm:$0xff] %vm249_vm0, %v4175_v42 }
 0x8b5   : > { %v5434_v63 = vpop.f32.mrb[102].mxu0 }
 0x8b6   : > { %4305 = vst.msk [vmem:[%s8439_s13 + $0x58] sm:$0xff] %vm249_vm0, %v5434_v63  ;;  %v4185_v16 = vpop.f32.mrb[103].mxu0 }
 0x8b7   : > { %4304 = vst.msk [vmem:[%s8439_s13 + $0x50] sm:$0xff] %vm249_vm0, %v4185_v16 }
 0x8bc   : > { %v5437_v55 = vpop.f32.mrb[104].mxu0 }
 0x8bd   : > { %4307 = vst.msk [vmem:[%s8439_s13 + $0x68] sm:$0xff] %vm249_vm0, %v5437_v55  ;;  %v4195_v62 = vpop.f32.mrb[105].mxu0 }
 0x8be   : > { %4306 = vst.msk [vmem:[%s8439_s13 + $0x60] sm:$0xff] %vm249_vm0, %v4195_v62 }
 0x8c4   : > { %v5440_v58 = vpop.f32.mrb[106].mxu0 }
 0x8c5   : > { %4309 = vst.msk [vmem:[%s8439_s13 + $0x78] sm:$0xff] %vm249_vm0, %v5440_v58  ;;  %v4205_v18 = vpop.f32.mrb[107].mxu0 }
 0x8c6   : > { %4308 = vst.msk [vmem:[%s8439_s13 + $0x70] sm:$0xff] %vm249_vm0, %v4205_v18 }
 0x8c8   : > { %v5443_v1 = vpop.f32.mrb[108].mxu0 }
 0x8c9   : > { %4311 = vst.msk [vmem:[%s8439_s13 + $0x88] sm:$0xff] %vm249_vm0, %v5443_v1  ;;  %v4215_v23 = vpop.f32.mrb[109].mxu0 }
 0x8ca   : > { %4310 = vst.msk [vmem:[%s8439_s13 + $0x80] sm:$0xff] %vm249_vm0, %v4215_v23 }
 0x8cc   : > { %v5446_v34 = vpop.f32.mrb[110].mxu0 }
 0x8cd   : > { %4313 = vst.msk [vmem:[%s8439_s13 + $0x98] sm:$0xff] %vm249_vm0, %v5446_v34  ;;  %v4225_v15 = vpop.f32.mrb[111].mxu0 }
 0x8ce   : > { %4312 = vst.msk [vmem:[%s8439_s13 + $0x90] sm:$0xff] %vm249_vm0, %v4225_v15 }
 0x8d0   : > { %v5449_v2 = vpop.f32.mrb[112].mxu0 }
 0x8d1   : > { %4315 = vst.msk [vmem:[%s8439_s13 + $0xa8] sm:$0xff] %vm249_vm0, %v5449_v2  ;;  %v4235_v60 = vpop.f32.mrb[113].mxu0 }
 0x8d2   : > { %4314 = vst.msk [vmem:[%s8439_s13 + $0xa0] sm:$0xff] %vm249_vm0, %v4235_v60 }
 0x8f3   : > { %v5452_v21 = vpop.f32.mrb[114].mxu0 }
 0x8f4   : > { %4317 = vst.msk [vmem:[%s8439_s13 + $0xb8] sm:$0xff] %vm249_vm0, %v5452_v21  ;;  %v4245_v36 = vpop.f32.mrb[115].mxu0 }
 0x8f5   : > { %4316 = vst.msk [vmem:[%s8439_s13 + $0xb0] sm:$0xff] %vm249_vm0, %v4245_v36 }
 0x902   : > { %v5455_v28 = vpop.f32.mrb[116].mxu0 }
 0x903   : > { %4319 = vst.msk [vmem:[%s8439_s13 + $0xc8] sm:$0xff] %vm249_vm0, %v5455_v28  ;;  %v4255_v3 = vpop.f32.mrb[117].mxu0 }
 0x904   : > { %4318 = vst.msk [vmem:[%s8439_s13 + $0xc0] sm:$0xff] %vm249_vm0, %v4255_v3 }
 0x906   : > { %v5458_v5 = vpop.f32.mrb[118].mxu0 }
 0x907   : > { %4321 = vst.msk [vmem:[%s8439_s13 + $0xd8] sm:$0xff] %vm249_vm0, %v5458_v5  ;;  %v4265_v56 = vpop.f32.mrb[119].mxu0 }
 0x908   : > { %4320 = vst.msk [vmem:[%s8439_s13 + $0xd0] sm:$0xff] %vm249_vm0, %v4265_v56 }
 0x90a   : > { %v5461_v46 = vpop.f32.mrb[120].mxu0 }
 0x90b   : > { %4323 = vst.msk [vmem:[%s8439_s13 + $0xe8] sm:$0xff] %vm249_vm0, %v5461_v46  ;;  %v4275_v24 = vpop.f32.mrb[121].mxu0 }
 0x90c   : > { %4322 = vst.msk [vmem:[%s8439_s13 + $0xe0] sm:$0xff] %vm249_vm0, %v4275_v24 }
 0x90e   : > { %v5464_v31 = vpop.f32.mrb[122].mxu0 }
 0x90f   : > { %4325 = vst.msk [vmem:[%s8439_s13 + $0xf8] sm:$0xff] %vm249_vm0, %v5464_v31  ;;  %v4285_v41 = vpop.f32.mrb[123].mxu0 }
 0x910   : > { %4324 = vst.msk [vmem:[%s8439_s13 + $0xf0] sm:$0xff] %vm249_vm0, %v4285_v41 }
 0x911 PF: > { %s14_s15 = sadd.s32 1, %s6339_s15  }
 0x912   : > { %p11_p4 = scmp.ge.s32.totalorder %s14_s15, 4  }
 0x914   :  { %13 = sbr.rel (!%p11_p4) target bundleno = 1 (0x1), region = 67 }

</bundles_post_ra>
